<compile_context>
chip_gen: v7x
topology: tpu7x:2x2x1
jax: 0.10.0
libtpu: 0.0.40
codegen_flags: <defaults>
</compile_context>

<pallas_src>
import functools

import jax
import jax.numpy as jnp
from jax import lax
from jax.experimental import pallas as pl
from jax.experimental.pallas import tpu as pltpu


# ----------------------------------------------------------------------------
# Chip-generation helpers (trace-time only)
# ----------------------------------------------------------------------------
def _vmem_limit_bytes():
    # ~80% of physical VMEM, capped at 100 MiB: ~51 MiB on v7x (64 MiB phys),
    # 100 MiB on v5e / v6e (128 MiB phys).  The default scoped VMEM limit
    # (16-32 MiB) is far below what these chips actually have.
    cap = 128 * 1024 * 1024
    try:
        cap = int(pltpu.get_tpu_info().vmem_capacity_bytes)
    except Exception:
        pass
    return int(min(cap * 4 // 5, 100 * 1024 * 1024))


def _tensorcores_per_chip():
    # Only v7x exposes 2 TensorCores to a single Pallas kernel here; on
    # v5e/v6e a "parallel" batch split is just a sequential loop that
    # duplicates weight DMA, so report 1 there.
    # TODO(synk): switch to pltpu.get_tpu_info() once it exposes the TC count.
    try:
        kind = jax.devices()[0].device_kind.lower()
    except Exception:
        return 1
    return 2 if ("v7" in kind or "7x" in kind) else 1


# ----------------------------------------------------------------------------
# In-kernel helpers
# ----------------------------------------------------------------------------
def _layernorm(x, w, b, eps=1e-5):
    # PyTorch nn.LayerNorm semantics (biased variance, eps inside rsqrt).
    mu = jnp.mean(x, axis=-1, keepdims=True)
    var = jnp.mean(jnp.square(x - mu), axis=-1, keepdims=True)
    return (x - mu) * lax.rsqrt(var + eps) * w + b


def _round_up(x, m):
    return ((x + m - 1) // m) * m


# ----------------------------------------------------------------------------
# Kernel 1: patch-embedding matmul (synthetic visual encoder hot path)
# ----------------------------------------------------------------------------
def patch_embed_kernel(p_ref, w_ref, b_ref, out_ref):
    out_ref[...] = (
        jnp.dot(p_ref[...], w_ref[...], preferred_element_type=jnp.float32)
        + b_ref[...]
    ).astype(out_ref.dtype)


def patch_embed(patches, w, b, *, tile_n=512):
    # patches: (N, C*ps*ps) -> tokens (N, D) in bf16.  This kernel is
    # memory-bound: large row tiles (512) sit near the HBM roofline and
    # amortize the ~0.35 us/step grid overhead.
    N, P = patches.shape
    D = w.shape[1]
    tile_n = min(tile_n, _round_up(N, 8))
    Np = _round_up(N, tile_n)
    if Np != N:
        patches = jnp.pad(patches, ((0, Np - N), (0, 0)))
    tokens = pl.pallas_call(
        patch_embed_kernel,
        out_shape=jax.ShapeDtypeStruct((Np, D), jnp.bfloat16),
        grid=(Np // tile_n,),
        in_specs=[
            pl.BlockSpec((tile_n, P), lambda i: (i, 0)),
            # Constant-index weight/bias blocks (fetched once across the grid).
            # TODO(synk): single-buffer these (pipeline_mode=pl.Buffered(1))
            #             once verified; frees one weight-sized VMEM buffer.
            pl.BlockSpec((P, D), lambda i: (0, 0)),
            pl.BlockSpec((1, D), lambda i: (0, 0)),
        ],
        out_specs=pl.BlockSpec((tile_n, D), lambda i: (i, 0)),
        compiler_params=pltpu.CompilerParams(
            dimension_semantics=("parallel",),
            vmem_limit_bytes=_vmem_limit_bytes()),
    )(patches.astype(jnp.bfloat16), w, b.reshape(1, D))
    return tokens[:N]


# ----------------------------------------------------------------------------
# Kernel 2: fused PerceiverResampler, layer-streamed over a depth grid axis
# ----------------------------------------------------------------------------
def resampler_kernel(x_ref, lat0_ref, ln_ref, fln_ref,
                     wq_ref, wkv_ref, wout_ref, w1_ref, w2_ref,
                     out_ref, lat_ref, *, heads, dim_head, sb, v_tok, n_lat):
    layer = pl.program_id(1)
    inner = heads * dim_head

    # -------- init latents once per sample tile (layer 0) --------
    @pl.when(layer == 0)
    def _():
        lat0 = lat0_ref[...].astype(jnp.float32)              # (n, d)
        lat_ref[...] = jnp.concatenate([lat0] * sb, axis=0)   # (sb*n, d)

    x = x_ref[...].astype(jnp.float32)     # (sb*v, d) media tokens (resident)
    lat = lat_ref[...]                     # (sb*n, d) f32 latents accumulator
    d = lat.shape[-1]

    lns = ln_ref[0].astype(jnp.float32)    # (6, d) this layer's LN params

    # ---------------- PerceiverAttention ----------------
    xn = _layernorm(x, lns[0:1], lns[1:2])        # norm_media
    latn = _layernorm(lat, lns[2:3], lns[3:4])    # norm_latents

    wq = wq_ref[0]       # (d, inner)  bf16, 1/sqrt(dh) pre-folded
    wkv = wkv_ref[0]     # (d, 2*inner) bf16
    wout = wout_ref[0]   # (inner, d)  bf16

    # Big MXU projections over all samples at once; media / latent KV are
    # projected separately (no [media; latents] row-concat copy per layer).
    q = jnp.dot(latn.astype(jnp.bfloat16), wq,
                preferred_element_type=jnp.float32)            # (sb*n, inner)
    kv_m = jnp.dot(xn.astype(jnp.bfloat16), wkv,
                   preferred_element_type=jnp.float32)         # (sb*v, 2*inner)
    kv_l = jnp.dot(latn.astype(jnp.bfloat16), wkv,
                   preferred_element_type=jnp.float32)         # (sb*n, 2*inner)

    # Per-sample attention: linear in batch, no cross-sample mask needed.
    # TODO(synk): at CLIP scale (heads=8, dh=64, large sb) move heads onto a
    #             grid axis / batched dot_general to avoid the per-head lane
    #             slices and the static per-sample unroll.
    attn_rows = []
    for s in range(sb):
        q_s = q[s * n_lat:(s + 1) * n_lat, :]                  # (n, inner)
        kvm_s = kv_m[s * v_tok:(s + 1) * v_tok, :]             # (v, 2*inner)
        kvl_s = kv_l[s * n_lat:(s + 1) * n_lat, :]             # (n, 2*inner)
        k_s = jnp.concatenate([kvm_s[:, :inner], kvl_s[:, :inner]], axis=0)
        v_s = jnp.concatenate([kvm_s[:, inner:], kvl_s[:, inner:]], axis=0)
        o_s = jnp.zeros((n_lat, d), jnp.float32)
        for h in range(heads):
            lo, hi = h * dim_head, (h + 1) * dim_head
            sim = lax.dot_general(
                q_s[:, lo:hi].astype(jnp.bfloat16),
                k_s[:, lo:hi].astype(jnp.bfloat16),
                (((1,), (1,)), ((), ())),
                preferred_element_type=jnp.float32)            # (n, v+n)
            m = jnp.max(sim, axis=-1, keepdims=True)
            p = jnp.exp(sim - m)
            p = p * pl.reciprocal(jnp.sum(p, axis=-1, keepdims=True),
                                  approx=True)                 # EUP recip
            oh = jnp.dot(p.astype(jnp.bfloat16),
                         v_s[:, lo:hi].astype(jnp.bfloat16),
                         preferred_element_type=jnp.float32)   # (n, dh)
            # Fold the per-head output straight into the output projection
            # (no lane-axis concat of head outputs).
            o_s = o_s + jnp.dot(oh.astype(jnp.bfloat16), wout[lo:hi, :],
                                preferred_element_type=jnp.float32)
        attn_rows.append(o_s)
    lat = lat + jnp.concatenate(attn_rows, axis=0)             # residual

    # ---------------- FeedForward ----------------
    hn = _layernorm(lat, lns[4:5], lns[5:6])
    h1 = jnp.dot(hn.astype(jnp.bfloat16), w1_ref[0],
                 preferred_element_type=jnp.float32)
    # TODO(synk): PyTorch nn.GELU() is exact (erf); tanh approximation used
    #             in-kernel (difference ~1e-3) to stay on supported TPU ops.
    h1 = jax.nn.gelu(h1, approximate=True)
    lat = lat + jnp.dot(h1.astype(jnp.bfloat16), w2_ref[0],
                        preferred_element_type=jnp.float32)    # residual

    lat_ref[...] = lat                      # carry latents to the next layer

    # ---------------- final LayerNorm + single store ----------------
    @pl.when(layer == pl.num_programs(1) - 1)
    def _():
        fln = fln_ref[...].astype(jnp.float32)                 # (2, d)
        out_ref[...] = _layernorm(lat, fln[0:1], fln[1:2]).astype(out_ref.dtype)


def fused_resampler_call(x2d, p, cfg, *, bt, v_tok):
    d = cfg["embedding_dim"]
    n = cfg["num_latents"]
    heads, dh = cfg["heads"], cfg["dim_head"]
    inner = heads * dh
    hidden = cfg["ff_mult"] * d
    depth = cfg["depth"]

    # 2-way "parallel" split of the sample axis only where two TensorCores are
    # actually available (v7x) and the resulting blocks stay sublane-aligned;
    # on single-TC chips (v5e/v6e) the split would only add grid overhead and
    # duplicate weight DMA.
    num_tiles = 1
    if (_tensorcores_per_chip() >= 2 and bt % 2 == 0
            and ((bt // 2) * v_tok) % 8 == 0 and ((bt // 2) * n) % 8 == 0):
        num_tiles = 2
    sb = bt // num_tiles

    kern = functools.partial(resampler_kernel, heads=heads, dim_head=dh,
                             sb=sb, v_tok=v_tok, n_lat=n)
    return pl.pallas_call(
        kern,
        out_shape=jax.ShapeDtypeStruct((bt * n, d), jnp.float32),
        # depth is an "arbitrary" (inner) grid axis: one layer of weights is
        # streamed per step while media tokens / latents stay VMEM-resident,
        # so layer d+1 weight DMA overlaps layer d compute.
        grid=(num_tiles, depth),
        in_specs=[
            pl.BlockSpec((sb * v_tok, d), lambda i, l: (i, 0)),       # media tokens
            pl.BlockSpec((n, d), lambda i, l: (0, 0)),                # initial latents
            pl.BlockSpec((1, 6, d), lambda i, l: (l, 0, 0)),          # per-layer LN
            pl.BlockSpec((2, d), lambda i, l: (0, 0)),                # final LN
            pl.BlockSpec((1, d, inner), lambda i, l: (l, 0, 0)),      # W_q (scaled)
            pl.BlockSpec((1, d, 2 * inner), lambda i, l: (l, 0, 0)),  # W_kv
            pl.BlockSpec((1, inner, d), lambda i, l: (l, 0, 0)),      # W_out
            pl.BlockSpec((1, d, hidden), lambda i, l: (l, 0, 0)),     # FF W1
            pl.BlockSpec((1, hidden, d), lambda i, l: (l, 0, 0)),     # FF W2
        ],
        out_specs=pl.BlockSpec((sb * n, d), lambda i, l: (i, 0)),
        scratch_shapes=[pltpu.VMEM((sb * n, d), jnp.float32)],        # latents acc
        compiler_params=pltpu.CompilerParams(
            dimension_semantics=("parallel", "arbitrary"),
            vmem_limit_bytes=_vmem_limit_bytes()),
    )(x2d, p["latents"], p["ln"], p["final_ln"],
      p["wq"], p["wkv"], p["wout"], p["w1"], p["w2"])


# ----------------------------------------------------------------------------
# Glue (plain JAX): patch extraction, reshapes, parameter plumbing
# ----------------------------------------------------------------------------
def _patchify(imgs, ps):
    # imgs: (N, C, H, W) NCHW -> (N*hp*wp, C*ps*ps), patch flattened in
    # (c, kh, kw) order (matches Conv2d(stride=ps) weight flattening).
    # TODO(synk): fold this transpose into the patch-embed BlockSpec (or fuse
    #             the patch embed into the resampler media path) to avoid an
    #             extra HBM round trip at real image scale.
    N, C, H, W = imgs.shape
    hp, wp = H // ps, W // ps
    x = imgs.reshape(N, C, hp, ps, wp, ps)
    x = x.transpose(0, 2, 4, 1, 3, 5)          # (N, hp, wp, C, ps, ps)
    return x.reshape(N * hp * wp, C * ps * ps)


def encode_depth_sensor(x, enc_params, cfg):
    # x: (b, T, F, 3, H, W)  -> (b, T, F, patch_num, embedding_dim)
    b, T, F = x.shape[:3]
    imgs = x.reshape((-1,) + x.shape[3:])                        # (b*T*F, 3, H, W)
    ps = cfg["patch_size"]
    v = (imgs.shape[2] // ps) * (imgs.shape[3] // ps)
    patches = _patchify(imgs, ps)                                # (b*T*F*v, C*ps*ps)
    tokens = patch_embed(patches, enc_params["w"], enc_params["b"])
    return tokens.reshape(b, T, F, v, cfg["embedding_dim"])


def perceiver_resampler(feats, p, cfg):
    # feats: (b, T, F, v, d) -> (b, T, num_latents, d)
    b, T, F, v, d = feats.shape
    n = cfg["num_latents"]
    x2d = feats.reshape(b * T * F * v, d)      # sample-major token rows
    out2d = fused_resampler_call(x2d, p, cfg, bt=b * T, v_tok=F * v)
    return out2d.reshape(b, T, n, d)


def depth_model_forward(params, depth_static, depth_gripper, *, cfg):
    # depth_static / depth_gripper: (B, T, 1, 1, 3, H, W)
    # Batch both camera branches into ONE encoder call + ONE resampler call
    # (the PyTorch module applies the same shared weights to both).
    x = jnp.concatenate([
        depth_static.reshape((-1,) + depth_static.shape[2:]),
        depth_gripper.reshape((-1,) + depth_gripper.shape[2:]),
    ], axis=0)                                                    # (2*B*T, 1, 1, 3, H, W)
    feats = encode_depth_sensor(x, params["encoder"], cfg)        # (2*B*T, 1, 1, v, d)
    lat = perceiver_resampler(feats, params["perceiver"], cfg)    # (2*B*T, 1, n, d)
    out_static, out_gripper = jnp.split(lat, 2, axis=0)
    return out_static, out_gripper


# ----------------------------------------------------------------------------
# Deterministic parameter init (per-layer stacked, bf16 pre-cast, scale folded)
# ----------------------------------------------------------------------------
def init_depth_model_params(key, cfg):
    D = cfg["embedding_dim"]
    ps = cfg["patch_size"]
    inner = cfg["heads"] * cfg["dim_head"]
    hidden = cfg["ff_mult"] * D
    depth = cfg["depth"]
    scale = cfg["dim_head"] ** -0.5
    k_enc, k_lat, k_wq, k_wkv, k_wout, k_w1, k_w2 = jax.random.split(key, 7)

    def nrm(k, shape):
        return 0.02 * jax.random.normal(k, shape, jnp.float32)

    ones = jnp.ones((D,), jnp.float32)
    zeros = jnp.zeros((D,), jnp.float32)
    # per-layer LayerNorm params: [norm_media w,b | norm_latents w,b | ff-LN w,b]
    ln_layer = jnp.stack([ones, zeros, ones, zeros, ones, zeros])  # (6, D)

    # Weights are stored pre-cast to bf16 (MXU operand dtype) and the
    # 1/sqrt(dim_head) softmax scale is pre-folded into W_q, so the jitted
    # forward performs no per-call weight cast/scale passes over HBM.
    return {
        "encoder": {
            "w": nrm(k_enc, (3 * ps * ps, D)).astype(jnp.bfloat16),
            "b": jnp.zeros((D,), jnp.float32),
        },
        "perceiver": {
            "latents": jax.random.normal(k_lat, (cfg["num_latents"], D), jnp.float32),
            "ln": jnp.broadcast_to(ln_layer[None], (depth, 6, D)),
            "wq": (nrm(k_wq, (depth, D, inner)) * scale).astype(jnp.bfloat16),
            "wkv": nrm(k_wkv, (depth, D, 2 * inner)).astype(jnp.bfloat16),
            "wout": nrm(k_wout, (depth, inner, D)).astype(jnp.bfloat16),
            "w1": nrm(k_w1, (depth, D, hidden)).astype(jnp.bfloat16),
            "w2": nrm(k_w2, (depth, hidden, D)).astype(jnp.bfloat16),
            "final_ln": jnp.stack([ones, zeros]),                  # (2, D)
        },
    }


# ----------------------------------------------------------------------------
# Main
# ----------------------------------------------------------------------------
if __name__ == "__main__":
    cfg = dict(
        embedding_dim=32,   # PerceiverResampler dim (== vision embedding dim)
        patch_size=8,
        heads=2,
        dim_head=16,
        num_latents=4,
        depth=2,
        ff_mult=2,
    )
    key = jax.random.PRNGKey(0)
    kp, ks, kg = jax.random.split(key, 3)
    params = init_depth_model_params(kp, cfg)

    B, T, H, W = 2, 2, 16, 16
    depth_static = jax.random.normal(ks, (B, T, 1, 1, 3, H, W), jnp.float32)
    depth_gripper = jax.random.normal(kg, (B, T, 1, 1, 3, H, W), jnp.float32)

    fwd = jax.jit(functools.partial(depth_model_forward, cfg=cfg))
    out_static, out_gripper = fwd(params, depth_static, depth_gripper)
    jax.block_until_ready((out_static, out_gripper))

    assert out_static.shape == (B * T, 1, cfg["num_latents"], cfg["embedding_dim"])
    assert out_gripper.shape == (B * T, 1, cfg["num_latents"], cfg["embedding_dim"])
    assert bool(jnp.all(jnp.isfinite(out_static))) and bool(jnp.all(jnp.isfinite(out_gripper)))
    print("KERNEL_OK")
</pallas_src>

<mosaic_0001>
module attributes {stable_mosaic.version = 11 : i64} {
  func.func @patch_embed_kernel(%arg0: i32, %arg1: memref<32x192xbf16, #tpu.memory_space<vmem>>, %arg2: memref<192x32xbf16, #tpu.memory_space<vmem>>, %arg3: memref<1x32xf32, #tpu.memory_space<vmem>>, %arg4: memref<32x32xbf16, #tpu.memory_space<vmem>>) attributes {dimension_semantics = [#tpu.dimension_semantics<parallel>], iteration_bounds = array<i64: 1>, scalar_prefetch = 0 : i64, scratch_operands = 0 : i64, tpu.core_type = #tpu.core_type<tc>, window_params = [{transform_indices = @transform_0, window_bounds = array<i64: 32, 192>}, {pipeline_mode = #tpu.pipeline_mode<synchronous>, transform_indices = @transform_1, window_bounds = array<i64: 192, 32>}, {pipeline_mode = #tpu.pipeline_mode<synchronous>, transform_indices = @transform_2, window_bounds = array<i64: 1, 32>}, {transform_indices = @transform_3, window_bounds = array<i64: 32, 32>}]} {
    %c0 = arith.constant 0 : index
    %c0_0 = arith.constant 0 : index
    %0 = vector.load %arg1[%c0, %c0_0] : memref<32x192xbf16, #tpu.memory_space<vmem>>, vector<32x192xbf16>
    %c0_1 = arith.constant 0 : index
    %c0_2 = arith.constant 0 : index
    %1 = vector.load %arg2[%c0_1, %c0_2] : memref<192x32xbf16, #tpu.memory_space<vmem>>, vector<192x32xbf16>
    %cst = arith.constant dense<0.000000e+00> : vector<32x32xf32>
    %2 = tpu.matmul %0, %1, %cst {dimension_numbers = #tpu.dot_dimension_numbers<[1], [0], [0], [1], [0, 0, 1, 1], [], []>} : vector<32x192xbf16>, vector<192x32xbf16>, vector<32x32xf32> -> vector<32x32xf32>
    %c0_3 = arith.constant 0 : index
    %c0_4 = arith.constant 0 : index
    %3 = vector.load %arg3[%c0_3, %c0_4] : memref<1x32xf32, #tpu.memory_space<vmem>>, vector<1x32xf32>
    %4 = vector.broadcast %3 : vector<1x32xf32> to vector<32x32xf32>
    %5 = arith.addf %2, %4 : vector<32x32xf32>
    %6 = arith.truncf %5 : vector<32x32xf32> to vector<32x32xbf16>
    %c0_5 = arith.constant 0 : index
    %c0_6 = arith.constant 0 : index
    %7 = vector.load %arg4[%c0_5, %c0_6] : memref<32x32xbf16, #tpu.memory_space<vmem>>, vector<32x32xbf16>
    tpu.vector_store %arg4[%c0_5, %c0_6], %6 {strides = array<i32>} : memref<32x32xbf16, #tpu.memory_space<vmem>>, vector<32x32xbf16>,
    return
  }
  func.func @transform_0(%arg0: i32) -> (i32, i32) {
    %c0_i32 = arith.constant 0 : i32
    %c0_i32_0 = arith.constant 0 : i32
    return %arg0, %c0_i32 : i32, i32
  }
  func.func @transform_1(%arg0: i32) -> (i32, i32) {
    %c0_i32 = arith.constant 0 : i32
    %c0_i32_0 = arith.constant 0 : i32
    %c0_i32_1 = arith.constant 0 : i32
    return %c0_i32, %c0_i32_0 : i32, i32
  }
  func.func @transform_2(%arg0: i32) -> (i32, i32) {
    %c0_i32 = arith.constant 0 : i32
    %c0_i32_0 = arith.constant 0 : i32
    %c0_i32_1 = arith.constant 0 : i32
    return %c0_i32, %c0_i32_0 : i32, i32
  }
  func.func @transform_3(%arg0: i32) -> (i32, i32) {
    %c0_i32 = arith.constant 0 : i32
    %c0_i32_0 = arith.constant 0 : i32
    return %arg0, %c0_i32 : i32, i32
  }
}

module attributes {stable_mosaic.version = 11 : i64} {
  func.func @resampler_kernel(%arg0: i32, %arg1: i32, %arg2: memref<32x32xbf16, #tpu.memory_space<vmem>>, %arg3: memref<4x32xf32, #tpu.memory_space<vmem>>, %arg4: memref<1x6x32xf32, #tpu.memory_space<vmem>>, %arg5: memref<2x32xf32, #tpu.memory_space<vmem>>, %arg6: memref<1x32x32xbf16, #tpu.memory_space<vmem>>, %arg7: memref<1x32x64xbf16, #tpu.memory_space<vmem>>, %arg8: memref<1x32x32xbf16, #tpu.memory_space<vmem>>, %arg9: memref<1x32x64xbf16, #tpu.memory_space<vmem>>, %arg10: memref<1x64x32xbf16, #tpu.memory_space<vmem>>, %arg11: memref<32x32xf32, #tpu.memory_space<vmem>>, %arg12: memref<32x32xf32, #tpu.memory_space<vmem>>) attributes {dimension_semantics = [#tpu.dimension_semantics<parallel>, #tpu.dimension_semantics<arbitrary>], iteration_bounds = array<i64: 1, 2>, scalar_prefetch = 0 : i64, scratch_operands = 1 : i64, tpu.core_type = #tpu.core_type<tc>, window_params = [{transform_indices = @transform_0, window_bounds = array<i64: 32, 32>}, {pipeline_mode = #tpu.pipeline_mode<synchronous>, transform_indices = @transform_1, window_bounds = array<i64: 4, 32>}, {transform_indices = @transform_2, window_bounds = array<i64: 1, 6, 32>}, {pipeline_mode = #tpu.pipeline_mode<synchronous>, transform_indices = @transform_3, window_bounds = array<i64: 2, 32>}, {transform_indices = @transform_4, window_bounds = array<i64: 1, 32, 32>}, {transform_indices = @transform_5, window_bounds = array<i64: 1, 32, 64>}, {transform_indices = @transform_6, window_bounds = array<i64: 1, 32, 32>}, {transform_indices = @transform_7, window_bounds = array<i64: 1, 32, 64>}, {transform_indices = @transform_8, window_bounds = array<i64: 1, 64, 32>}, {transform_indices = @transform_9, window_bounds = array<i64: 32, 32>}]} {
    %c0_i32 = arith.constant 0 : i32
    %0 = arith.cmpi eq, %arg1, %c0_i32 : i32
    %1 = arith.extui %0 : i1 to i32
    %c0_i32_0 = arith.constant 0 : i32
    %2 = arith.cmpi ne, %1, %c0_i32_0 : i32
    scf.if %2 {
      %c0_136 = arith.constant 0 : index
      %c0_137 = arith.constant 0 : index
      %568 = vector.load %arg3[%c0_136, %c0_137] : memref<4x32xf32, #tpu.memory_space<vmem>>, vector<4x32xf32>
      %569 = tpu.concatenate %568, %568, %568, %568, %568, %568, %568, %568 in 0 : vector<4x32xf32>, vector<4x32xf32>, vector<4x32xf32>, vector<4x32xf32>, vector<4x32xf32>, vector<4x32xf32>, vector<4x32xf32>, vector<4x32xf32> -> vector<32x32xf32>
      %c0_138 = arith.constant 0 : index
      %c0_139 = arith.constant 0 : index
      %570 = vector.load %arg12[%c0_138, %c0_139] : memref<32x32xf32, #tpu.memory_space<vmem>>, vector<32x32xf32>
      tpu.vector_store %arg12[%c0_138, %c0_139], %569 {strides = array<i32>} : memref<32x32xf32, #tpu.memory_space<vmem>>, vector<32x32xf32>,
    } else {
    }
    %c0 = arith.constant 0 : index
    %c0_1 = arith.constant 0 : index
    %3 = vector.load %arg2[%c0, %c0_1] : memref<32x32xbf16, #tpu.memory_space<vmem>>, vector<32x32xbf16>
    %4 = arith.extf %3 : vector<32x32xbf16> to vector<32x32xf32>
    %c0_2 = arith.constant 0 : index
    %c0_3 = arith.constant 0 : index
    %5 = vector.load %arg12[%c0_2, %c0_3] : memref<32x32xf32, #tpu.memory_space<vmem>>, vector<32x32xf32>
    %c0_4 = arith.constant 0 : index
    %c0_5 = arith.constant 0 : index
    %c0_6 = arith.constant 0 : index
    %6 = vector.load %arg4[%c0_4, %c0_5, %c0_6] : memref<1x6x32xf32, #tpu.memory_space<vmem>>, vector<1x6x32xf32>
    %7 = vector.shape_cast %6 : vector<1x6x32xf32> to vector<6x32xf32>
    %8 = vector.extract_strided_slice %7 {offsets = [0, 0], sizes = [1, 32], strides = [1, 1]} : vector<6x32xf32> to vector<1x32xf32>
    %9 = vector.extract_strided_slice %7 {offsets = [1, 0], sizes = [1, 32], strides = [1, 1]} : vector<6x32xf32> to vector<1x32xf32>
    %cst = arith.constant dense<0.000000e+00> : vector<32xf32>
    %10 = vector.multi_reduction <add>, %4, %cst [1] : vector<32x32xf32> to vector<32xf32>
    %11 = vector.shape_cast %10 : vector<32xf32> to vector<32x1xf32>
    %cst_7 = arith.constant 3.200000e+01 : f32
    %12 = vector.broadcast %cst_7 : f32 to vector<32x1xf32>
    %13 = arith.divf %11, %12 : vector<32x1xf32>
    %14 = vector.broadcast %13 : vector<32x1xf32> to vector<32x32xf32>
    %15 = arith.subf %4, %14 : vector<32x32xf32>
    %16 = arith.mulf %15, %15 : vector<32x32xf32>
    %cst_8 = arith.constant dense<0.000000e+00> : vector<32xf32>
    %17 = vector.multi_reduction <add>, %16, %cst_8 [1] : vector<32x32xf32> to vector<32xf32>
    %18 = vector.shape_cast %17 : vector<32xf32> to vector<32x1xf32>
    %cst_9 = arith.constant 3.200000e+01 : f32
    %19 = vector.broadcast %cst_9 : f32 to vector<32x1xf32>
    %20 = arith.divf %18, %19 : vector<32x1xf32>
    %21 = vector.broadcast %13 : vector<32x1xf32> to vector<32x32xf32>
    %22 = arith.subf %4, %21 : vector<32x32xf32>
    %cst_10 = arith.constant 9.99999974E-6 : f32
    %23 = vector.broadcast %cst_10 : f32 to vector<32x1xf32>
    %24 = arith.addf %20, %23 : vector<32x1xf32>
    %25 = math.rsqrt %24 : vector<32x1xf32>
    %26 = vector.broadcast %25 : vector<32x1xf32> to vector<32x32xf32>
    %27 = arith.mulf %22, %26 : vector<32x32xf32>
    %28 = vector.broadcast %8 : vector<1x32xf32> to vector<32x32xf32>
    %29 = arith.mulf %27, %28 : vector<32x32xf32>
    %30 = vector.broadcast %9 : vector<1x32xf32> to vector<32x32xf32>
    %31 = arith.addf %29, %30 : vector<32x32xf32>
    %32 = vector.extract_strided_slice %7 {offsets = [2, 0], sizes = [1, 32], strides = [1, 1]} : vector<6x32xf32> to vector<1x32xf32>
    %33 = vector.extract_strided_slice %7 {offsets = [3, 0], sizes = [1, 32], strides = [1, 1]} : vector<6x32xf32> to vector<1x32xf32>
    %cst_11 = arith.constant dense<0.000000e+00> : vector<32xf32>
    %34 = vector.multi_reduction <add>, %5, %cst_11 [1] : vector<32x32xf32> to vector<32xf32>
    %35 = vector.shape_cast %34 : vector<32xf32> to vector<32x1xf32>
    %cst_12 = arith.constant 3.200000e+01 : f32
    %36 = vector.broadcast %cst_12 : f32 to vector<32x1xf32>
    %37 = arith.divf %35, %36 : vector<32x1xf32>
    %38 = vector.broadcast %37 : vector<32x1xf32> to vector<32x32xf32>
    %39 = arith.subf %5, %38 : vector<32x32xf32>
    %40 = arith.mulf %39, %39 : vector<32x32xf32>
    %cst_13 = arith.constant dense<0.000000e+00> : vector<32xf32>
    %41 = vector.multi_reduction <add>, %40, %cst_13 [1] : vector<32x32xf32> to vector<32xf32>
    %42 = vector.shape_cast %41 : vector<32xf32> to vector<32x1xf32>
    %cst_14 = arith.constant 3.200000e+01 : f32
    %43 = vector.broadcast %cst_14 : f32 to vector<32x1xf32>
    %44 = arith.divf %42, %43 : vector<32x1xf32>
    %45 = vector.broadcast %37 : vector<32x1xf32> to vector<32x32xf32>
    %46 = arith.subf %5, %45 : vector<32x32xf32>
    %cst_15 = arith.constant 9.99999974E-6 : f32
    %47 = vector.broadcast %cst_15 : f32 to vector<32x1xf32>
    %48 = arith.addf %44, %47 : vector<32x1xf32>
    %49 = math.rsqrt %48 : vector<32x1xf32>
    %50 = vector.broadcast %49 : vector<32x1xf32> to vector<32x32xf32>
    %51 = arith.mulf %46, %50 : vector<32x32xf32>
    %52 = vector.broadcast %32 : vector<1x32xf32> to vector<32x32xf32>
    %53 = arith.mulf %51, %52 : vector<32x32xf32>
    %54 = vector.broadcast %33 : vector<1x32xf32> to vector<32x32xf32>
    %55 = arith.addf %53, %54 : vector<32x32xf32>
    %c0_16 = arith.constant 0 : index
    %c0_17 = arith.constant 0 : index
    %c0_18 = arith.constant 0 : index
    %56 = vector.load %arg6[%c0_16, %c0_17, %c0_18] : memref<1x32x32xbf16, #tpu.memory_space<vmem>>, vector<1x32x32xbf16>
    %57 = vector.shape_cast %56 : vector<1x32x32xbf16> to vector<32x32xbf16>
    %c0_19 = arith.constant 0 : index
    %c0_20 = arith.constant 0 : index
    %c0_21 = arith.constant 0 : index
    %58 = vector.load %arg7[%c0_19, %c0_20, %c0_21] : memref<1x32x64xbf16, #tpu.memory_space<vmem>>, vector<1x32x64xbf16>
    %59 = vector.shape_cast %58 : vector<1x32x64xbf16> to vector<32x64xbf16>
    %c0_22 = arith.constant 0 : index
    %c0_23 = arith.constant 0 : index
    %c0_24 = arith.constant 0 : index
    %60 = vector.load %arg8[%c0_22, %c0_23, %c0_24] : memref<1x32x32xbf16, #tpu.memory_space<vmem>>, vector<1x32x32xbf16>
    %61 = vector.shape_cast %60 : vector<1x32x32xbf16> to vector<32x32xbf16>
    %62 = arith.truncf %55 : vector<32x32xf32> to vector<32x32xbf16>
    %cst_25 = arith.constant dense<0.000000e+00> : vector<32x32xf32>
    %63 = tpu.matmul %62, %57, %cst_25 {dimension_numbers = #tpu.dot_dimension_numbers<[1], [0], [0], [1], [0, 0, 1, 1], [], []>} : vector<32x32xbf16>, vector<32x32xbf16>, vector<32x32xf32> -> vector<32x32xf32>
    %64 = arith.truncf %31 : vector<32x32xf32> to vector<32x32xbf16>
    %cst_26 = arith.constant dense<0.000000e+00> : vector<32x64xf32>
    %65 = tpu.matmul %64, %59, %cst_26 {dimension_numbers = #tpu.dot_dimension_numbers<[1], [0], [0], [1], [0, 0, 1, 1], [], []>} : vector<32x32xbf16>, vector<32x64xbf16>, vector<32x64xf32> -> vector<32x64xf32>
    %66 = arith.truncf %55 : vector<32x32xf32> to vector<32x32xbf16>
    %cst_27 = arith.constant dense<0.000000e+00> : vector<32x64xf32>
    %67 = tpu.matmul %66, %59, %cst_27 {dimension_numbers = #tpu.dot_dimension_numbers<[1], [0], [0], [1], [0, 0, 1, 1], [], []>} : vector<32x32xbf16>, vector<32x64xbf16>, vector<32x64xf32> -> vector<32x64xf32>
    %68 = vector.extract_strided_slice %63 {offsets = [0, 0], sizes = [4, 32], strides = [1, 1]} : vector<32x32xf32> to vector<4x32xf32>
    %69 = vector.extract_strided_slice %65 {offsets = [0, 0], sizes = [4, 64], strides = [1, 1]} : vector<32x64xf32> to vector<4x64xf32>
    %70 = vector.extract_strided_slice %67 {offsets = [0, 0], sizes = [4, 64], strides = [1, 1]} : vector<32x64xf32> to vector<4x64xf32>
    %71 = vector.extract_strided_slice %69 {offsets = [0, 0], sizes = [4, 32], strides = [1, 1]} : vector<4x64xf32> to vector<4x32xf32>
    %72 = vector.extract_strided_slice %70 {offsets = [0, 0], sizes = [4, 32], strides = [1, 1]} : vector<4x64xf32> to vector<4x32xf32>
    %73 = tpu.concatenate %71, %72 in 0 : vector<4x32xf32>, vector<4x32xf32> -> vector<8x32xf32>
    %74 = vector.extract_strided_slice %69 {offsets = [0, 32], sizes = [4, 32], strides = [1, 1]} : vector<4x64xf32> to vector<4x32xf32>
    %75 = vector.extract_strided_slice %70 {offsets = [0, 32], sizes = [4, 32], strides = [1, 1]} : vector<4x64xf32> to vector<4x32xf32>
    %76 = tpu.concatenate %74, %75 in 0 : vector<4x32xf32>, vector<4x32xf32> -> vector<8x32xf32>
    %cst_28 = arith.constant 0.000000e+00 : f32
    %77 = vector.broadcast %cst_28 : f32 to vector<4x32xf32>
    %78 = vector.extract_strided_slice %68 {offsets = [0, 0], sizes = [4, 16], strides = [1, 1]} : vector<4x32xf32> to vector<4x16xf32>
    %79 = arith.truncf %78 : vector<4x16xf32> to vector<4x16xbf16>
    %80 = vector.extract_strided_slice %73 {offsets = [0, 0], sizes = [8, 16], strides = [1, 1]} : vector<8x32xf32> to vector<8x16xf32>
    %81 = arith.truncf %80 : vector<8x16xf32> to vector<8x16xbf16>
    %cst_29 = arith.constant dense<0.000000e+00> : vector<4x8xf32>
    %82 = tpu.matmul %79, %81, %cst_29 {dimension_numbers = #tpu.dot_dimension_numbers<[1], [1], [0], [0], [0, 0, 1, 0], [], []>} : vector<4x16xbf16>, vector<8x16xbf16>, vector<4x8xf32> -> vector<4x8xf32>
    %cst_30 = arith.constant dense<0xFF800000> : vector<4xf32>
    %83 = vector.multi_reduction <maximumf>, %82, %cst_30 [1] : vector<4x8xf32> to vector<4xf32>
    %84 = vector.shape_cast %83 : vector<4xf32> to vector<4x1xf32>
    %85 = vector.broadcast %84 : vector<4x1xf32> to vector<4x8xf32>
    %86 = arith.subf %82, %85 : vector<4x8xf32>
    %87 = math.exp %86 : vector<4x8xf32>
    %cst_31 = arith.constant dense<0.000000e+00> : vector<4xf32>
    %88 = vector.multi_reduction <add>, %87, %cst_31 [1] : vector<4x8xf32> to vector<4xf32>
    %89 = vector.shape_cast %88 : vector<4xf32> to vector<4x1xf32>
    %90 = tpu.reciprocal %89 {approx = true} : vector<4x1xf32> -> vector<4x1xf32>
    %91 = vector.broadcast %90 : vector<4x1xf32> to vector<4x8xf32>
    %92 = arith.mulf %87, %91 : vector<4x8xf32>
    %93 = arith.truncf %92 : vector<4x8xf32> to vector<4x8xbf16>
    %94 = vector.extract_strided_slice %76 {offsets = [0, 0], sizes = [8, 16], strides = [1, 1]} : vector<8x32xf32> to vector<8x16xf32>
    %95 = arith.truncf %94 : vector<8x16xf32> to vector<8x16xbf16>
    %cst_32 = arith.constant dense<0.000000e+00> : vector<4x16xf32>
    %96 = tpu.matmul %93, %95, %cst_32 {dimension_numbers = #tpu.dot_dimension_numbers<[1], [0], [0], [1], [0, 0, 1, 1], [], []>} : vector<4x8xbf16>, vector<8x16xbf16>, vector<4x16xf32> -> vector<4x16xf32>
    %97 = arith.truncf %96 : vector<4x16xf32> to vector<4x16xbf16>
    %98 = vector.extract_strided_slice %61 {offsets = [0, 0], sizes = [16, 32], strides = [1, 1]} : vector<32x32xbf16> to vector<16x32xbf16>
    %cst_33 = arith.constant dense<0.000000e+00> : vector<4x32xf32>
    %99 = tpu.matmul %97, %98, %cst_33 {dimension_numbers = #tpu.dot_dimension_numbers<[1], [0], [0], [1], [0, 0, 1, 1], [], []>} : vector<4x16xbf16>, vector<16x32xbf16>, vector<4x32xf32> -> vector<4x32xf32>
    %100 = arith.addf %77, %99 : vector<4x32xf32>
    %101 = vector.extract_strided_slice %68 {offsets = [0, 16], sizes = [4, 16], strides = [1, 1]} : vector<4x32xf32> to vector<4x16xf32>
    %102 = arith.truncf %101 : vector<4x16xf32> to vector<4x16xbf16>
    %103 = vector.extract_strided_slice %73 {offsets = [0, 16], sizes = [8, 16], strides = [1, 1]} : vector<8x32xf32> to vector<8x16xf32>
    %104 = arith.truncf %103 : vector<8x16xf32> to vector<8x16xbf16>
    %cst_34 = arith.constant dense<0.000000e+00> : vector<4x8xf32>
    %105 = tpu.matmul %102, %104, %cst_34 {dimension_numbers = #tpu.dot_dimension_numbers<[1], [1], [0], [0], [0, 0, 1, 0], [], []>} : vector<4x16xbf16>, vector<8x16xbf16>, vector<4x8xf32> -> vector<4x8xf32>
    %cst_35 = arith.constant dense<0xFF800000> : vector<4xf32>
    %106 = vector.multi_reduction <maximumf>, %105, %cst_35 [1] : vector<4x8xf32> to vector<4xf32>
    %107 = vector.shape_cast %106 : vector<4xf32> to vector<4x1xf32>
    %108 = vector.broadcast %107 : vector<4x1xf32> to vector<4x8xf32>
    %109 = arith.subf %105, %108 : vector<4x8xf32>
    %110 = math.exp %109 : vector<4x8xf32>
    %cst_36 = arith.constant dense<0.000000e+00> : vector<4xf32>
    %111 = vector.multi_reduction <add>, %110, %cst_36 [1] : vector<4x8xf32> to vector<4xf32>
    %112 = vector.shape_cast %111 : vector<4xf32> to vector<4x1xf32>
    %113 = tpu.reciprocal %112 {approx = true} : vector<4x1xf32> -> vector<4x1xf32>
    %114 = vector.broadcast %113 : vector<4x1xf32> to vector<4x8xf32>
    %115 = arith.mulf %110, %114 : vector<4x8xf32>
    %116 = arith.truncf %115 : vector<4x8xf32> to vector<4x8xbf16>
    %117 = vector.extract_strided_slice %76 {offsets = [0, 16], sizes = [8, 16], strides = [1, 1]} : vector<8x32xf32> to vector<8x16xf32>
    %118 = arith.truncf %117 : vector<8x16xf32> to vector<8x16xbf16>
    %cst_37 = arith.constant dense<0.000000e+00> : vector<4x16xf32>
    %119 = tpu.matmul %116, %118, %cst_37 {dimension_numbers = #tpu.dot_dimension_numbers<[1], [0], [0], [1], [0, 0, 1, 1], [], []>} : vector<4x8xbf16>, vector<8x16xbf16>, vector<4x16xf32> -> vector<4x16xf32>
    %120 = arith.truncf %119 : vector<4x16xf32> to vector<4x16xbf16>
    %121 = vector.extract_strided_slice %61 {offsets = [16, 0], sizes = [16, 32], strides = [1, 1]} : vector<32x32xbf16> to vector<16x32xbf16>
    %cst_38 = arith.constant dense<0.000000e+00> : vector<4x32xf32>
    %122 = tpu.matmul %120, %121, %cst_38 {dimension_numbers = #tpu.dot_dimension_numbers<[1], [0], [0], [1], [0, 0, 1, 1], [], []>} : vector<4x16xbf16>, vector<16x32xbf16>, vector<4x32xf32> -> vector<4x32xf32>
    %123 = arith.addf %100, %122 : vector<4x32xf32>
    %124 = vector.extract_strided_slice %63 {offsets = [4, 0], sizes = [4, 32], strides = [1, 1]} : vector<32x32xf32> to vector<4x32xf32>
    %125 = vector.extract_strided_slice %65 {offsets = [4, 0], sizes = [4, 64], strides = [1, 1]} : vector<32x64xf32> to vector<4x64xf32>
    %126 = vector.extract_strided_slice %67 {offsets = [4, 0], sizes = [4, 64], strides = [1, 1]} : vector<32x64xf32> to vector<4x64xf32>
    %127 = vector.extract_strided_slice %125 {offsets = [0, 0], sizes = [4, 32], strides = [1, 1]} : vector<4x64xf32> to vector<4x32xf32>
    %128 = vector.extract_strided_slice %126 {offsets = [0, 0], sizes = [4, 32], strides = [1, 1]} : vector<4x64xf32> to vector<4x32xf32>
    %129 = tpu.concatenate %127, %128 in 0 : vector<4x32xf32>, vector<4x32xf32> -> vector<8x32xf32>
    %130 = vector.extract_strided_slice %125 {offsets = [0, 32], sizes = [4, 32], strides = [1, 1]} : vector<4x64xf32> to vector<4x32xf32>
    %131 = vector.extract_strided_slice %126 {offsets = [0, 32], sizes = [4, 32], strides = [1, 1]} : vector<4x64xf32> to vector<4x32xf32>
    %132 = tpu.concatenate %130, %131 in 0 : vector<4x32xf32>, vector<4x32xf32> -> vector<8x32xf32>
    %cst_39 = arith.constant 0.000000e+00 : f32
    %133 = vector.broadcast %cst_39 : f32 to vector<4x32xf32>
    %134 = vector.extract_strided_slice %124 {offsets = [0, 0], sizes = [4, 16], strides = [1, 1]} : vector<4x32xf32> to vector<4x16xf32>
    %135 = arith.truncf %134 : vector<4x16xf32> to vector<4x16xbf16>
    %136 = vector.extract_strided_slice %129 {offsets = [0, 0], sizes = [8, 16], strides = [1, 1]} : vector<8x32xf32> to vector<8x16xf32>
    %137 = arith.truncf %136 : vector<8x16xf32> to vector<8x16xbf16>
    %cst_40 = arith.constant dense<0.000000e+00> : vector<4x8xf32>
    %138 = tpu.matmul %135, %137, %cst_40 {dimension_numbers = #tpu.dot_dimension_numbers<[1], [1], [0], [0], [0, 0, 1, 0], [], []>} : vector<4x16xbf16>, vector<8x16xbf16>, vector<4x8xf32> -> vector<4x8xf32>
    %cst_41 = arith.constant dense<0xFF800000> : vector<4xf32>
    %139 = vector.multi_reduction <maximumf>, %138, %cst_41 [1] : vector<4x8xf32> to vector<4xf32>
    %140 = vector.shape_cast %139 : vector<4xf32> to vector<4x1xf32>
    %141 = vector.broadcast %140 : vector<4x1xf32> to vector<4x8xf32>
    %142 = arith.subf %138, %141 : vector<4x8xf32>
    %143 = math.exp %142 : vector<4x8xf32>
    %cst_42 = arith.constant dense<0.000000e+00> : vector<4xf32>
    %144 = vector.multi_reduction <add>, %143, %cst_42 [1] : vector<4x8xf32> to vector<4xf32>
    %145 = vector.shape_cast %144 : vector<4xf32> to vector<4x1xf32>
    %146 = tpu.reciprocal %145 {approx = true} : vector<4x1xf32> -> vector<4x1xf32>
    %147 = vector.broadcast %146 : vector<4x1xf32> to vector<4x8xf32>
    %148 = arith.mulf %143, %147 : vector<4x8xf32>
    %149 = arith.truncf %148 : vector<4x8xf32> to vector<4x8xbf16>
    %150 = vector.extract_strided_slice %132 {offsets = [0, 0], sizes = [8, 16], strides = [1, 1]} : vector<8x32xf32> to vector<8x16xf32>
    %151 = arith.truncf %150 : vector<8x16xf32> to vector<8x16xbf16>
    %cst_43 = arith.constant dense<0.000000e+00> : vector<4x16xf32>
    %152 = tpu.matmul %149, %151, %cst_43 {dimension_numbers = #tpu.dot_dimension_numbers<[1], [0], [0], [1], [0, 0, 1, 1], [], []>} : vector<4x8xbf16>, vector<8x16xbf16>, vector<4x16xf32> -> vector<4x16xf32>
    %153 = arith.truncf %152 : vector<4x16xf32> to vector<4x16xbf16>
    %154 = vector.extract_strided_slice %61 {offsets = [0, 0], sizes = [16, 32], strides = [1, 1]} : vector<32x32xbf16> to vector<16x32xbf16>
    %cst_44 = arith.constant dense<0.000000e+00> : vector<4x32xf32>
    %155 = tpu.matmul %153, %154, %cst_44 {dimension_numbers = #tpu.dot_dimension_numbers<[1], [0], [0], [1], [0, 0, 1, 1], [], []>} : vector<4x16xbf16>, vector<16x32xbf16>, vector<4x32xf32> -> vector<4x32xf32>
    %156 = arith.addf %133, %155 : vector<4x32xf32>
    %157 = vector.extract_strided_slice %124 {offsets = [0, 16], sizes = [4, 16], strides = [1, 1]} : vector<4x32xf32> to vector<4x16xf32>
    %158 = arith.truncf %157 : vector<4x16xf32> to vector<4x16xbf16>
    %159 = vector.extract_strided_slice %129 {offsets = [0, 16], sizes = [8, 16], strides = [1, 1]} : vector<8x32xf32> to vector<8x16xf32>
    %160 = arith.truncf %159 : vector<8x16xf32> to vector<8x16xbf16>
    %cst_45 = arith.constant dense<0.000000e+00> : vector<4x8xf32>
    %161 = tpu.matmul %158, %160, %cst_45 {dimension_numbers = #tpu.dot_dimension_numbers<[1], [1], [0], [0], [0, 0, 1, 0], [], []>} : vector<4x16xbf16>, vector<8x16xbf16>, vector<4x8xf32> -> vector<4x8xf32>
    %cst_46 = arith.constant dense<0xFF800000> : vector<4xf32>
    %162 = vector.multi_reduction <maximumf>, %161, %cst_46 [1] : vector<4x8xf32> to vector<4xf32>
    %163 = vector.shape_cast %162 : vector<4xf32> to vector<4x1xf32>
    %164 = vector.broadcast %163 : vector<4x1xf32> to vector<4x8xf32>
    %165 = arith.subf %161, %164 : vector<4x8xf32>
    %166 = math.exp %165 : vector<4x8xf32>
    %cst_47 = arith.constant dense<0.000000e+00> : vector<4xf32>
    %167 = vector.multi_reduction <add>, %166, %cst_47 [1] : vector<4x8xf32> to vector<4xf32>
    %168 = vector.shape_cast %167 : vector<4xf32> to vector<4x1xf32>
    %169 = tpu.reciprocal %168 {approx = true} : vector<4x1xf32> -> vector<4x1xf32>
    %170 = vector.broadcast %169 : vector<4x1xf32> to vector<4x8xf32>
    %171 = arith.mulf %166, %170 : vector<4x8xf32>
    %172 = arith.truncf %171 : vector<4x8xf32> to vector<4x8xbf16>
    %173 = vector.extract_strided_slice %132 {offsets = [0, 16], sizes = [8, 16], strides = [1, 1]} : vector<8x32xf32> to vector<8x16xf32>
    %174 = arith.truncf %173 : vector<8x16xf32> to vector<8x16xbf16>
    %cst_48 = arith.constant dense<0.000000e+00> : vector<4x16xf32>
    %175 = tpu.matmul %172, %174, %cst_48 {dimension_numbers = #tpu.dot_dimension_numbers<[1], [0], [0], [1], [0, 0, 1, 1], [], []>} : vector<4x8xbf16>, vector<8x16xbf16>, vector<4x16xf32> -> vector<4x16xf32>
    %176 = arith.truncf %175 : vector<4x16xf32> to vector<4x16xbf16>
    %177 = vector.extract_strided_slice %61 {offsets = [16, 0], sizes = [16, 32], strides = [1, 1]} : vector<32x32xbf16> to vector<16x32xbf16>
    %cst_49 = arith.constant dense<0.000000e+00> : vector<4x32xf32>
    %178 = tpu.matmul %176, %177, %cst_49 {dimension_numbers = #tpu.dot_dimension_numbers<[1], [0], [0], [1], [0, 0, 1, 1], [], []>} : vector<4x16xbf16>, vector<16x32xbf16>, vector<4x32xf32> -> vector<4x32xf32>
    %179 = arith.addf %156, %178 : vector<4x32xf32>
    %180 = vector.extract_strided_slice %63 {offsets = [8, 0], sizes = [4, 32], strides = [1, 1]} : vector<32x32xf32> to vector<4x32xf32>
    %181 = vector.extract_strided_slice %65 {offsets = [8, 0], sizes = [4, 64], strides = [1, 1]} : vector<32x64xf32> to vector<4x64xf32>
    %182 = vector.extract_strided_slice %67 {offsets = [8, 0], sizes = [4, 64], strides = [1, 1]} : vector<32x64xf32> to vector<4x64xf32>
    %183 = vector.extract_strided_slice %181 {offsets = [0, 0], sizes = [4, 32], strides = [1, 1]} : vector<4x64xf32> to vector<4x32xf32>
    %184 = vector.extract_strided_slice %182 {offsets = [0, 0], sizes = [4, 32], strides = [1, 1]} : vector<4x64xf32> to vector<4x32xf32>
    %185 = tpu.concatenate %183, %184 in 0 : vector<4x32xf32>, vector<4x32xf32> -> vector<8x32xf32>
    %186 = vector.extract_strided_slice %181 {offsets = [0, 32], sizes = [4, 32], strides = [1, 1]} : vector<4x64xf32> to vector<4x32xf32>
    %187 = vector.extract_strided_slice %182 {offsets = [0, 32], sizes = [4, 32], strides = [1, 1]} : vector<4x64xf32> to vector<4x32xf32>
    %188 = tpu.concatenate %186, %187 in 0 : vector<4x32xf32>, vector<4x32xf32> -> vector<8x32xf32>
    %cst_50 = arith.constant 0.000000e+00 : f32
    %189 = vector.broadcast %cst_50 : f32 to vector<4x32xf32>
    %190 = vector.extract_strided_slice %180 {offsets = [0, 0], sizes = [4, 16], strides = [1, 1]} : vector<4x32xf32> to vector<4x16xf32>
    %191 = arith.truncf %190 : vector<4x16xf32> to vector<4x16xbf16>
    %192 = vector.extract_strided_slice %185 {offsets = [0, 0], sizes = [8, 16], strides = [1, 1]} : vector<8x32xf32> to vector<8x16xf32>
    %193 = arith.truncf %192 : vector<8x16xf32> to vector<8x16xbf16>
    %cst_51 = arith.constant dense<0.000000e+00> : vector<4x8xf32>
    %194 = tpu.matmul %191, %193, %cst_51 {dimension_numbers = #tpu.dot_dimension_numbers<[1], [1], [0], [0], [0, 0, 1, 0], [], []>} : vector<4x16xbf16>, vector<8x16xbf16>, vector<4x8xf32> -> vector<4x8xf32>
    %cst_52 = arith.constant dense<0xFF800000> : vector<4xf32>
    %195 = vector.multi_reduction <maximumf>, %194, %cst_52 [1] : vector<4x8xf32> to vector<4xf32>
    %196 = vector.shape_cast %195 : vector<4xf32> to vector<4x1xf32>
    %197 = vector.broadcast %196 : vector<4x1xf32> to vector<4x8xf32>
    %198 = arith.subf %194, %197 : vector<4x8xf32>
    %199 = math.exp %198 : vector<4x8xf32>
    %cst_53 = arith.constant dense<0.000000e+00> : vector<4xf32>
    %200 = vector.multi_reduction <add>, %199, %cst_53 [1] : vector<4x8xf32> to vector<4xf32>
    %201 = vector.shape_cast %200 : vector<4xf32> to vector<4x1xf32>
    %202 = tpu.reciprocal %201 {approx = true} : vector<4x1xf32> -> vector<4x1xf32>
    %203 = vector.broadcast %202 : vector<4x1xf32> to vector<4x8xf32>
    %204 = arith.mulf %199, %203 : vector<4x8xf32>
    %205 = arith.truncf %204 : vector<4x8xf32> to vector<4x8xbf16>
    %206 = vector.extract_strided_slice %188 {offsets = [0, 0], sizes = [8, 16], strides = [1, 1]} : vector<8x32xf32> to vector<8x16xf32>
    %207 = arith.truncf %206 : vector<8x16xf32> to vector<8x16xbf16>
    %cst_54 = arith.constant dense<0.000000e+00> : vector<4x16xf32>
    %208 = tpu.matmul %205, %207, %cst_54 {dimension_numbers = #tpu.dot_dimension_numbers<[1], [0], [0], [1], [0, 0, 1, 1], [], []>} : vector<4x8xbf16>, vector<8x16xbf16>, vector<4x16xf32> -> vector<4x16xf32>
    %209 = arith.truncf %208 : vector<4x16xf32> to vector<4x16xbf16>
    %210 = vector.extract_strided_slice %61 {offsets = [0, 0], sizes = [16, 32], strides = [1, 1]} : vector<32x32xbf16> to vector<16x32xbf16>
    %cst_55 = arith.constant dense<0.000000e+00> : vector<4x32xf32>
    %211 = tpu.matmul %209, %210, %cst_55 {dimension_numbers = #tpu.dot_dimension_numbers<[1], [0], [0], [1], [0, 0, 1, 1], [], []>} : vector<4x16xbf16>, vector<16x32xbf16>, vector<4x32xf32> -> vector<4x32xf32>
    %212 = arith.addf %189, %211 : vector<4x32xf32>
    %213 = vector.extract_strided_slice %180 {offsets = [0, 16], sizes = [4, 16], strides = [1, 1]} : vector<4x32xf32> to vector<4x16xf32>
    %214 = arith.truncf %213 : vector<4x16xf32> to vector<4x16xbf16>
    %215 = vector.extract_strided_slice %185 {offsets = [0, 16], sizes = [8, 16], strides = [1, 1]} : vector<8x32xf32> to vector<8x16xf32>
    %216 = arith.truncf %215 : vector<8x16xf32> to vector<8x16xbf16>
    %cst_56 = arith.constant dense<0.000000e+00> : vector<4x8xf32>
    %217 = tpu.matmul %214, %216, %cst_56 {dimension_numbers = #tpu.dot_dimension_numbers<[1], [1], [0], [0], [0, 0, 1, 0], [], []>} : vector<4x16xbf16>, vector<8x16xbf16>, vector<4x8xf32> -> vector<4x8xf32>
    %cst_57 = arith.constant dense<0xFF800000> : vector<4xf32>
    %218 = vector.multi_reduction <maximumf>, %217, %cst_57 [1] : vector<4x8xf32> to vector<4xf32>
    %219 = vector.shape_cast %218 : vector<4xf32> to vector<4x1xf32>
    %220 = vector.broadcast %219 : vector<4x1xf32> to vector<4x8xf32>
    %221 = arith.subf %217, %220 : vector<4x8xf32>
    %222 = math.exp %221 : vector<4x8xf32>
    %cst_58 = arith.constant dense<0.000000e+00> : vector<4xf32>
    %223 = vector.multi_reduction <add>, %222, %cst_58 [1] : vector<4x8xf32> to vector<4xf32>
    %224 = vector.shape_cast %223 : vector<4xf32> to vector<4x1xf32>
    %225 = tpu.reciprocal %224 {approx = true} : vector<4x1xf32> -> vector<4x1xf32>
    %226 = vector.broadcast %225 : vector<4x1xf32> to vector<4x8xf32>
    %227 = arith.mulf %222, %226 : vector<4x8xf32>
    %228 = arith.truncf %227 : vector<4x8xf32> to vector<4x8xbf16>
    %229 = vector.extract_strided_slice %188 {offsets = [0, 16], sizes = [8, 16], strides = [1, 1]} : vector<8x32xf32> to vector<8x16xf32>
    %230 = arith.truncf %229 : vector<8x16xf32> to vector<8x16xbf16>
    %cst_59 = arith.constant dense<0.000000e+00> : vector<4x16xf32>
    %231 = tpu.matmul %228, %230, %cst_59 {dimension_numbers = #tpu.dot_dimension_numbers<[1], [0], [0], [1], [0, 0, 1, 1], [], []>} : vector<4x8xbf16>, vector<8x16xbf16>, vector<4x16xf32> -> vector<4x16xf32>
    %232 = arith.truncf %231 : vector<4x16xf32> to vector<4x16xbf16>
    %233 = vector.extract_strided_slice %61 {offsets = [16, 0], sizes = [16, 32], strides = [1, 1]} : vector<32x32xbf16> to vector<16x32xbf16>
    %cst_60 = arith.constant dense<0.000000e+00> : vector<4x32xf32>
    %234 = tpu.matmul %232, %233, %cst_60 {dimension_numbers = #tpu.dot_dimension_numbers<[1], [0], [0], [1], [0, 0, 1, 1], [], []>} : vector<4x16xbf16>, vector<16x32xbf16>, vector<4x32xf32> -> vector<4x32xf32>
    %235 = arith.addf %212, %234 : vector<4x32xf32>
    %236 = vector.extract_strided_slice %63 {offsets = [12, 0], sizes = [4, 32], strides = [1, 1]} : vector<32x32xf32> to vector<4x32xf32>
    %237 = vector.extract_strided_slice %65 {offsets = [12, 0], sizes = [4, 64], strides = [1, 1]} : vector<32x64xf32> to vector<4x64xf32>
    %238 = vector.extract_strided_slice %67 {offsets = [12, 0], sizes = [4, 64], strides = [1, 1]} : vector<32x64xf32> to vector<4x64xf32>
    %239 = vector.extract_strided_slice %237 {offsets = [0, 0], sizes = [4, 32], strides = [1, 1]} : vector<4x64xf32> to vector<4x32xf32>
    %240 = vector.extract_strided_slice %238 {offsets = [0, 0], sizes = [4, 32], strides = [1, 1]} : vector<4x64xf32> to vector<4x32xf32>
    %241 = tpu.concatenate %239, %240 in 0 : vector<4x32xf32>, vector<4x32xf32> -> vector<8x32xf32>
    %242 = vector.extract_strided_slice %237 {offsets = [0, 32], sizes = [4, 32], strides = [1, 1]} : vector<4x64xf32> to vector<4x32xf32>
    %243 = vector.extract_strided_slice %238 {offsets = [0, 32], sizes = [4, 32], strides = [1, 1]} : vector<4x64xf32> to vector<4x32xf32>
    %244 = tpu.concatenate %242, %243 in 0 : vector<4x32xf32>, vector<4x32xf32> -> vector<8x32xf32>
    %cst_61 = arith.constant 0.000000e+00 : f32
    %245 = vector.broadcast %cst_61 : f32 to vector<4x32xf32>
    %246 = vector.extract_strided_slice %236 {offsets = [0, 0], sizes = [4, 16], strides = [1, 1]} : vector<4x32xf32> to vector<4x16xf32>
    %247 = arith.truncf %246 : vector<4x16xf32> to vector<4x16xbf16>
    %248 = vector.extract_strided_slice %241 {offsets = [0, 0], sizes = [8, 16], strides = [1, 1]} : vector<8x32xf32> to vector<8x16xf32>
    %249 = arith.truncf %248 : vector<8x16xf32> to vector<8x16xbf16>
    %cst_62 = arith.constant dense<0.000000e+00> : vector<4x8xf32>
    %250 = tpu.matmul %247, %249, %cst_62 {dimension_numbers = #tpu.dot_dimension_numbers<[1], [1], [0], [0], [0, 0, 1, 0], [], []>} : vector<4x16xbf16>, vector<8x16xbf16>, vector<4x8xf32> -> vector<4x8xf32>
    %cst_63 = arith.constant dense<0xFF800000> : vector<4xf32>
    %251 = vector.multi_reduction <maximumf>, %250, %cst_63 [1] : vector<4x8xf32> to vector<4xf32>
    %252 = vector.shape_cast %251 : vector<4xf32> to vector<4x1xf32>
    %253 = vector.broadcast %252 : vector<4x1xf32> to vector<4x8xf32>
    %254 = arith.subf %250, %253 : vector<4x8xf32>
    %255 = math.exp %254 : vector<4x8xf32>
    %cst_64 = arith.constant dense<0.000000e+00> : vector<4xf32>
    %256 = vector.multi_reduction <add>, %255, %cst_64 [1] : vector<4x8xf32> to vector<4xf32>
    %257 = vector.shape_cast %256 : vector<4xf32> to vector<4x1xf32>
    %258 = tpu.reciprocal %257 {approx = true} : vector<4x1xf32> -> vector<4x1xf32>
    %259 = vector.broadcast %258 : vector<4x1xf32> to vector<4x8xf32>
    %260 = arith.mulf %255, %259 : vector<4x8xf32>
    %261 = arith.truncf %260 : vector<4x8xf32> to vector<4x8xbf16>
    %262 = vector.extract_strided_slice %244 {offsets = [0, 0], sizes = [8, 16], strides = [1, 1]} : vector<8x32xf32> to vector<8x16xf32>
    %263 = arith.truncf %262 : vector<8x16xf32> to vector<8x16xbf16>
    %cst_65 = arith.constant dense<0.000000e+00> : vector<4x16xf32>
    %264 = tpu.matmul %261, %263, %cst_65 {dimension_numbers = #tpu.dot_dimension_numbers<[1], [0], [0], [1], [0, 0, 1, 1], [], []>} : vector<4x8xbf16>, vector<8x16xbf16>, vector<4x16xf32> -> vector<4x16xf32>
    %265 = arith.truncf %264 : vector<4x16xf32> to vector<4x16xbf16>
    %266 = vector.extract_strided_slice %61 {offsets = [0, 0], sizes = [16, 32], strides = [1, 1]} : vector<32x32xbf16> to vector<16x32xbf16>
    %cst_66 = arith.constant dense<0.000000e+00> : vector<4x32xf32>
    %267 = tpu.matmul %265, %266, %cst_66 {dimension_numbers = #tpu.dot_dimension_numbers<[1], [0], [0], [1], [0, 0, 1, 1], [], []>} : vector<4x16xbf16>, vector<16x32xbf16>, vector<4x32xf32> -> vector<4x32xf32>
    %268 = arith.addf %245, %267 : vector<4x32xf32>
    %269 = vector.extract_strided_slice %236 {offsets = [0, 16], sizes = [4, 16], strides = [1, 1]} : vector<4x32xf32> to vector<4x16xf32>
    %270 = arith.truncf %269 : vector<4x16xf32> to vector<4x16xbf16>
    %271 = vector.extract_strided_slice %241 {offsets = [0, 16], sizes = [8, 16], strides = [1, 1]} : vector<8x32xf32> to vector<8x16xf32>
    %272 = arith.truncf %271 : vector<8x16xf32> to vector<8x16xbf16>
    %cst_67 = arith.constant dense<0.000000e+00> : vector<4x8xf32>
    %273 = tpu.matmul %270, %272, %cst_67 {dimension_numbers = #tpu.dot_dimension_numbers<[1], [1], [0], [0], [0, 0, 1, 0], [], []>} : vector<4x16xbf16>, vector<8x16xbf16>, vector<4x8xf32> -> vector<4x8xf32>
    %cst_68 = arith.constant dense<0xFF800000> : vector<4xf32>
    %274 = vector.multi_reduction <maximumf>, %273, %cst_68 [1] : vector<4x8xf32> to vector<4xf32>
    %275 = vector.shape_cast %274 : vector<4xf32> to vector<4x1xf32>
    %276 = vector.broadcast %275 : vector<4x1xf32> to vector<4x8xf32>
    %277 = arith.subf %273, %276 : vector<4x8xf32>
    %278 = math.exp %277 : vector<4x8xf32>
    %cst_69 = arith.constant dense<0.000000e+00> : vector<4xf32>
    %279 = vector.multi_reduction <add>, %278, %cst_69 [1] : vector<4x8xf32> to vector<4xf32>
    %280 = vector.shape_cast %279 : vector<4xf32> to vector<4x1xf32>
    %281 = tpu.reciprocal %280 {approx = true} : vector<4x1xf32> -> vector<4x1xf32>
    %282 = vector.broadcast %281 : vector<4x1xf32> to vector<4x8xf32>
    %283 = arith.mulf %278, %282 : vector<4x8xf32>
    %284 = arith.truncf %283 : vector<4x8xf32> to vector<4x8xbf16>
    %285 = vector.extract_strided_slice %244 {offsets = [0, 16], sizes = [8, 16], strides = [1, 1]} : vector<8x32xf32> to vector<8x16xf32>
    %286 = arith.truncf %285 : vector<8x16xf32> to vector<8x16xbf16>
    %cst_70 = arith.constant dense<0.000000e+00> : vector<4x16xf32>
    %287 = tpu.matmul %284, %286, %cst_70 {dimension_numbers = #tpu.dot_dimension_numbers<[1], [0], [0], [1], [0, 0, 1, 1], [], []>} : vector<4x8xbf16>, vector<8x16xbf16>, vector<4x16xf32> -> vector<4x16xf32>
    %288 = arith.truncf %287 : vector<4x16xf32> to vector<4x16xbf16>
    %289 = vector.extract_strided_slice %61 {offsets = [16, 0], sizes = [16, 32], strides = [1, 1]} : vector<32x32xbf16> to vector<16x32xbf16>
    %cst_71 = arith.constant dense<0.000000e+00> : vector<4x32xf32>
    %290 = tpu.matmul %288, %289, %cst_71 {dimension_numbers = #tpu.dot_dimension_numbers<[1], [0], [0], [1], [0, 0, 1, 1], [], []>} : vector<4x16xbf16>, vector<16x32xbf16>, vector<4x32xf32> -> vector<4x32xf32>
    %291 = arith.addf %268, %290 : vector<4x32xf32>
    %292 = vector.extract_strided_slice %63 {offsets = [16, 0], sizes = [4, 32], strides = [1, 1]} : vector<32x32xf32> to vector<4x32xf32>
    %293 = vector.extract_strided_slice %65 {offsets = [16, 0], sizes = [4, 64], strides = [1, 1]} : vector<32x64xf32> to vector<4x64xf32>
    %294 = vector.extract_strided_slice %67 {offsets = [16, 0], sizes = [4, 64], strides = [1, 1]} : vector<32x64xf32> to vector<4x64xf32>
    %295 = vector.extract_strided_slice %293 {offsets = [0, 0], sizes = [4, 32], strides = [1, 1]} : vector<4x64xf32> to vector<4x32xf32>
    %296 = vector.extract_strided_slice %294 {offsets = [0, 0], sizes = [4, 32], strides = [1, 1]} : vector<4x64xf32> to vector<4x32xf32>
    %297 = tpu.concatenate %295, %296 in 0 : vector<4x32xf32>, vector<4x32xf32> -> vector<8x32xf32>
    %298 = vector.extract_strided_slice %293 {offsets = [0, 32], sizes = [4, 32], strides = [1, 1]} : vector<4x64xf32> to vector<4x32xf32>
    %299 = vector.extract_strided_slice %294 {offsets = [0, 32], sizes = [4, 32], strides = [1, 1]} : vector<4x64xf32> to vector<4x32xf32>
    %300 = tpu.concatenate %298, %299 in 0 : vector<4x32xf32>, vector<4x32xf32> -> vector<8x32xf32>
    %cst_72 = arith.constant 0.000000e+00 : f32
    %301 = vector.broadcast %cst_72 : f32 to vector<4x32xf32>
    %302 = vector.extract_strided_slice %292 {offsets = [0, 0], sizes = [4, 16], strides = [1, 1]} : vector<4x32xf32> to vector<4x16xf32>
    %303 = arith.truncf %302 : vector<4x16xf32> to vector<4x16xbf16>
    %304 = vector.extract_strided_slice %297 {offsets = [0, 0], sizes = [8, 16], strides = [1, 1]} : vector<8x32xf32> to vector<8x16xf32>
    %305 = arith.truncf %304 : vector<8x16xf32> to vector<8x16xbf16>
    %cst_73 = arith.constant dense<0.000000e+00> : vector<4x8xf32>
    %306 = tpu.matmul %303, %305, %cst_73 {dimension_numbers = #tpu.dot_dimension_numbers<[1], [1], [0], [0], [0, 0, 1, 0], [], []>} : vector<4x16xbf16>, vector<8x16xbf16>, vector<4x8xf32> -> vector<4x8xf32>
    %cst_74 = arith.constant dense<0xFF800000> : vector<4xf32>
    %307 = vector.multi_reduction <maximumf>, %306, %cst_74 [1] : vector<4x8xf32> to vector<4xf32>
    %308 = vector.shape_cast %307 : vector<4xf32> to vector<4x1xf32>
    %309 = vector.broadcast %308 : vector<4x1xf32> to vector<4x8xf32>
    %310 = arith.subf %306, %309 : vector<4x8xf32>
    %311 = math.exp %310 : vector<4x8xf32>
    %cst_75 = arith.constant dense<0.000000e+00> : vector<4xf32>
    %312 = vector.multi_reduction <add>, %311, %cst_75 [1] : vector<4x8xf32> to vector<4xf32>
    %313 = vector.shape_cast %312 : vector<4xf32> to vector<4x1xf32>
    %314 = tpu.reciprocal %313 {approx = true} : vector<4x1xf32> -> vector<4x1xf32>
    %315 = vector.broadcast %314 : vector<4x1xf32> to vector<4x8xf32>
    %316 = arith.mulf %311, %315 : vector<4x8xf32>
    %317 = arith.truncf %316 : vector<4x8xf32> to vector<4x8xbf16>
    %318 = vector.extract_strided_slice %300 {offsets = [0, 0], sizes = [8, 16], strides = [1, 1]} : vector<8x32xf32> to vector<8x16xf32>
    %319 = arith.truncf %318 : vector<8x16xf32> to vector<8x16xbf16>
    %cst_76 = arith.constant dense<0.000000e+00> : vector<4x16xf32>
    %320 = tpu.matmul %317, %319, %cst_76 {dimension_numbers = #tpu.dot_dimension_numbers<[1], [0], [0], [1], [0, 0, 1, 1], [], []>} : vector<4x8xbf16>, vector<8x16xbf16>, vector<4x16xf32> -> vector<4x16xf32>
    %321 = arith.truncf %320 : vector<4x16xf32> to vector<4x16xbf16>
    %322 = vector.extract_strided_slice %61 {offsets = [0, 0], sizes = [16, 32], strides = [1, 1]} : vector<32x32xbf16> to vector<16x32xbf16>
    %cst_77 = arith.constant dense<0.000000e+00> : vector<4x32xf32>
    %323 = tpu.matmul %321, %322, %cst_77 {dimension_numbers = #tpu.dot_dimension_numbers<[1], [0], [0], [1], [0, 0, 1, 1], [], []>} : vector<4x16xbf16>, vector<16x32xbf16>, vector<4x32xf32> -> vector<4x32xf32>
    %324 = arith.addf %301, %323 : vector<4x32xf32>
    %325 = vector.extract_strided_slice %292 {offsets = [0, 16], sizes = [4, 16], strides = [1, 1]} : vector<4x32xf32> to vector<4x16xf32>
    %326 = arith.truncf %325 : vector<4x16xf32> to vector<4x16xbf16>
    %327 = vector.extract_strided_slice %297 {offsets = [0, 16], sizes = [8, 16], strides = [1, 1]} : vector<8x32xf32> to vector<8x16xf32>
    %328 = arith.truncf %327 : vector<8x16xf32> to vector<8x16xbf16>
    %cst_78 = arith.constant dense<0.000000e+00> : vector<4x8xf32>
    %329 = tpu.matmul %326, %328, %cst_78 {dimension_numbers = #tpu.dot_dimension_numbers<[1], [1], [0], [0], [0, 0, 1, 0], [], []>} : vector<4x16xbf16>, vector<8x16xbf16>, vector<4x8xf32> -> vector<4x8xf32>
    %cst_79 = arith.constant dense<0xFF800000> : vector<4xf32>
    %330 = vector.multi_reduction <maximumf>, %329, %cst_79 [1] : vector<4x8xf32> to vector<4xf32>
    %331 = vector.shape_cast %330 : vector<4xf32> to vector<4x1xf32>
    %332 = vector.broadcast %331 : vector<4x1xf32> to vector<4x8xf32>
    %333 = arith.subf %329, %332 : vector<4x8xf32>
    %334 = math.exp %333 : vector<4x8xf32>
    %cst_80 = arith.constant dense<0.000000e+00> : vector<4xf32>
    %335 = vector.multi_reduction <add>, %334, %cst_80 [1] : vector<4x8xf32> to vector<4xf32>
    %336 = vector.shape_cast %335 : vector<4xf32> to vector<4x1xf32>
    %337 = tpu.reciprocal %336 {approx = true} : vector<4x1xf32> -> vector<4x1xf32>
    %338 = vector.broadcast %337 : vector<4x1xf32> to vector<4x8xf32>
    %339 = arith.mulf %334, %338 : vector<4x8xf32>
    %340 = arith.truncf %339 : vector<4x8xf32> to vector<4x8xbf16>
    %341 = vector.extract_strided_slice %300 {offsets = [0, 16], sizes = [8, 16], strides = [1, 1]} : vector<8x32xf32> to vector<8x16xf32>
    %342 = arith.truncf %341 : vector<8x16xf32> to vector<8x16xbf16>
    %cst_81 = arith.constant dense<0.000000e+00> : vector<4x16xf32>
    %343 = tpu.matmul %340, %342, %cst_81 {dimension_numbers = #tpu.dot_dimension_numbers<[1], [0], [0], [1], [0, 0, 1, 1], [], []>} : vector<4x8xbf16>, vector<8x16xbf16>, vector<4x16xf32> -> vector<4x16xf32>
    %344 = arith.truncf %343 : vector<4x16xf32> to vector<4x16xbf16>
    %345 = vector.extract_strided_slice %61 {offsets = [16, 0], sizes = [16, 32], strides = [1, 1]} : vector<32x32xbf16> to vector<16x32xbf16>
    %cst_82 = arith.constant dense<0.000000e+00> : vector<4x32xf32>
    %346 = tpu.matmul %344, %345, %cst_82 {dimension_numbers = #tpu.dot_dimension_numbers<[1], [0], [0], [1], [0, 0, 1, 1], [], []>} : vector<4x16xbf16>, vector<16x32xbf16>, vector<4x32xf32> -> vector<4x32xf32>
    %347 = arith.addf %324, %346 : vector<4x32xf32>
    %348 = vector.extract_strided_slice %63 {offsets = [20, 0], sizes = [4, 32], strides = [1, 1]} : vector<32x32xf32> to vector<4x32xf32>
    %349 = vector.extract_strided_slice %65 {offsets = [20, 0], sizes = [4, 64], strides = [1, 1]} : vector<32x64xf32> to vector<4x64xf32>
    %350 = vector.extract_strided_slice %67 {offsets = [20, 0], sizes = [4, 64], strides = [1, 1]} : vector<32x64xf32> to vector<4x64xf32>
    %351 = vector.extract_strided_slice %349 {offsets = [0, 0], sizes = [4, 32], strides = [1, 1]} : vector<4x64xf32> to vector<4x32xf32>
    %352 = vector.extract_strided_slice %350 {offsets = [0, 0], sizes = [4, 32], strides = [1, 1]} : vector<4x64xf32> to vector<4x32xf32>
    %353 = tpu.concatenate %351, %352 in 0 : vector<4x32xf32>, vector<4x32xf32> -> vector<8x32xf32>
    %354 = vector.extract_strided_slice %349 {offsets = [0, 32], sizes = [4, 32], strides = [1, 1]} : vector<4x64xf32> to vector<4x32xf32>
    %355 = vector.extract_strided_slice %350 {offsets = [0, 32], sizes = [4, 32], strides = [1, 1]} : vector<4x64xf32> to vector<4x32xf32>
    %356 = tpu.concatenate %354, %355 in 0 : vector<4x32xf32>, vector<4x32xf32> -> vector<8x32xf32>
    %cst_83 = arith.constant 0.000000e+00 : f32
    %357 = vector.broadcast %cst_83 : f32 to vector<4x32xf32>
    %358 = vector.extract_strided_slice %348 {offsets = [0, 0], sizes = [4, 16], strides = [1, 1]} : vector<4x32xf32> to vector<4x16xf32>
    %359 = arith.truncf %358 : vector<4x16xf32> to vector<4x16xbf16>
    %360 = vector.extract_strided_slice %353 {offsets = [0, 0], sizes = [8, 16], strides = [1, 1]} : vector<8x32xf32> to vector<8x16xf32>
    %361 = arith.truncf %360 : vector<8x16xf32> to vector<8x16xbf16>
    %cst_84 = arith.constant dense<0.000000e+00> : vector<4x8xf32>
    %362 = tpu.matmul %359, %361, %cst_84 {dimension_numbers = #tpu.dot_dimension_numbers<[1], [1], [0], [0], [0, 0, 1, 0], [], []>} : vector<4x16xbf16>, vector<8x16xbf16>, vector<4x8xf32> -> vector<4x8xf32>
    %cst_85 = arith.constant dense<0xFF800000> : vector<4xf32>
    %363 = vector.multi_reduction <maximumf>, %362, %cst_85 [1] : vector<4x8xf32> to vector<4xf32>
    %364 = vector.shape_cast %363 : vector<4xf32> to vector<4x1xf32>
    %365 = vector.broadcast %364 : vector<4x1xf32> to vector<4x8xf32>
    %366 = arith.subf %362, %365 : vector<4x8xf32>
    %367 = math.exp %366 : vector<4x8xf32>
    %cst_86 = arith.constant dense<0.000000e+00> : vector<4xf32>
    %368 = vector.multi_reduction <add>, %367, %cst_86 [1] : vector<4x8xf32> to vector<4xf32>
    %369 = vector.shape_cast %368 : vector<4xf32> to vector<4x1xf32>
    %370 = tpu.reciprocal %369 {approx = true} : vector<4x1xf32> -> vector<4x1xf32>
    %371 = vector.broadcast %370 : vector<4x1xf32> to vector<4x8xf32>
    %372 = arith.mulf %367, %371 : vector<4x8xf32>
    %373 = arith.truncf %372 : vector<4x8xf32> to vector<4x8xbf16>
    %374 = vector.extract_strided_slice %356 {offsets = [0, 0], sizes = [8, 16], strides = [1, 1]} : vector<8x32xf32> to vector<8x16xf32>
    %375 = arith.truncf %374 : vector<8x16xf32> to vector<8x16xbf16>
    %cst_87 = arith.constant dense<0.000000e+00> : vector<4x16xf32>
    %376 = tpu.matmul %373, %375, %cst_87 {dimension_numbers = #tpu.dot_dimension_numbers<[1], [0], [0], [1], [0, 0, 1, 1], [], []>} : vector<4x8xbf16>, vector<8x16xbf16>, vector<4x16xf32> -> vector<4x16xf32>
    %377 = arith.truncf %376 : vector<4x16xf32> to vector<4x16xbf16>
    %378 = vector.extract_strided_slice %61 {offsets = [0, 0], sizes = [16, 32], strides = [1, 1]} : vector<32x32xbf16> to vector<16x32xbf16>
    %cst_88 = arith.constant dense<0.000000e+00> : vector<4x32xf32>
    %379 = tpu.matmul %377, %378, %cst_88 {dimension_numbers = #tpu.dot_dimension_numbers<[1], [0], [0], [1], [0, 0, 1, 1], [], []>} : vector<4x16xbf16>, vector<16x32xbf16>, vector<4x32xf32> -> vector<4x32xf32>
    %380 = arith.addf %357, %379 : vector<4x32xf32>
    %381 = vector.extract_strided_slice %348 {offsets = [0, 16], sizes = [4, 16], strides = [1, 1]} : vector<4x32xf32> to vector<4x16xf32>
    %382 = arith.truncf %381 : vector<4x16xf32> to vector<4x16xbf16>
    %383 = vector.extract_strided_slice %353 {offsets = [0, 16], sizes = [8, 16], strides = [1, 1]} : vector<8x32xf32> to vector<8x16xf32>
    %384 = arith.truncf %383 : vector<8x16xf32> to vector<8x16xbf16>
    %cst_89 = arith.constant dense<0.000000e+00> : vector<4x8xf32>
    %385 = tpu.matmul %382, %384, %cst_89 {dimension_numbers = #tpu.dot_dimension_numbers<[1], [1], [0], [0], [0, 0, 1, 0], [], []>} : vector<4x16xbf16>, vector<8x16xbf16>, vector<4x8xf32> -> vector<4x8xf32>
    %cst_90 = arith.constant dense<0xFF800000> : vector<4xf32>
    %386 = vector.multi_reduction <maximumf>, %385, %cst_90 [1] : vector<4x8xf32> to vector<4xf32>
    %387 = vector.shape_cast %386 : vector<4xf32> to vector<4x1xf32>
    %388 = vector.broadcast %387 : vector<4x1xf32> to vector<4x8xf32>
    %389 = arith.subf %385, %388 : vector<4x8xf32>
    %390 = math.exp %389 : vector<4x8xf32>
    %cst_91 = arith.constant dense<0.000000e+00> : vector<4xf32>
    %391 = vector.multi_reduction <add>, %390, %cst_91 [1] : vector<4x8xf32> to vector<4xf32>
    %392 = vector.shape_cast %391 : vector<4xf32> to vector<4x1xf32>
    %393 = tpu.reciprocal %392 {approx = true} : vector<4x1xf32> -> vector<4x1xf32>
    %394 = vector.broadcast %393 : vector<4x1xf32> to vector<4x8xf32>
    %395 = arith.mulf %390, %394 : vector<4x8xf32>
    %396 = arith.truncf %395 : vector<4x8xf32> to vector<4x8xbf16>
    %397 = vector.extract_strided_slice %356 {offsets = [0, 16], sizes = [8, 16], strides = [1, 1]} : vector<8x32xf32> to vector<8x16xf32>
    %398 = arith.truncf %397 : vector<8x16xf32> to vector<8x16xbf16>
    %cst_92 = arith.constant dense<0.000000e+00> : vector<4x16xf32>
    %399 = tpu.matmul %396, %398, %cst_92 {dimension_numbers = #tpu.dot_dimension_numbers<[1], [0], [0], [1], [0, 0, 1, 1], [], []>} : vector<4x8xbf16>, vector<8x16xbf16>, vector<4x16xf32> -> vector<4x16xf32>
    %400 = arith.truncf %399 : vector<4x16xf32> to vector<4x16xbf16>
    %401 = vector.extract_strided_slice %61 {offsets = [16, 0], sizes = [16, 32], strides = [1, 1]} : vector<32x32xbf16> to vector<16x32xbf16>
    %cst_93 = arith.constant dense<0.000000e+00> : vector<4x32xf32>
    %402 = tpu.matmul %400, %401, %cst_93 {dimension_numbers = #tpu.dot_dimension_numbers<[1], [0], [0], [1], [0, 0, 1, 1], [], []>} : vector<4x16xbf16>, vector<16x32xbf16>, vector<4x32xf32> -> vector<4x32xf32>
    %403 = arith.addf %380, %402 : vector<4x32xf32>
    %404 = vector.extract_strided_slice %63 {offsets = [24, 0], sizes = [4, 32], strides = [1, 1]} : vector<32x32xf32> to vector<4x32xf32>
    %405 = vector.extract_strided_slice %65 {offsets = [24, 0], sizes = [4, 64], strides = [1, 1]} : vector<32x64xf32> to vector<4x64xf32>
    %406 = vector.extract_strided_slice %67 {offsets = [24, 0], sizes = [4, 64], strides = [1, 1]} : vector<32x64xf32> to vector<4x64xf32>
    %407 = vector.extract_strided_slice %405 {offsets = [0, 0], sizes = [4, 32], strides = [1, 1]} : vector<4x64xf32> to vector<4x32xf32>
    %408 = vector.extract_strided_slice %406 {offsets = [0, 0], sizes = [4, 32], strides = [1, 1]} : vector<4x64xf32> to vector<4x32xf32>
    %409 = tpu.concatenate %407, %408 in 0 : vector<4x32xf32>, vector<4x32xf32> -> vector<8x32xf32>
    %410 = vector.extract_strided_slice %405 {offsets = [0, 32], sizes = [4, 32], strides = [1, 1]} : vector<4x64xf32> to vector<4x32xf32>
    %411 = vector.extract_strided_slice %406 {offsets = [0, 32], sizes = [4, 32], strides = [1, 1]} : vector<4x64xf32> to vector<4x32xf32>
    %412 = tpu.concatenate %410, %411 in 0 : vector<4x32xf32>, vector<4x32xf32> -> vector<8x32xf32>
    %cst_94 = arith.constant 0.000000e+00 : f32
    %413 = vector.broadcast %cst_94 : f32 to vector<4x32xf32>
    %414 = vector.extract_strided_slice %404 {offsets = [0, 0], sizes = [4, 16], strides = [1, 1]} : vector<4x32xf32> to vector<4x16xf32>
    %415 = arith.truncf %414 : vector<4x16xf32> to vector<4x16xbf16>
    %416 = vector.extract_strided_slice %409 {offsets = [0, 0], sizes = [8, 16], strides = [1, 1]} : vector<8x32xf32> to vector<8x16xf32>
    %417 = arith.truncf %416 : vector<8x16xf32> to vector<8x16xbf16>
    %cst_95 = arith.constant dense<0.000000e+00> : vector<4x8xf32>
    %418 = tpu.matmul %415, %417, %cst_95 {dimension_numbers = #tpu.dot_dimension_numbers<[1], [1], [0], [0], [0, 0, 1, 0], [], []>} : vector<4x16xbf16>, vector<8x16xbf16>, vector<4x8xf32> -> vector<4x8xf32>
    %cst_96 = arith.constant dense<0xFF800000> : vector<4xf32>
    %419 = vector.multi_reduction <maximumf>, %418, %cst_96 [1] : vector<4x8xf32> to vector<4xf32>
    %420 = vector.shape_cast %419 : vector<4xf32> to vector<4x1xf32>
    %421 = vector.broadcast %420 : vector<4x1xf32> to vector<4x8xf32>
    %422 = arith.subf %418, %421 : vector<4x8xf32>
    %423 = math.exp %422 : vector<4x8xf32>
    %cst_97 = arith.constant dense<0.000000e+00> : vector<4xf32>
    %424 = vector.multi_reduction <add>, %423, %cst_97 [1] : vector<4x8xf32> to vector<4xf32>
    %425 = vector.shape_cast %424 : vector<4xf32> to vector<4x1xf32>
    %426 = tpu.reciprocal %425 {approx = true} : vector<4x1xf32> -> vector<4x1xf32>
    %427 = vector.broadcast %426 : vector<4x1xf32> to vector<4x8xf32>
    %428 = arith.mulf %423, %427 : vector<4x8xf32>
    %429 = arith.truncf %428 : vector<4x8xf32> to vector<4x8xbf16>
    %430 = vector.extract_strided_slice %412 {offsets = [0, 0], sizes = [8, 16], strides = [1, 1]} : vector<8x32xf32> to vector<8x16xf32>
    %431 = arith.truncf %430 : vector<8x16xf32> to vector<8x16xbf16>
    %cst_98 = arith.constant dense<0.000000e+00> : vector<4x16xf32>
    %432 = tpu.matmul %429, %431, %cst_98 {dimension_numbers = #tpu.dot_dimension_numbers<[1], [0], [0], [1], [0, 0, 1, 1], [], []>} : vector<4x8xbf16>, vector<8x16xbf16>, vector<4x16xf32> -> vector<4x16xf32>
    %433 = arith.truncf %432 : vector<4x16xf32> to vector<4x16xbf16>
    %434 = vector.extract_strided_slice %61 {offsets = [0, 0], sizes = [16, 32], strides = [1, 1]} : vector<32x32xbf16> to vector<16x32xbf16>
    %cst_99 = arith.constant dense<0.000000e+00> : vector<4x32xf32>
    %435 = tpu.matmul %433, %434, %cst_99 {dimension_numbers = #tpu.dot_dimension_numbers<[1], [0], [0], [1], [0, 0, 1, 1], [], []>} : vector<4x16xbf16>, vector<16x32xbf16>, vector<4x32xf32> -> vector<4x32xf32>
    %436 = arith.addf %413, %435 : vector<4x32xf32>
    %437 = vector.extract_strided_slice %404 {offsets = [0, 16], sizes = [4, 16], strides = [1, 1]} : vector<4x32xf32> to vector<4x16xf32>
    %438 = arith.truncf %437 : vector<4x16xf32> to vector<4x16xbf16>
    %439 = vector.extract_strided_slice %409 {offsets = [0, 16], sizes = [8, 16], strides = [1, 1]} : vector<8x32xf32> to vector<8x16xf32>
    %440 = arith.truncf %439 : vector<8x16xf32> to vector<8x16xbf16>
    %cst_100 = arith.constant dense<0.000000e+00> : vector<4x8xf32>
    %441 = tpu.matmul %438, %440, %cst_100 {dimension_numbers = #tpu.dot_dimension_numbers<[1], [1], [0], [0], [0, 0, 1, 0], [], []>} : vector<4x16xbf16>, vector<8x16xbf16>, vector<4x8xf32> -> vector<4x8xf32>
    %cst_101 = arith.constant dense<0xFF800000> : vector<4xf32>
    %442 = vector.multi_reduction <maximumf>, %441, %cst_101 [1] : vector<4x8xf32> to vector<4xf32>
    %443 = vector.shape_cast %442 : vector<4xf32> to vector<4x1xf32>
    %444 = vector.broadcast %443 : vector<4x1xf32> to vector<4x8xf32>
    %445 = arith.subf %441, %444 : vector<4x8xf32>
    %446 = math.exp %445 : vector<4x8xf32>
    %cst_102 = arith.constant dense<0.000000e+00> : vector<4xf32>
    %447 = vector.multi_reduction <add>, %446, %cst_102 [1] : vector<4x8xf32> to vector<4xf32>
    %448 = vector.shape_cast %447 : vector<4xf32> to vector<4x1xf32>
    %449 = tpu.reciprocal %448 {approx = true} : vector<4x1xf32> -> vector<4x1xf32>
    %450 = vector.broadcast %449 : vector<4x1xf32> to vector<4x8xf32>
    %451 = arith.mulf %446, %450 : vector<4x8xf32>
    %452 = arith.truncf %451 : vector<4x8xf32> to vector<4x8xbf16>
    %453 = vector.extract_strided_slice %412 {offsets = [0, 16], sizes = [8, 16], strides = [1, 1]} : vector<8x32xf32> to vector<8x16xf32>
    %454 = arith.truncf %453 : vector<8x16xf32> to vector<8x16xbf16>
    %cst_103 = arith.constant dense<0.000000e+00> : vector<4x16xf32>
    %455 = tpu.matmul %452, %454, %cst_103 {dimension_numbers = #tpu.dot_dimension_numbers<[1], [0], [0], [1], [0, 0, 1, 1], [], []>} : vector<4x8xbf16>, vector<8x16xbf16>, vector<4x16xf32> -> vector<4x16xf32>
    %456 = arith.truncf %455 : vector<4x16xf32> to vector<4x16xbf16>
    %457 = vector.extract_strided_slice %61 {offsets = [16, 0], sizes = [16, 32], strides = [1, 1]} : vector<32x32xbf16> to vector<16x32xbf16>
    %cst_104 = arith.constant dense<0.000000e+00> : vector<4x32xf32>
    %458 = tpu.matmul %456, %457, %cst_104 {dimension_numbers = #tpu.dot_dimension_numbers<[1], [0], [0], [1], [0, 0, 1, 1], [], []>} : vector<4x16xbf16>, vector<16x32xbf16>, vector<4x32xf32> -> vector<4x32xf32>
    %459 = arith.addf %436, %458 : vector<4x32xf32>
    %460 = vector.extract_strided_slice %63 {offsets = [28, 0], sizes = [4, 32], strides = [1, 1]} : vector<32x32xf32> to vector<4x32xf32>
    %461 = vector.extract_strided_slice %65 {offsets = [28, 0], sizes = [4, 64], strides = [1, 1]} : vector<32x64xf32> to vector<4x64xf32>
    %462 = vector.extract_strided_slice %67 {offsets = [28, 0], sizes = [4, 64], strides = [1, 1]} : vector<32x64xf32> to vector<4x64xf32>
    %463 = vector.extract_strided_slice %461 {offsets = [0, 0], sizes = [4, 32], strides = [1, 1]} : vector<4x64xf32> to vector<4x32xf32>
    %464 = vector.extract_strided_slice %462 {offsets = [0, 0], sizes = [4, 32], strides = [1, 1]} : vector<4x64xf32> to vector<4x32xf32>
    %465 = tpu.concatenate %463, %464 in 0 : vector<4x32xf32>, vector<4x32xf32> -> vector<8x32xf32>
    %466 = vector.extract_strided_slice %461 {offsets = [0, 32], sizes = [4, 32], strides = [1, 1]} : vector<4x64xf32> to vector<4x32xf32>
    %467 = vector.extract_strided_slice %462 {offsets = [0, 32], sizes = [4, 32], strides = [1, 1]} : vector<4x64xf32> to vector<4x32xf32>
    %468 = tpu.concatenate %466, %467 in 0 : vector<4x32xf32>, vector<4x32xf32> -> vector<8x32xf32>
    %cst_105 = arith.constant 0.000000e+00 : f32
    %469 = vector.broadcast %cst_105 : f32 to vector<4x32xf32>
    %470 = vector.extract_strided_slice %460 {offsets = [0, 0], sizes = [4, 16], strides = [1, 1]} : vector<4x32xf32> to vector<4x16xf32>
    %471 = arith.truncf %470 : vector<4x16xf32> to vector<4x16xbf16>
    %472 = vector.extract_strided_slice %465 {offsets = [0, 0], sizes = [8, 16], strides = [1, 1]} : vector<8x32xf32> to vector<8x16xf32>
    %473 = arith.truncf %472 : vector<8x16xf32> to vector<8x16xbf16>
    %cst_106 = arith.constant dense<0.000000e+00> : vector<4x8xf32>
    %474 = tpu.matmul %471, %473, %cst_106 {dimension_numbers = #tpu.dot_dimension_numbers<[1], [1], [0], [0], [0, 0, 1, 0], [], []>} : vector<4x16xbf16>, vector<8x16xbf16>, vector<4x8xf32> -> vector<4x8xf32>
    %cst_107 = arith.constant dense<0xFF800000> : vector<4xf32>
    %475 = vector.multi_reduction <maximumf>, %474, %cst_107 [1] : vector<4x8xf32> to vector<4xf32>
    %476 = vector.shape_cast %475 : vector<4xf32> to vector<4x1xf32>
    %477 = vector.broadcast %476 : vector<4x1xf32> to vector<4x8xf32>
    %478 = arith.subf %474, %477 : vector<4x8xf32>
    %479 = math.exp %478 : vector<4x8xf32>
    %cst_108 = arith.constant dense<0.000000e+00> : vector<4xf32>
    %480 = vector.multi_reduction <add>, %479, %cst_108 [1] : vector<4x8xf32> to vector<4xf32>
    %481 = vector.shape_cast %480 : vector<4xf32> to vector<4x1xf32>
    %482 = tpu.reciprocal %481 {approx = true} : vector<4x1xf32> -> vector<4x1xf32>
    %483 = vector.broadcast %482 : vector<4x1xf32> to vector<4x8xf32>
    %484 = arith.mulf %479, %483 : vector<4x8xf32>
    %485 = arith.truncf %484 : vector<4x8xf32> to vector<4x8xbf16>
    %486 = vector.extract_strided_slice %468 {offsets = [0, 0], sizes = [8, 16], strides = [1, 1]} : vector<8x32xf32> to vector<8x16xf32>
    %487 = arith.truncf %486 : vector<8x16xf32> to vector<8x16xbf16>
    %cst_109 = arith.constant dense<0.000000e+00> : vector<4x16xf32>
    %488 = tpu.matmul %485, %487, %cst_109 {dimension_numbers = #tpu.dot_dimension_numbers<[1], [0], [0], [1], [0, 0, 1, 1], [], []>} : vector<4x8xbf16>, vector<8x16xbf16>, vector<4x16xf32> -> vector<4x16xf32>
    %489 = arith.truncf %488 : vector<4x16xf32> to vector<4x16xbf16>
    %490 = vector.extract_strided_slice %61 {offsets = [0, 0], sizes = [16, 32], strides = [1, 1]} : vector<32x32xbf16> to vector<16x32xbf16>
    %cst_110 = arith.constant dense<0.000000e+00> : vector<4x32xf32>
    %491 = tpu.matmul %489, %490, %cst_110 {dimension_numbers = #tpu.dot_dimension_numbers<[1], [0], [0], [1], [0, 0, 1, 1], [], []>} : vector<4x16xbf16>, vector<16x32xbf16>, vector<4x32xf32> -> vector<4x32xf32>
    %492 = arith.addf %469, %491 : vector<4x32xf32>
    %493 = vector.extract_strided_slice %460 {offsets = [0, 16], sizes = [4, 16], strides = [1, 1]} : vector<4x32xf32> to vector<4x16xf32>
    %494 = arith.truncf %493 : vector<4x16xf32> to vector<4x16xbf16>
    %495 = vector.extract_strided_slice %465 {offsets = [0, 16], sizes = [8, 16], strides = [1, 1]} : vector<8x32xf32> to vector<8x16xf32>
    %496 = arith.truncf %495 : vector<8x16xf32> to vector<8x16xbf16>
    %cst_111 = arith.constant dense<0.000000e+00> : vector<4x8xf32>
    %497 = tpu.matmul %494, %496, %cst_111 {dimension_numbers = #tpu.dot_dimension_numbers<[1], [1], [0], [0], [0, 0, 1, 0], [], []>} : vector<4x16xbf16>, vector<8x16xbf16>, vector<4x8xf32> -> vector<4x8xf32>
    %cst_112 = arith.constant dense<0xFF800000> : vector<4xf32>
    %498 = vector.multi_reduction <maximumf>, %497, %cst_112 [1] : vector<4x8xf32> to vector<4xf32>
    %499 = vector.shape_cast %498 : vector<4xf32> to vector<4x1xf32>
    %500 = vector.broadcast %499 : vector<4x1xf32> to vector<4x8xf32>
    %501 = arith.subf %497, %500 : vector<4x8xf32>
    %502 = math.exp %501 : vector<4x8xf32>
    %cst_113 = arith.constant dense<0.000000e+00> : vector<4xf32>
    %503 = vector.multi_reduction <add>, %502, %cst_113 [1] : vector<4x8xf32> to vector<4xf32>
    %504 = vector.shape_cast %503 : vector<4xf32> to vector<4x1xf32>
    %505 = tpu.reciprocal %504 {approx = true} : vector<4x1xf32> -> vector<4x1xf32>
    %506 = vector.broadcast %505 : vector<4x1xf32> to vector<4x8xf32>
    %507 = arith.mulf %502, %506 : vector<4x8xf32>
    %508 = arith.truncf %507 : vector<4x8xf32> to vector<4x8xbf16>
    %509 = vector.extract_strided_slice %468 {offsets = [0, 16], sizes = [8, 16], strides = [1, 1]} : vector<8x32xf32> to vector<8x16xf32>
    %510 = arith.truncf %509 : vector<8x16xf32> to vector<8x16xbf16>
    %cst_114 = arith.constant dense<0.000000e+00> : vector<4x16xf32>
    %511 = tpu.matmul %508, %510, %cst_114 {dimension_numbers = #tpu.dot_dimension_numbers<[1], [0], [0], [1], [0, 0, 1, 1], [], []>} : vector<4x8xbf16>, vector<8x16xbf16>, vector<4x16xf32> -> vector<4x16xf32>
    %512 = arith.truncf %511 : vector<4x16xf32> to vector<4x16xbf16>
    %513 = vector.extract_strided_slice %61 {offsets = [16, 0], sizes = [16, 32], strides = [1, 1]} : vector<32x32xbf16> to vector<16x32xbf16>
    %cst_115 = arith.constant dense<0.000000e+00> : vector<4x32xf32>
    %514 = tpu.matmul %512, %513, %cst_115 {dimension_numbers = #tpu.dot_dimension_numbers<[1], [0], [0], [1], [0, 0, 1, 1], [], []>} : vector<4x16xbf16>, vector<16x32xbf16>, vector<4x32xf32> -> vector<4x32xf32>
    %515 = arith.addf %492, %514 : vector<4x32xf32>
    %516 = tpu.concatenate %123, %179, %235, %291, %347, %403, %459, %515 in 0 : vector<4x32xf32>, vector<4x32xf32>, vector<4x32xf32>, vector<4x32xf32>, vector<4x32xf32>, vector<4x32xf32>, vector<4x32xf32>, vector<4x32xf32> -> vector<32x32xf32>
    %517 = arith.addf %5, %516 : vector<32x32xf32>
    %518 = vector.extract_strided_slice %7 {offsets = [4, 0], sizes = [1, 32], strides = [1, 1]} : vector<6x32xf32> to vector<1x32xf32>
    %519 = vector.extract_strided_slice %7 {offsets = [5, 0], sizes = [1, 32], strides = [1, 1]} : vector<6x32xf32> to vector<1x32xf32>
    %cst_116 = arith.constant dense<0.000000e+00> : vector<32xf32>
    %520 = vector.multi_reduction <add>, %517, %cst_116 [1] : vector<32x32xf32> to vector<32xf32>
    %521 = vector.shape_cast %520 : vector<32xf32> to vector<32x1xf32>
    %cst_117 = arith.constant 3.200000e+01 : f32
    %522 = vector.broadcast %cst_117 : f32 to vector<32x1xf32>
    %523 = arith.divf %521, %522 : vector<32x1xf32>
    %524 = vector.broadcast %523 : vector<32x1xf32> to vector<32x32xf32>
    %525 = arith.subf %517, %524 : vector<32x32xf32>
    %526 = arith.mulf %525, %525 : vector<32x32xf32>
    %cst_118 = arith.constant dense<0.000000e+00> : vector<32xf32>
    %527 = vector.multi_reduction <add>, %526, %cst_118 [1] : vector<32x32xf32> to vector<32xf32>
    %528 = vector.shape_cast %527 : vector<32xf32> to vector<32x1xf32>
    %cst_119 = arith.constant 3.200000e+01 : f32
    %529 = vector.broadcast %cst_119 : f32 to vector<32x1xf32>
    %530 = arith.divf %528, %529 : vector<32x1xf32>
    %531 = vector.broadcast %523 : vector<32x1xf32> to vector<32x32xf32>
    %532 = arith.subf %517, %531 : vector<32x32xf32>
    %cst_120 = arith.constant 9.99999974E-6 : f32
    %533 = vector.broadcast %cst_120 : f32 to vector<32x1xf32>
    %534 = arith.addf %530, %533 : vector<32x1xf32>
    %535 = math.rsqrt %534 : vector<32x1xf32>
    %536 = vector.broadcast %535 : vector<32x1xf32> to vector<32x32xf32>
    %537 = arith.mulf %532, %536 : vector<32x32xf32>
    %538 = vector.broadcast %518 : vector<1x32xf32> to vector<32x32xf32>
    %539 = arith.mulf %537, %538 : vector<32x32xf32>
    %540 = vector.broadcast %519 : vector<1x32xf32> to vector<32x32xf32>
    %541 = arith.addf %539, %540 : vector<32x32xf32>
    %542 = arith.truncf %541 : vector<32x32xf32> to vector<32x32xbf16>
    %c0_121 = arith.constant 0 : index
    %c0_122 = arith.constant 0 : index
    %c0_123 = arith.constant 0 : index
    %543 = vector.load %arg9[%c0_121, %c0_122, %c0_123] : memref<1x32x64xbf16, #tpu.memory_space<vmem>>, vector<1x32x64xbf16>
    %544 = vector.shape_cast %543 : vector<1x32x64xbf16> to vector<32x64xbf16>
    %cst_124 = arith.constant dense<0.000000e+00> : vector<32x64xf32>
    %545 = tpu.matmul %542, %544, %cst_124 {dimension_numbers = #tpu.dot_dimension_numbers<[1], [0], [0], [1], [0, 0, 1, 1], [], []>} : vector<32x32xbf16>, vector<32x64xbf16>, vector<32x64xf32> -> vector<32x64xf32>
    %546 = arith.mulf %545, %545 : vector<32x64xf32>
    %547 = arith.mulf %545, %546 : vector<32x64xf32>
    %cst_125 = arith.constant 4.471500e-02 : f32
    %548 = vector.broadcast %cst_125 : f32 to vector<32x64xf32>
    %549 = arith.mulf %548, %547 : vector<32x64xf32>
    %550 = arith.addf %545, %549 : vector<32x64xf32>
    %cst_126 = arith.constant 0.797884583 : f32
    %551 = vector.broadcast %cst_126 : f32 to vector<32x64xf32>
    %552 = arith.mulf %551, %550 : vector<32x64xf32>
    %553 = math.tanh %552 : vector<32x64xf32>
    %cst_127 = arith.constant 1.000000e+00 : f32
    %554 = vector.broadcast %cst_127 : f32 to vector<32x64xf32>
    %555 = arith.addf %554, %553 : vector<32x64xf32>
    %cst_128 = arith.constant 5.000000e-01 : f32
    %556 = vector.broadcast %cst_128 : f32 to vector<32x64xf32>
    %557 = arith.mulf %556, %555 : vector<32x64xf32>
    %558 = arith.mulf %545, %557 : vector<32x64xf32>
    %559 = arith.truncf %558 : vector<32x64xf32> to vector<32x64xbf16>
    %c0_129 = arith.constant 0 : index
    %c0_130 = arith.constant 0 : index
    %c0_131 = arith.constant 0 : index
    %560 = vector.load %arg10[%c0_129, %c0_130, %c0_131] : memref<1x64x32xbf16, #tpu.memory_space<vmem>>, vector<1x64x32xbf16>
    %561 = vector.shape_cast %560 : vector<1x64x32xbf16> to vector<64x32xbf16>
    %cst_132 = arith.constant dense<0.000000e+00> : vector<32x32xf32>
    %562 = tpu.matmul %559, %561, %cst_132 {dimension_numbers = #tpu.dot_dimension_numbers<[1], [0], [0], [1], [0, 0, 1, 1], [], []>} : vector<32x64xbf16>, vector<64x32xbf16>, vector<32x32xf32> -> vector<32x32xf32>
    %563 = arith.addf %517, %562 : vector<32x32xf32>
    %c0_133 = arith.constant 0 : index
    %c0_134 = arith.constant 0 : index
    %564 = vector.load %arg12[%c0_133, %c0_134] : memref<32x32xf32, #tpu.memory_space<vmem>>, vector<32x32xf32>
    tpu.vector_store %arg12[%c0_133, %c0_134], %563 {strides = array<i32>} : memref<32x32xf32, #tpu.memory_space<vmem>>, vector<32x32xf32>,
    %c1_i32 = arith.constant 1 : i32
    %565 = arith.cmpi eq, %arg1, %c1_i32 : i32
    %566 = arith.extui %565 : i1 to i32
    %c0_i32_135 = arith.constant 0 : i32
    %567 = arith.cmpi ne, %566, %c0_i32_135 : i32
    scf.if %567 {
      %c0_136 = arith.constant 0 : index
      %c0_137 = arith.constant 0 : index
      %568 = vector.load %arg5[%c0_136, %c0_137] : memref<2x32xf32, #tpu.memory_space<vmem>>, vector<2x32xf32>
      %569 = vector.extract_strided_slice %568 {offsets = [0, 0], sizes = [1, 32], strides = [1, 1]} : vector<2x32xf32> to vector<1x32xf32>
      %570 = vector.extract_strided_slice %568 {offsets = [1, 0], sizes = [1, 32], strides = [1, 1]} : vector<2x32xf32> to vector<1x32xf32>
      %cst_138 = arith.constant dense<0.000000e+00> : vector<32xf32>
      %571 = vector.multi_reduction <add>, %563, %cst_138 [1] : vector<32x32xf32> to vector<32xf32>
      %572 = vector.shape_cast %571 : vector<32xf32> to vector<32x1xf32>
      %cst_139 = arith.constant 3.200000e+01 : f32
      %573 = vector.broadcast %cst_139 : f32 to vector<32x1xf32>
      %574 = arith.divf %572, %573 : vector<32x1xf32>
      %575 = vector.broadcast %574 : vector<32x1xf32> to vector<32x32xf32>
      %576 = arith.subf %563, %575 : vector<32x32xf32>
      %577 = arith.mulf %576, %576 : vector<32x32xf32>
      %cst_140 = arith.constant dense<0.000000e+00> : vector<32xf32>
      %578 = vector.multi_reduction <add>, %577, %cst_140 [1] : vector<32x32xf32> to vector<32xf32>
      %579 = vector.shape_cast %578 : vector<32xf32> to vector<32x1xf32>
      %cst_141 = arith.constant 3.200000e+01 : f32
      %580 = vector.broadcast %cst_141 : f32 to vector<32x1xf32>
      %581 = arith.divf %579, %580 : vector<32x1xf32>
      %582 = vector.broadcast %574 : vector<32x1xf32> to vector<32x32xf32>
      %583 = arith.subf %563, %582 : vector<32x32xf32>
      %cst_142 = arith.constant 9.99999974E-6 : f32
      %584 = vector.broadcast %cst_142 : f32 to vector<32x1xf32>
      %585 = arith.addf %581, %584 : vector<32x1xf32>
      %586 = math.rsqrt %585 : vector<32x1xf32>
      %587 = vector.broadcast %586 : vector<32x1xf32> to vector<32x32xf32>
      %588 = arith.mulf %583, %587 : vector<32x32xf32>
      %589 = vector.broadcast %569 : vector<1x32xf32> to vector<32x32xf32>
      %590 = arith.mulf %588, %589 : vector<32x32xf32>
      %591 = vector.broadcast %570 : vector<1x32xf32> to vector<32x32xf32>
      %592 = arith.addf %590, %591 : vector<32x32xf32>
      %c0_143 = arith.constant 0 : index
      %c0_144 = arith.constant 0 : index
      %593 = vector.load %arg11[%c0_143, %c0_144] : memref<32x32xf32, #tpu.memory_space<vmem>>, vector<32x32xf32>
      tpu.vector_store %arg11[%c0_143, %c0_144], %592 {strides = array<i32>} : memref<32x32xf32, #tpu.memory_space<vmem>>, vector<32x32xf32>,
    } else {
    }
    return
  }
  func.func @transform_0(%arg0: i32, %arg1: i32) -> (i32, i32) {
    %c0_i32 = arith.constant 0 : i32
    %c0_i32_0 = arith.constant 0 : i32
    return %arg0, %c0_i32 : i32, i32
  }
  func.func @transform_1(%arg0: i32, %arg1: i32) -> (i32, i32) {
    %c0_i32 = arith.constant 0 : i32
    %c0_i32_0 = arith.constant 0 : i32
    %c0_i32_1 = arith.constant 0 : i32
    return %c0_i32, %c0_i32_0 : i32, i32
  }
  func.func @transform_2(%arg0: i32, %arg1: i32) -> (i32, i32, i32) {
    %c0_i32 = arith.constant 0 : i32
    %c0_i32_0 = arith.constant 0 : i32
    %c0_i32_1 = arith.constant 0 : i32
    return %arg1, %c0_i32, %c0_i32_0 : i32, i32, i32
  }
  func.func @transform_3(%arg0: i32, %arg1: i32) -> (i32, i32) {
    %c0_i32 = arith.constant 0 : i32
    %c0_i32_0 = arith.constant 0 : i32
    %c0_i32_1 = arith.constant 0 : i32
    return %c0_i32, %c0_i32_0 : i32, i32
  }
  func.func @transform_4(%arg0: i32, %arg1: i32) -> (i32, i32, i32) {
    %c0_i32 = arith.constant 0 : i32
    %c0_i32_0 = arith.constant 0 : i32
    %c0_i32_1 = arith.constant 0 : i32
    return %arg1, %c0_i32, %c0_i32_0 : i32, i32, i32
  }
  func.func @transform_5(%arg0: i32, %arg1: i32) -> (i32, i32, i32) {
    %c0_i32 = arith.constant 0 : i32
    %c0_i32_0 = arith.constant 0 : i32
    %c0_i32_1 = arith.constant 0 : i32
    return %arg1, %c0_i32, %c0_i32_0 : i32, i32, i32
  }
  func.func @transform_6(%arg0: i32, %arg1: i32) -> (i32, i32, i32) {
    %c0_i32 = arith.constant 0 : i32
    %c0_i32_0 = arith.constant 0 : i32
    %c0_i32_1 = arith.constant 0 : i32
    return %arg1, %c0_i32, %c0_i32_0 : i32, i32, i32
  }
  func.func @transform_7(%arg0: i32, %arg1: i32) -> (i32, i32, i32) {
    %c0_i32 = arith.constant 0 : i32
    %c0_i32_0 = arith.constant 0 : i32
    %c0_i32_1 = arith.constant 0 : i32
    return %arg1, %c0_i32, %c0_i32_0 : i32, i32, i32
  }
  func.func @transform_8(%arg0: i32, %arg1: i32) -> (i32, i32, i32) {
    %c0_i32 = arith.constant 0 : i32
    %c0_i32_0 = arith.constant 0 : i32
    %c0_i32_1 = arith.constant 0 : i32
    return %arg1, %c0_i32, %c0_i32_0 : i32, i32, i32
  }
  func.func @transform_9(%arg0: i32, %arg1: i32) -> (i32, i32) {
    %c0_i32 = arith.constant 0 : i32
    %c0_i32_0 = arith.constant 0 : i32
    return %arg0, %c0_i32 : i32, i32
  }
}

</mosaic_0001>

<bundles_post_ra>
// kernel: split.0
= control target key start
LH: loop header
LB: loop body
LE: loop exit
PB: predicated region body
PF: predicated region fallthrough
CT: control target
= control target key end

     0   :  { %2 = vsyncpa [#allocation6], 0  ;;  %s97_s0 = inlined_call_operand.vmem [shape: f32[8,1,4,32], index: 0, kind: input, shape index: {}]   ;;  %s98_s1 = inlined_call_operand.hbm [shape: f32[4,1,4,32], index: 1, kind: output, shape index: {}]  }
   0x1   :  { %v35_v0 = vld [vmem:[%s97_s0 + $0x10] sm:$0xff]   ;;  %v37_v1 = vld [vmem:[%s97_s0 + $0x18] sm:$0xff]   ;;  %s66_s0 = smov [#allocation5]  }
   0x2   :  { %7 = vst [vmem:[#allocation5] sm:$0xff] %v35_v0   ;;  %15 = vst [vmem:[#allocation5 + $0x8] sm:$0xff] %v37_v1   ;;  %s23_s10 = sshll.u32 %s66_s0, 4  ;;  %s24_s10 = int_to_ptr.vmem [resolvable:$true] %s23_s10 }
   0x3   :  { %s42_s11 = scalar_lea.vmem %s24_s10, 256  ;;  %p47_p1 = scmp.lt.s32.totalorder %s24_s10, %s24_s10 }
   0x4   :  { %p43_p0 = scmp.ne.s32.totalorder %s24_s10, %s42_s11  ;;  %p48_p2 = scmp.lt.s32.totalorder %s42_s11, %s42_s11 }
   0x6   :  { %p49_p3 = por %p48_p2, %p47_p1 }
   0x8   :  { %p50_p4 = pnand %p49_p3, %p43_p0 }
   0xa   :  { %53 = shalt.err (!%p50_p4)
}
   0xb   :  { %s54_s14 = scalar_lea.hbm %s98_s1, 256 }
   0xc   :  { %p55_p5 = scmp.ne.s32.totalorder %s98_s1, %s54_s14  ;;  %p58_p6 = scmp.lt.u32.totalorder %s54_s14, %s98_s1 }
   0xe   :  { %p60_p7 = pnand %p58_p6, %p55_p5 }
  0x10   :  { %63 = shalt.err (!%p60_p7)
}
  0x11   :  { %s67_s19 = smov 64   ;;  %s68_s20 = smov 4  }
  0x12   :  { %29 = dma.vmem_to_hbm [thread:$0]  %s24_s10, 256, %s98_s1, [#allocation6], %s67_s19, %s67_s19, %s68_s20  }
  0x13   :  { %64 = dma.done.wait [#allocation6], 256  }
  0x14   :  { %65 = vsyncadd [#allocation6], 4294967040 }
  0x15   :  { %31 = vsyncpa [#allocation6], 1 }

// kernel: depth_model_forward.2
= control target key start
LH: loop header
LB: loop body
LE: loop exit
PB: predicated region body
PF: predicated region fallthrough
CT: control target
= control target key end

     0   :  { %8 = vsyncpa [#allocation3], 0  ;;  %s534_s0 = inlined_call_operand.hbm [shape: bf16[32,192], index: 0, kind: input, shape index: {}]   ;;  %s535_s1 = inlined_call_operand.hbm [shape: bf16[192,32], index: 1, kind: input, shape index: {}]   ;;  %s536_s2 = inlined_call_operand.hbm [shape: f32[1,32], index: 2, kind: input, shape index: {}]   ;;  %s537_s3 = inlined_call_operand.hbm [shape: bf16[32,32], index: 3, kind: output, shape index: {}]  }
   0x1   :  { %9 = vsyncpa [#allocation6], 0 }
   0x2   :  { %10 = vsyncpa [#allocation4], 0  ;;  %s447_s12 = smov [#allocation5]   ;;  %s353_s16 = scalar_lea.hbm %s535_s1, 1536 }
   0x3   :  { %s28_s13 = sshll.u32 %s447_s12, 4  ;;  %p354_p0 = scmp.ne.s32.totalorder %s535_s1, %s353_s16  ;;  %s29_s13 = int_to_ptr.vmem [resolvable:$true] %s28_s13 }
   0x4   :  { %p357_p1 = scmp.lt.u32.totalorder %s353_s16, %s535_s1 }
   0x6   :  { %p359_p2 = pnand %p357_p1, %p354_p0 }
   0x8   :  { %362 = shalt.err (!%p359_p2)
}
   0x9   :  { %s363_s21 = scalar_lea.vmem %s29_s13, 1536  ;;  %p368_p4 = scmp.lt.s32.totalorder %s29_s13, %s29_s13 }
   0xa   :  { %p364_p3 = scmp.ne.s32.totalorder %s29_s13, %s363_s21  ;;  %p369_p5 = scmp.lt.s32.totalorder %s363_s21, %s363_s21 }
   0xc   :  { %p370_p6 = por %p369_p5, %p368_p4 }
   0xe   :  { %p371_p7 = pnand %p370_p6, %p364_p3 }
  0x10   :  { %374 = shalt.err (!%p371_p7)
}
  0x11   :  { %s448_s22 = smov 64   ;;  %s449_s23 = smov 4  }
  0x12   :  { %34 = dma.hbm_to_vmem [thread:$0]  %s535_s1, 1536, %s29_s13, [#allocation6], %s448_s22, %s448_s22, %s449_s23  }
  0x13   :  { %s450_s26 = smov [#allocation2]   ;;  %s375_s30 = scalar_lea.hbm %s534_s0, 512 }
  0x14   :  { %s16_s27 = sshll.u32 %s450_s26, 4  ;;  %p376_p8 = scmp.ne.s32.totalorder %s534_s0, %s375_s30  ;;  %s17_s27 = int_to_ptr.vmem [resolvable:$true] %s16_s27 }
  0x15   :  { %p379_p9 = scmp.lt.u32.totalorder %s375_s30, %s534_s0 }
  0x17   :  { %p381_p10 = pnand %p379_p9, %p376_p8 }
  0x19   :  { %384 = shalt.err (!%p381_p10)
}
  0x1a   :  { %s385_s8 = scalar_lea.vmem %s17_s27, 512  ;;  %p390_p12 = scmp.lt.s32.totalorder %s17_s27, %s17_s27 }
  0x1b   :  { %p386_p11 = scmp.ne.s32.totalorder %s17_s27, %s385_s8  ;;  %p391_p13 = scmp.lt.s32.totalorder %s385_s8, %s385_s8 }
  0x1d   :  { %p392_p0 = por %p391_p13, %p390_p12 }
  0x1f   :  { %p393_p1 = pnand %p392_p0, %p386_p11 }
  0x21   :  { %396 = shalt.err (!%p393_p1)
}
  0x22   :  { %s451_s1 = smov 128   ;;  %s452_s9 = smov 8  }
  0x23   :  { %22 = dma.hbm_to_vmem [thread:$0]  %s534_s0, 512, %s17_s27, [#allocation3], %s451_s1, %s451_s1, %s452_s9  }
  0x24   :  { %s453_s12 = smov [#allocation7]   ;;  %s397_s16 = scalar_lea.hbm %s536_s2, 16 }
  0x25   :  { %s41_s13 = sshll.u32 %s453_s12, 4  ;;  %p398_p2 = scmp.ne.s32.totalorder %s536_s2, %s397_s16  ;;  %s42_s13 = int_to_ptr.vmem [resolvable:$true] %s41_s13 }
  0x26   :  { %p401_p3 = scmp.lt.u32.totalorder %s397_s16, %s536_s2 }
  0x28   :  { %p403_p4 = pnand %p401_p3, %p398_p2 }
  0x2a   :  { %406 = shalt.err (!%p403_p4)
}
  0x2b   :  { %s407_s21 = scalar_lea.vmem %s42_s13, 16  ;;  %s411_s0 = scalar_lea.vmem %s42_s13, 32 }
  0x2c   :  { %p408_p5 = scmp.ne.s32.totalorder %s42_s13, %s407_s21  ;;  %p412_p6 = scmp.lt.s32.totalorder %s42_s13, %s42_s13 }
  0x2d   :  { %p413_p7 = scmp.lt.s32.totalorder %s411_s0, %s407_s21 }
  0x2f   :  { %p414_p8 = por %p413_p7, %p412_p6 }
  0x31   :  { %p415_p9 = pnand %p414_p8, %p408_p5 }
  0x33   :  { %418 = shalt.err (!%p415_p9)
}
  0x34   :  { %44 = dma.hbm_to_vmem [thread:$0]  %s536_s2, 16, %s42_s13, [#allocation6]  }
  0x35   :  { %441 = dma.done.wait [#allocation3], 512  }
  0x36   :  { %442 = vsyncadd [#allocation3], 4294966784 }
  0x37   :  { %443 = dma.done.wait [#allocation6], 1552  }
  0x38   :  { %444 = vsyncadd [#allocation6], 4294965744  ;;  %v454_v0 = vmov 0   ;;  %v335_v1 = vld [vmem:[#allocation5] sm:$0xff]   ;;  %v336_v2 = vld [vmem:[#allocation5 + $0x8] sm:$0xff]   ;;  %vm180_vm0 = vcmask 523264  }
  0x39   :  { %187 = vmatprep.subr.bf16.mxu0 %v454_v0  ;;  %302 = vmatprep.subr.bf16.mxu1 %v454_v0  ;;  %v337_v3 = vld [vmem:[#allocation5 + $0x10] sm:$0xff]   ;;  %v338_v4 = vld [vmem:[#allocation5 + $0x18] sm:$0xff]   ;;  %v349_v5 = vld [vmem:[#allocation2 + $0x4] ss:$8 sps:$4 sm:$0xff]   ;;  %vm252_vm1 = vcmask 257024   ;;  %s455_s2 = smov [#allocation8]  }
  0x3a   :  { %188 = vmatpush1.bf16.msra.mxu0 %v335_v1  ;;  %314 = vmatpush1.bf16.msra.mxu1 %v335_v1  ;;  %v339_v6 = vld [vmem:[#allocation5 + $0x20] sm:$0xff]   ;;  %v352_v7 = vld [vmem:[#allocation2 + $0x14] ss:$8 sps:$4 sm:$0xff]   ;;  %v340_v8 = vld [vmem:[#allocation5 + $0x28] sm:$0xff]   ;;  %s262_s26 = sshll.u32 %s455_s2, 4  ;;  %s263_s26 = int_to_ptr.vmem [resolvable:$true] %s262_s26 }
  0x3b   :  { %189 = vmatprep.subr.bf16.mxu0 %v454_v0  ;;  %303 = vmatprep.subr.bf16.mxu1 %v454_v0  ;;  %v341_v9 = vld [vmem:[#allocation5 + $0x30] sm:$0xff]   ;;  %v342_v10 = vld [vmem:[#allocation5 + $0x38] sm:$0xff]   ;;  %v343_v11 = vld [vmem:[#allocation5 + $0x40] sm:$0xff]   ;;  %s419_s27 = scalar_lea.vmem %s263_s26, 256  ;;  %p424_p11 = scmp.lt.s32.totalorder %s263_s26, %s263_s26 }
  0x3c   :  { %292 = vmatprep.mubr.msk.bf16.mxu0 %vm180_vm0, %v349_v5  ;;  %293 = vmatprep.mubr.msk.bf16.mxu1 %vm180_vm0, %v352_v7  ;;  %v344_v12 = vld [vmem:[#allocation5 + $0x48] sm:$0xff]   ;;  %v345_v13 = vld [vmem:[#allocation5 + $0x50] sm:$0xff]   ;;  %v346_v14 = vld [vmem:[#allocation5 + $0x58] sm:$0xff]   ;;  %p420_p10 = scmp.ne.s32.totalorder %s263_s26, %s419_s27  ;;  %p425_p12 = scmp.lt.s32.totalorder %s419_s27, %s419_s27 }
  0x3d   :  { %v347_v15 = vld [vmem:[#allocation2] ss:$8 sps:$4 sm:$0xff]   ;;  %v350_v16 = vld [vmem:[#allocation2 + $0x10] ss:$8 sps:$4 sm:$0xff]  }
  0x3e   :  { %190 = vmatpush1.bf16.msra.mxu0 %v336_v2  ;;  %315 = vmatpush1.bf16.msra.mxu1 %v336_v2  ;;  %v275_v17 = vld [vmem:[#allocation7] ss:$0 sm:$0xff]  ;;  %p426_p13 = por %p425_p12, %p424_p11 }
  0x3f   :  { %191 = vmatprep.subr.bf16.mxu0 %v454_v0  ;;  %304 = vmatprep.subr.bf16.mxu1 %v454_v0 }
  0x40   :  { %p427_p0 = pnand %p426_p13, %p420_p10 }
  0x42   :  { %192 = vmatpush1.bf16.msra.mxu0 %v337_v3  ;;  %316 = vmatpush1.bf16.msra.mxu1 %v337_v3 }
  0x43   :  { %193 = vmatprep.subr.bf16.mxu0 %v454_v0  ;;  %305 = vmatprep.subr.bf16.mxu1 %v454_v0 }
  0x46   :  { %194 = vmatpush1.bf16.msra.mxu0 %v338_v4  ;;  %317 = vmatpush1.bf16.msra.mxu1 %v338_v4 }
  0x47   :  { %195 = vmatprep.subr.bf16.mxu0 %v454_v0  ;;  %306 = vmatprep.subr.bf16.mxu1 %v454_v0 }
  0x4a   :  { %196 = vmatpush1.bf16.msra.mxu0 %v339_v6  ;;  %318 = vmatpush1.bf16.msra.mxu1 %v339_v6 }
  0x4b   :  { %197 = vmatprep.subr.bf16.mxu0 %v454_v0  ;;  %307 = vmatprep.subr.bf16.mxu1 %v454_v0 }
  0x4e   :  { %198 = vmatpush1.bf16.msra.mxu0 %v340_v8  ;;  %319 = vmatpush1.bf16.msra.mxu1 %v340_v8 }
  0x4f   :  { %199 = vmatprep.subr.bf16.mxu0 %v454_v0  ;;  %308 = vmatprep.subr.bf16.mxu1 %v454_v0 }
  0x52   :  { %200 = vmatpush1.bf16.msra.mxu0 %v341_v9  ;;  %320 = vmatpush1.bf16.msra.mxu1 %v341_v9 }
  0x53   :  { %201 = vmatprep.subr.bf16.mxu0 %v454_v0  ;;  %309 = vmatprep.subr.bf16.mxu1 %v454_v0 }
  0x56   :  { %202 = vmatpush1.bf16.msra.mxu0 %v342_v10  ;;  %321 = vmatpush1.bf16.msra.mxu1 %v342_v10 }
  0x57   :  { %203 = vmatprep.subr.bf16.mxu0 %v454_v0  ;;  %310 = vmatprep.subr.bf16.mxu1 %v454_v0 }
  0x5a   :  { %204 = vmatpush1.bf16.msra.mxu0 %v343_v11  ;;  %322 = vmatpush1.bf16.msra.mxu1 %v343_v11 }
  0x5b   :  { %205 = vmatprep.subr.bf16.mxu0 %v454_v0  ;;  %311 = vmatprep.subr.bf16.mxu1 %v454_v0 }
  0x5e   :  { %206 = vmatpush1.bf16.msra.mxu0 %v344_v12  ;;  %323 = vmatpush1.bf16.msra.mxu1 %v344_v12 }
  0x5f   :  { %207 = vmatprep.subr.bf16.mxu0 %v454_v0  ;;  %312 = vmatprep.subr.bf16.mxu1 %v454_v0 }
  0x62   :  { %208 = vmatpush1.bf16.msra.mxu0 %v345_v13  ;;  %324 = vmatpush1.bf16.msra.mxu1 %v345_v13 }
  0x63   :  { %209 = vmatprep.subr.bf16.mxu0 %v454_v0  ;;  %313 = vmatprep.subr.bf16.mxu1 %v454_v0 }
  0x66   :  { %210 = vmatpush1.bf16.msra.mxu0 %v346_v14  ;;  %325 = vmatpush1.bf16.msra.mxu1 %v346_v14 }
  0x69   :  { %220 = vmatmul.mubr.bf16.vlgmr.msra.gmra.mrb[0].mxu0 %v347_v15  ;;  %228 = vmatmul.mubr.bf16.vlgmr.msra.gmra.mrb[0].mxu1 %v350_v16 }
 0x13c   :  { %v221_v18 = vpop.f32.mrb[0].mxu0  ;;  %v229_v19 = vpop.f32.mrb[0].mxu1 }
 0x13d   :  { %v222_v20 = vadd.f32 %v275_v17, %v221_v18  ;;  %v230_v21 = vadd.f32 %v275_v17, %v229_v19  ;;  %v223_v22 = vpop.f32.mrb[1].mxu0  ;;  %v231_v23 = vpop.f32.mrb[1].mxu1 }
 0x13e   :  { %v224_v24 = vpop.f32.mrb[2].mxu0  ;;  %v232_v25 = vpop.f32.mrb[2].mxu1 }
 0x13f   :  { %v298_v26 = vpack.c.bf16 %v222_v20, %v222_v20  ;;  %v300_v27 = vpack.c.bf16 %v230_v21, %v230_v21  ;;  %v225_v28 = vadd.f32 %v275_v17, %v224_v24  ;;  %v233_v29 = vadd.f32 %v275_v17, %v232_v25  ;;  %v226_v30 = vpop.f32.mrb[3].mxu0  ;;  %v234_v31 = vpop.f32.mrb[3].mxu1 }
 0x141   :  { %253 = vst.msk [vmem:[#allocation8] sm:$0xf] %vm252_vm1, %v298_v26  ;;  %255 = vst.msk [vmem:[#allocation8 + $0x8] sm:$0xf] %vm252_vm1, %v300_v27  ;;  %v299_v32 = vpack.c.bf16 %v225_v28, %v225_v28  ;;  %v301_v33 = vpack.c.bf16 %v233_v29, %v233_v29 }
 0x143   :  { %254 = vst.msk [vmem:[#allocation8 + $0x4] sm:$0xf] %vm252_vm1, %v299_v32  ;;  %256 = vst.msk [vmem:[#allocation8 + $0xc] sm:$0xf] %vm252_vm1, %v301_v33 }
 0x144   :  { %430 = shalt.err (!%p427_p0)
}
 0x145   :  { %s431_s30 = scalar_lea.hbm %s537_s3, 256 }
 0x146   :  { %p432_p1 = scmp.ne.s32.totalorder %s537_s3, %s431_s30  ;;  %p435_p2 = scmp.lt.u32.totalorder %s431_s30, %s537_s3 }
 0x148   :  { %p437_p3 = pnand %p435_p2, %p432_p1 }
 0x14a   :  { %440 = shalt.err (!%p437_p3)
}
 0x14b   :  { %268 = dma.vmem_to_hbm [thread:$0]  %s263_s26, 256, %s537_s3, [#allocation4], %s448_s22, %s448_s22, %s449_s23  }
 0x14c   :  { %445 = dma.done.wait [#allocation4], 256  }
 0x14d   :  { %446 = vsyncadd [#allocation4], 4294967040 }
 0x14e   :  { %272 = vsyncpa [#allocation3], 1 }
 0x14f   :  { %273 = vsyncpa [#allocation6], 1 }
 0x150   :  { %274 = vsyncpa [#allocation4], 1 }

// kernel: depth_model_forward.3
= control target key start
LH: loop header
LB: loop body
LE: loop exit
PB: predicated region body
PF: predicated region fallthrough
CT: control target
= control target key end

     0   :  { %s6417_s0 = inlined_call_operand.hbm [shape: bf16[32,32], index: 0, kind: input, shape index: {}]   ;;  %s6418_s1 = inlined_call_operand.hbm [shape: f32[4,32], index: 1, kind: input, shape index: {}]   ;;  %s6419_s2 = inlined_call_operand.hbm [shape: f32[2,6,32], index: 2, kind: input, shape index: {}]   ;;  %s6420_s3 = inlined_call_operand.hbm [shape: f32[2,32], index: 3, kind: input, shape index: {}]   ;;  %s6421_s4 = inlined_call_operand.hbm [shape: bf16[2,32,32], index: 4, kind: input, shape index: {}]   ;;  %s6422_s5 = inlined_call_operand.hbm [shape: bf16[2,32,64], index: 5, kind: input, shape index: {}]   ;;  %s6423_s6 = inlined_call_operand.hbm [shape: bf16[2,32,32], index: 6, kind: input, shape index: {}]   ;;  %s6424_s7 = inlined_call_operand.hbm [shape: bf16[2,32,64], index: 7, kind: input, shape index: {}]   ;;  %s6425_s8 = inlined_call_operand.hbm [shape: bf16[2,64,32], index: 8, kind: input, shape index: {}]   ;;  %s6426_s9 = inlined_call_operand.hbm [shape: f32[32,32], index: 9, kind: output, shape index: {}]  }
   0x1   :  { %6449 = sst [smem:[#allocation34_spill]] %s6417_s0 }
   0x2   :  { %6450 = sst [smem:[#allocation35_spill]] %s6418_s1 }
   0x3   :  { %6451 = sst [smem:[#allocation36_spill]] %s6421_s4 }
   0x4   :  { %6452 = sst [smem:[#allocation37_spill]] %s6423_s6 }
   0x5   :  { %6453 = sst [smem:[#allocation38_spill]] %s6426_s9 }
   0x6   :  { %14 = vsyncpa [#allocation4], 0 }
   0x7   :  { %15 = vsyncpa [#allocation7], 0 }
   0x8   :  { %16 = vsyncpa [#allocation11], 0 }
   0x9   :  { %18 = vsyncpa [#allocation11 + $0x1], 0 }
   0xa   :  { %19 = vsyncpa [#allocation14], 0 }
   0xb   :  { %21 = vsyncpa [#allocation14 + $0x1], 0 }
   0xc   :  { %22 = vsyncpa [#allocation17], 0 }
   0xd   :  { %24 = vsyncpa [#allocation17 + $0x1], 0 }
   0xe   :  { %25 = vsyncpa [#allocation5], 0  ;;  %s5346_s30 = smov 0   ;;  %s5348_s10 = smov 0  }
   0xf   :  { %s5350_s11 = smov 0   ;;  %s5352_s12 = smov 0  }
  0x10   :  { %s5354_s13 = smov 0   ;;  %s5356_s14 = smov 0  }
  0x11 LB: > { %6454 = sst [smem:[#allocation27_spill]] %s5259_s10  ;;  %s5375_s15 = sadd.s32 4294967295, %s5275_s14   ;;  %s5275_s14 = sphi %s5356_s14, %s31_s14   ;;  %s5271_s13 = sphi %s5354_s13, %s6504_s13   ;;  %s5267_s12 = sphi %s5352_s12, %s6503_s12   ;;  %s5263_s11 = sphi %s5350_s11, %s6502_s11   ;;  %s5259_s10 = sphi %s5348_s10, %s6501_s10   ;;  %s5255_s30 = sphi %s5346_s30, %s6499_s30  }
  0x12   : > { %6455 = sst [smem:[#allocation28_spill]] %s5267_s12  ;;  %p104_p0 = scmp.ne.s32.totalorder %s5263_s11, %s5259_s10 }
  0x13   : > { %6456 = sst [smem:[#allocation29_spill]] %s5275_s14  ;;  %p105_p1 = scmp.eq.s32.totalorder %s5275_s14, 0 }
  0x14   : > { %6457 = sst [smem:[#allocation30_spill]] %s5375_s15  ;;  %p110_p2 = scmp.ne.s32.totalorder %s5259_s10, %s5255_s30 }
  0x15   : > { %p6427_p3 = scmp.eq.s32.totalorder %s5375_s15, 0  ;;  %p106_p4 = por %p105_p1, %p104_p0 }
  0x16   : > { %p4053_p5 = scmp.ge.s32.totalorder %s5275_s14, 1  ;;  %p298_p7 = scmp.lt.s32.totalorder %s5275_s14, 3 }
  0x17   : > { %p5386_p6 = por %p6427_p3, %p110_p2  ;;  %s5277_s19 = smov [#allocation3]  }
  0x18   : > { %p5391_p8 = pnand %p4053_p5, %p298_p7  ;;  %s313_s20 = sshll.u32 %s5277_s19, 4  ;;  %s5395_s20 = int_to_ptr.vmem [resolvable:$true] %s313_s20 }
  0x19   : > { %s6458_s17 = scalar_select %p5386_p6, 1, 0 }
  0x1a   : > { %s6460_s18 = scalar_select %p5391_p8, 1, 0 }
  0x1b   : > { %6459 = sst [smem:[#allocation31_spill]] %s6458_s17  ;;  %p4685_p9 = pneg %p5391_p8 }
  0x1c   : > { %6461 = sst [smem:[#allocation32_spill]] %s6460_s18  ;;  %p4717_p10 = scmp.lt.s32.totalorder %s5275_s14, 2 }
  0x1d   : > { %p5402_p11 = pnand %p4685_p9, %p6427_p3  ;;  %s5278_s23 = smov [#allocation6]  }
  0x1e   : > { %p5406_p12 = pnand %p4717_p10, %p106_p4  ;;  %s327_s24 = sshll.u32 %s5278_s23, 4  ;;  %s5410_s24 = int_to_ptr.vmem [resolvable:$true] %s327_s24 }
  0x1f   : > { %s6462_s21 = scalar_select %p5402_p11, 1, 0 }
  0x20   : > { %s6463_s22 = scalar_select %p5406_p12, 1, 0 }
  0x21   : > { %s6464_s0 = sld [smem:[#allocation34_spill]]  ;;  %p5420_p0 = pneg %p5402_p11 }
  0x23   : > { %s6465_s30 = scalar_select %p5420_p0, 1, 0 }
  0x27   : > { %s4907_s27 = scalar_lea.hbm %s6464_s0, 256 }
  0x28   : > { %p4908_p13 = scmp.ne.s32.totalorder %s6464_s0, %s4907_s27  ;;  %p4914_p4 = scmp.lt.u32.totalorder %s4907_s27, %s6464_s0 }
  0x2a   : > { %p4910_p1 = pnand %p5420_p0, %p4908_p13 }
  0x2c   : > { %p4911_p2 = pneg %p4910_p1 }
  0x2e   : > { %p4916_p5 = pnand %p4914_p4, %p4911_p2 }
  0x30   : > { %4919 = shalt.err (!%p4916_p5)
}
  0x31   : > { %s4920_s25 = scalar_lea.vmem %s5395_s20, 256  ;;  %p4928_p3 = scmp.lt.s32.totalorder %s5395_s20, %s5395_s20 }
  0x32   : > { %p4921_p7 = scmp.ne.s32.totalorder %s5395_s20, %s4920_s25  ;;  %p4929_p6 = scmp.lt.s32.totalorder %s4920_s25, %s4920_s25 }
  0x34   : > { %p4923_p9 = pnand %p4921_p7, %p5420_p0  ;;  %p4930_p13 = por %p4929_p6, %p4928_p3 }
  0x36   : > { %p4924_p10 = pneg %p4923_p9 }
  0x38   : > { %p4931_p1 = pnand %p4930_p13, %p4924_p10 }
  0x3a   : > { %4934 = shalt.err (!%p4931_p1)
}
  0x3b   : > { %s6432_s26 = smov 64   ;;  %s6434_s27 = smov 4  }
  0x3c   : > { %4688 = dma.hbm_to_vmem [thread:$0]  (!%p5402_p11), %s6464_s0, 256, %s5395_s20, [#allocation4], %s6432_s26, %s6432_s26, %s6434_s27  }
  0x3d   : > { %s6466_s1 = sld [smem:[#allocation35_spill]] }
  0x43   : > { %s4935_s25 = scalar_lea.hbm %s6466_s1, 64 }
  0x44   : > { %p4936_p3 = scmp.ne.s32.totalorder %s6466_s1, %s4935_s25  ;;  %p4942_p4 = scmp.lt.u32.totalorder %s4935_s25, %s6466_s1 }
  0x46   : > { %p4938_p6 = pnand %p4936_p3, %p5420_p0 }
  0x48   : > { %p4939_p2 = pneg %p4938_p6 }
  0x4a   : > { %p4944_p5 = pnand %p4942_p4, %p4939_p2 }
  0x4c   : > { %4947 = shalt.err (!%p4944_p5)
}
  0x4d   : > { %s4948_s20 = scalar_lea.vmem %s5410_s24, 64  ;;  %p4956_p13 = scmp.lt.s32.totalorder %s5410_s24, %s5410_s24 }
  0x4e   : > { %p4949_p7 = scmp.ne.s32.totalorder %s5410_s24, %s4948_s20  ;;  %p4957_p1 = scmp.lt.s32.totalorder %s4948_s20, %s4948_s20 }
  0x50   : > { %p4951_p9 = pnand %p4949_p7, %p5420_p0  ;;  %p4958_p3 = por %p4957_p1, %p4956_p13 }
  0x52   : > { %p4952_p10 = pneg %p4951_p9 }
  0x54   : > { %p4959_p6 = pnand %p4958_p3, %p4952_p10 }
  0x56   : > { %4962 = shalt.err (!%p4959_p6)
}
  0x57   : > { %4691 = dma.hbm_to_vmem [thread:$0]  (!%p5402_p11), %s6466_s1, 64, %s5410_s24, [#allocation7]  }
  0x58   : > { %s5468_s16 = sand.u32 1, %s5275_s14   ;;  %s40_s17 = sadd.s32 1, %s5271_s13 }
  0x59   : > { %s5472_s28 = sand.u32 1, %s5263_s11   ;;  %p41_p2 = scmp.ge.s32.totalorder %s40_s17, 2 }
  0x5a   : > { %s5475_s29 = sshll.u32 %s5472_s28, 4  ;;  %s5478_s19 = sshll.u32 %s5271_s13, 8 }
  0x5b   : > { %s6506_s17 = smov (%p41_p2, %s40_s17), 0  ;;  %s6468_s4 = sld [smem:[#allocation36_spill]] }
  0x5c   : > { %6467 = sst [smem:[#allocation33_spill]] %s6506_s17  ;;  %s94_s20 = ssub.s32 %s5271_s13, %s6506_s17 }
  0x5d   : > { %s371_s9 = scalar_lea.vmem [#allocation10], %s5475_s29  ;;  %p5491_p4 = scmp.eq.s32.totalorder %s94_s20, 0 }
  0x5e   : > { %s378_s12 = sshll.u32 %s371_s9, 4  ;;  %p5502_p7 = pneg %p5406_p12  ;;  %s5495_s12 = int_to_ptr.vmem [resolvable:$true] %s378_s12 }
  0x5f   : > { %s6469_s26 = scalar_select %p5491_p4, 1, 0 }
  0x61   : > { %s5486_s24 = scalar_lea.hbm %s6468_s4, %s5478_s19  ;;  %s4968_s20 = scalar_lea.hbm %s6468_s4, 512 }
  0x62   : > { %s4963_s0 = scalar_lea.hbm %s5486_s24, 256  ;;  %p4969_p13 = scmp.lt.u32.totalorder %s5486_s24, %s6468_s4 }
  0x63   : > { %p4964_p5 = scmp.ne.s32.totalorder %s5486_s24, %s4963_s0  ;;  %p4970_p1 = scmp.lt.u32.totalorder %s4968_s20, %s4963_s0 }
  0x64   : > { %p4972_p6 = scmp.lt.u32.totalorder %s4963_s0, %s5486_s24 }
  0x65   : > { %p4966_p9 = pnand %p5502_p7, %p4964_p5  ;;  %p4971_p3 = por %p4970_p1, %p4969_p13 }
  0x67   : > { %p4967_p10 = pneg %p4966_p9  ;;  %p4973_p2 = por %p4972_p6, %p4971_p3 }
  0x69   : > { %p4974_p8 = pnand %p4973_p2, %p4967_p10 }
  0x6b   : > { %4977 = shalt.err (!%p4974_p8)
}
  0x6c   : > { %s4978_s27 = scalar_lea.vmem %s5495_s12, 256  ;;  %s5281_s25 = smov [#allocation10]  }
  0x6d   : > { %p4979_p5 = scmp.ne.s32.totalorder %s5495_s12, %s4978_s27  ;;  %s4983_s9 = sshll.u32 %s5281_s25, 4  ;;  %s4984_s9 = int_to_ptr.vmem [resolvable:$false] %s4983_s9 }
  0x6e   : > { %s4985_s1 = scalar_lea.vmem %s4984_s9, 512  ;;  %p4986_p0 = scmp.lt.s32.totalorder %s5495_s12, %s4984_s9 }
  0x6f   : > { %p4981_p9 = pnand %p4979_p5, %p5502_p7  ;;  %p4987_p4 = scmp.lt.s32.totalorder %s4985_s1, %s4978_s27 }
  0x71   : > { %p4982_p11 = pneg %p4981_p9  ;;  %p4988_p13 = por %p4987_p4, %p4986_p0 }
  0x73   : > { %p4989_p1 = pnand %p4988_p13, %p4982_p11 }
  0x75   : > { %4992 = shalt.err (!%p4989_p1)
}
  0x76   : > { %s6471_s0 = smov 4   ;;  %s6472_s17 = smov 64  }
  0x77   : > { %s6473_s20 = scalar_lea.sflag [#allocation11], %s5468_s16  ;;  %s6474_s27 = sadd.s32 1, %s5263_s11 }
  0x78   : > { %4701 = dma.hbm_to_vmem [thread:$0]  (!%p5406_p12), %s5486_s24, 256, %s5495_s12, %s6473_s20, %s6472_s17, %s6472_s17, %s6471_s0  }
  0x79   : > { %p6475_p8 = scmp.ne.s32.totalorder %s6469_s26, 0  ;;  %s6476_s6 = sld [smem:[#allocation37_spill]] }
  0x7a   : > { %s413_s14 = scalar_lea.vmem [#allocation13], %s5475_s29  ;;  %s410_s15 = scalar_lea.sflag [#allocation14], %s5468_s16 }
  0x7b   : > { %s5535_s25 = scalar_select %p6475_p8, %s5263_s11, %s6474_s27  }
  0x7c   : > { %s420_s10 = sshll.u32 %s413_s14, 4  ;;  %s5544_s10 = int_to_ptr.vmem [resolvable:$true] %s420_s10 }
  0x7f   : > { %s5541_s4 = scalar_lea.hbm %s6476_s6, %s5478_s19  ;;  %s4998_s12 = scalar_lea.hbm %s6476_s6, 512 }
  0x80   : > { %s4993_s18 = scalar_lea.hbm %s5541_s4, 256  ;;  %p4999_p10 = scmp.lt.u32.totalorder %s5541_s4, %s6476_s6 }
  0x81   : > { %p4994_p11 = scmp.ne.s32.totalorder %s5541_s4, %s4993_s18  ;;  %p5000_p3 = scmp.lt.u32.totalorder %s4998_s12, %s4993_s18 }
  0x82   : > { %p5002_p2 = scmp.lt.u32.totalorder %s4993_s18, %s5541_s4 }
  0x83   : > { %p4996_p0 = pnand %p4994_p11, %p5502_p7  ;;  %p5001_p6 = por %p5000_p3, %p4999_p10 }
  0x85   : > { %p4997_p4 = pneg %p4996_p0  ;;  %p5003_p5 = por %p5002_p2, %p5001_p6 }
  0x87   : > { %p5004_p9 = pnand %p5003_p5, %p4997_p4 }
  0x89   : > { %5007 = shalt.err (!%p5004_p9)
}
  0x8a   : > { %s5008_s14 = scalar_lea.vmem %s5544_s10, 256  ;;  %s5282_s9 = smov [#allocation13]  }
  0x8b   : > { %p5009_p13 = scmp.ne.s32.totalorder %s5544_s10, %s5008_s14  ;;  %s5013_s1 = sshll.u32 %s5282_s9, 4  ;;  %s5014_s1 = int_to_ptr.vmem [resolvable:$false] %s5013_s1 }
  0x8c   : > { %s5015_s26 = scalar_lea.vmem %s5014_s1, 512  ;;  %p5016_p11 = scmp.lt.s32.totalorder %s5544_s10, %s5014_s1 }
  0x8d   : > { %p5011_p1 = pnand %p5009_p13, %p5502_p7  ;;  %p5017_p0 = scmp.lt.s32.totalorder %s5015_s26, %s5008_s14 }
  0x8f   : > { %p5012_p8 = pneg %p5011_p1  ;;  %p5018_p10 = por %p5017_p0, %p5016_p11 }
  0x91   : > { %p5019_p3 = pnand %p5018_p10, %p5012_p8 }
  0x93   : > { %5022 = shalt.err (!%p5019_p3)
}
  0x94   : > { %4707 = dma.hbm_to_vmem [thread:$0]  (!%p5406_p12), %s5541_s4, 256, %s5544_s10, %s410_s15, %s6472_s17, %s6472_s17, %s6471_s0  }
  0x95   : > { %s5283_s18 = smov [#allocation9]   ;;  %s4058_s12 = sshll.u32 %s5472_s28, 3 }
  0x96   : > { %s338_s24 = sshll.u32 %s5283_s18, 4  ;;  %s5023_s14 = scalar_lea.hbm %s6420_s3, 32  ;;  %s339_s24 = int_to_ptr.vmem [resolvable:$true] %s338_s24 }
  0x97   : > { %p5024_p4 = scmp.ne.s32.totalorder %s6420_s3, %s5023_s14  ;;  %p6477_p6 = scmp.ne.s32.totalorder %s6465_s30, 0 }
  0x98   : > { %p5030_p9 = scmp.lt.u32.totalorder %s5023_s14, %s6420_s3 }
  0x99   : > { %p5026_p2 = pnand %p5024_p4, %p6477_p6 }
  0x9b   : > { %p5027_p5 = pneg %p5026_p2 }
  0x9d   : > { %p5032_p13 = pnand %p5030_p9, %p5027_p5 }
  0x9f   : > { %5035 = shalt.err (!%p5032_p13)
}
  0xa0   : > { %s5036_s4 = scalar_lea.vmem %s339_s24, 32  ;;  %p5044_p0 = scmp.lt.s32.totalorder %s339_s24, %s339_s24 }
  0xa1   : > { %p5037_p1 = scmp.ne.s32.totalorder %s339_s24, %s5036_s4  ;;  %p5045_p10 = scmp.lt.s32.totalorder %s5036_s4, %s5036_s4 }
  0xa3   : > { %p5039_p8 = pnand %p5037_p1, %p6477_p6  ;;  %p5046_p3 = por %p5045_p10, %p5044_p0 }
  0xa5   : > { %p5040_p11 = pneg %p5039_p8 }
  0xa7   : > { %p5047_p12 = pnand %p5046_p3, %p5040_p11 }
  0xa9   : > { %5050 = shalt.err (!%p5047_p12)
}
  0xaa   : > { %p6478_p4 = scmp.ne.s32.totalorder %s6462_s21, 0  ;;  %s4059_s6 = sshll.u32 %s5271_s13, 7 }
  0xab   : > { %s5596_s30 = scalar_lea.hbm %s6419_s2, %s4059_s6  ;;  %s353_s14 = scalar_lea.vmem [#allocation8], %s4058_s12 }
  0xac   : > { %4694 = dma.hbm_to_vmem [thread:$0]  (!%p6478_p4), %s6420_s3, 32, %s339_s24, [#allocation7]  }
  0xad   : > { %s360_s9 = sshll.u32 %s353_s14, 4  ;;  %s350_s21 = scalar_lea.sflag [#allocation4], %s5468_s16  ;;  %s361_s9 = int_to_ptr.vmem [resolvable:$true] %s360_s9 }
  0xae   : > { %s5051_s1 = scalar_lea.hbm %s5596_s30, 128  ;;  %s5056_s4 = scalar_lea.hbm %s6419_s2, 256 }
  0xaf   : > { %p5052_p12 = scmp.ne.s32.totalorder %s5596_s30, %s5051_s1  ;;  %p5057_p5 = scmp.lt.u32.totalorder %s5596_s30, %s6419_s2 }
  0xb0   : > { %p5058_p9 = scmp.lt.u32.totalorder %s5056_s4, %s5051_s1  ;;  %p5060_p1 = scmp.lt.u32.totalorder %s5051_s1, %s5596_s30 }
  0xb1   : > { %p5054_p6 = pnand %p5052_p12, %p5502_p7 }
  0xb2   : > { %p5059_p13 = por %p5058_p9, %p5057_p5 }
  0xb3   : > { %p5055_p2 = pneg %p5054_p6 }
  0xb4   : > { %p5061_p8 = por %p5060_p1, %p5059_p13 }
  0xb6   : > { %p5062_p11 = pnand %p5061_p8, %p5055_p2 }
  0xb8   : > { %5065 = shalt.err (!%p5062_p11)
}
  0xb9   : > { %s5066_s12 = scalar_lea.vmem %s361_s9, 128  ;;  %s5284_s6 = smov [#allocation8]  }
  0xba   : > { %p5067_p0 = scmp.ne.s32.totalorder %s361_s9, %s5066_s12  ;;  %s5071_s20 = sshll.u32 %s5284_s6, 4  ;;  %s5072_s20 = int_to_ptr.vmem [resolvable:$false] %s5071_s20 }
  0xbb   : > { %s5073_s27 = scalar_lea.vmem %s5072_s20, 256  ;;  %p5074_p4 = scmp.lt.s32.totalorder %s361_s9, %s5072_s20 }
  0xbc   : > { %p5069_p10 = pnand %p5067_p0, %p5502_p7  ;;  %p5075_p12 = scmp.lt.s32.totalorder %s5073_s27, %s5066_s12 }
  0xbe   : > { %p5070_p3 = pneg %p5069_p10  ;;  %p5076_p6 = por %p5075_p12, %p5074_p4 }
  0xc0   : > { %p5077_p5 = pnand %p5076_p6, %p5070_p3 }
  0xc2   : > { %5080 = shalt.err (!%p5077_p5)
}
  0xc3   : > { %p6479_p9 = scmp.ne.s32.totalorder %s6463_s22, 0  ;;  %s5620_s24 = scalar_lea.hbm %s6422_s5, %s5478_s19 }
  0xc4   : > { %s392_s26 = scalar_lea.vmem [#allocation12], %s5475_s29  ;;  %s5081_s10 = scalar_lea.hbm %s5620_s24, 256 }
  0xc5   : > { %4698 = dma.hbm_to_vmem [thread:$0]  (!%p6479_p9), %s5596_s30, 128, %s361_s9, %s350_s21  }
  0xc6   : > { %s399_s4 = sshll.u32 %s392_s26, 4  ;;  %p5082_p2 = scmp.ne.s32.totalorder %s5620_s24, %s5081_s10  ;;  %s5623_s4 = int_to_ptr.vmem [resolvable:$true] %s399_s4 }
  0xc7   : > { %s5086_s9 = scalar_lea.hbm %s6422_s5, 512  ;;  %p5087_p8 = scmp.lt.u32.totalorder %s5620_s24, %s6422_s5 }
  0xc8   : > { %p5084_p13 = pnand %p5082_p2, %p5502_p7  ;;  %p5088_p11 = scmp.lt.u32.totalorder %s5086_s9, %s5081_s10 }
  0xc9   : > { %p5090_p10 = scmp.lt.u32.totalorder %s5081_s10, %s5620_s24 }
  0xca   : > { %p5085_p1 = pneg %p5084_p13  ;;  %p5089_p0 = por %p5088_p11, %p5087_p8 }
  0xcc   : > { %p5091_p3 = por %p5090_p10, %p5089_p0 }
  0xce   : > { %p5092_p4 = pnand %p5091_p3, %p5085_p1 }
  0xd0   : > { %5095 = shalt.err (!%p5092_p4)
}
  0xd1   : > { %s5096_s6 = scalar_lea.vmem %s5623_s4, 256  ;;  %s5285_s20 = smov [#allocation12]  }
  0xd2   : > { %p5097_p12 = scmp.ne.s32.totalorder %s5623_s4, %s5096_s6  ;;  %s5101_s27 = sshll.u32 %s5285_s20, 4  ;;  %s5102_s27 = int_to_ptr.vmem [resolvable:$false] %s5101_s27 }
  0xd3   : > { %s5103_s14 = scalar_lea.vmem %s5102_s27, 512  ;;  %p5104_p2 = scmp.lt.s32.totalorder %s5623_s4, %s5102_s27 }
  0xd4   : > { %p5099_p6 = pnand %p5097_p12, %p5502_p7  ;;  %p5105_p13 = scmp.lt.s32.totalorder %s5103_s14, %s5096_s6 }
  0xd6   : > { %p5100_p5 = pneg %p5099_p6  ;;  %p5106_p8 = por %p5105_p13, %p5104_p2 }
  0xd8   : > { %p5107_p11 = pnand %p5106_p8, %p5100_p5 }
  0xda   : > { %5110 = shalt.err (!%p5107_p11)
}
  0xdb   : > { %s6480_s1 = scalar_lea.sflag [#allocation11], %s5468_s16  ;;  %s5655_s18 = scalar_lea.hbm %s6424_s7, %s5478_s19 }
  0xdc   : > { %4704 = dma.hbm_to_vmem [thread:$0]  (!%p6479_p9), %s5620_s24, 256, %s5623_s4, %s6480_s1, %s6472_s17, %s6472_s17, %s6471_s0  }
  0xdd   : > { %s434_s30 = scalar_lea.vmem [#allocation15], %s5475_s29  ;;  %s5111_s21 = scalar_lea.hbm %s5655_s18, 256 }
  0xde   : > { %s441_s9 = sshll.u32 %s434_s30, 4  ;;  %p5112_p1 = scmp.ne.s32.totalorder %s5655_s18, %s5111_s21  ;;  %s5658_s9 = int_to_ptr.vmem [resolvable:$true] %s441_s9 }
  0xdf   : > { %s5116_s4 = scalar_lea.hbm %s6424_s7, 512  ;;  %p5117_p3 = scmp.lt.u32.totalorder %s5655_s18, %s6424_s7 }
  0xe0   : > { %p5114_p0 = pnand %p5112_p1, %p5502_p7  ;;  %p5118_p4 = scmp.lt.u32.totalorder %s5116_s4, %s5111_s21 }
  0xe1   : > { %p5120_p6 = scmp.lt.u32.totalorder %s5111_s21, %s5655_s18 }
  0xe2   : > { %p5115_p10 = pneg %p5114_p0  ;;  %p5119_p12 = por %p5118_p4, %p5117_p3 }
  0xe4   : > { %p5121_p5 = por %p5120_p6, %p5119_p12 }
  0xe6   : > { %p5122_p2 = pnand %p5121_p5, %p5115_p10 }
  0xe8   : > { %5125 = shalt.err (!%p5122_p2)
}
  0xe9   : > { %s5126_s29 = scalar_lea.vmem %s5658_s9, 256  ;;  %s5286_s20 = smov [#allocation15]  }
  0xea   : > { %p5127_p13 = scmp.ne.s32.totalorder %s5658_s9, %s5126_s29  ;;  %s5131_s27 = sshll.u32 %s5286_s20, 4  ;;  %s5132_s27 = int_to_ptr.vmem [resolvable:$false] %s5131_s27 }
  0xeb   : > { %s5133_s14 = scalar_lea.vmem %s5132_s27, 512  ;;  %p5134_p1 = scmp.lt.s32.totalorder %s5658_s9, %s5132_s27 }
  0xec   : > { %p5129_p8 = pnand %p5127_p13, %p5502_p7  ;;  %p5135_p0 = scmp.lt.s32.totalorder %s5133_s14, %s5126_s29 }
  0xee   : > { %p5130_p11 = pneg %p5129_p8  ;;  %p5136_p3 = por %p5135_p0, %p5134_p1 }
  0xf0   : > { %p5137_p4 = pnand %p5136_p3, %p5130_p11 }
  0xf2   : > { %5140 = shalt.err (!%p5137_p4)
}
  0xf3   : > { %4710 = dma.hbm_to_vmem [thread:$0]  (!%p6479_p9), %s5655_s18, 256, %s5658_s9, %s410_s15, %s6472_s17, %s6472_s17, %s6471_s0  }
  0xf4   : > { %s4072_s1 = sshll.u32 %s5472_s28, 5  ;;  %s4165_s26 = sshll.u32 %s5271_s13, 9 }
  0xf5   : > { %s5691_s21 = scalar_lea.hbm %s6425_s8, %s4165_s26  ;;  %s455_s12 = scalar_lea.vmem [#allocation16], %s4072_s1 }
  0xf6   : > { %s462_s16 = sshll.u32 %s455_s12, 4  ;;  %s452_s24 = scalar_lea.sflag [#allocation17], %s5472_s28  ;;  %s5693_s16 = int_to_ptr.vmem [resolvable:$true] %s462_s16 }
  0xf7   : > { %s5141_s4 = scalar_lea.hbm %s5691_s21, 512  ;;  %s5146_s9 = scalar_lea.hbm %s6425_s8, 1024 }
  0xf8   : > { %p5142_p10 = scmp.ne.s32.totalorder %s5691_s21, %s5141_s4  ;;  %p5147_p5 = scmp.lt.u32.totalorder %s5691_s21, %s6425_s8 }
  0xf9   : > { %p5148_p2 = scmp.lt.u32.totalorder %s5146_s9, %s5141_s4  ;;  %p5150_p8 = scmp.lt.u32.totalorder %s5141_s4, %s5691_s21 }
  0xfa   : > { %p5144_p12 = pnand %p5142_p10, %p5502_p7 }
  0xfb   : > { %p5149_p13 = por %p5148_p2, %p5147_p5 }
  0xfc   : > { %p5145_p6 = pneg %p5144_p12 }
  0xfd   : > { %p5151_p11 = por %p5150_p8, %p5149_p13 }
  0xff   : > { %p5152_p1 = pnand %p5151_p11, %p5145_p6 }
 0x101   : > { %5155 = shalt.err (!%p5152_p1)
}
 0x102   : > { %s5156_s29 = scalar_lea.vmem %s5693_s16, 512  ;;  %s5287_s20 = smov [#allocation16]  }
 0x103   : > { %p5157_p0 = scmp.ne.s32.totalorder %s5693_s16, %s5156_s29  ;;  %s5161_s27 = sshll.u32 %s5287_s20, 4  ;;  %s5162_s27 = int_to_ptr.vmem [resolvable:$false] %s5161_s27 }
 0x104   : > { %s5163_s14 = scalar_lea.vmem %s5162_s27, 1024  ;;  %p5164_p10 = scmp.lt.s32.totalorder %s5693_s16, %s5162_s27 }
 0x105   : > { %p5159_p3 = pnand %p5157_p0, %p5502_p7  ;;  %p5165_p12 = scmp.lt.s32.totalorder %s5163_s14, %s5156_s29 }
 0x107   : > { %p5160_p4 = pneg %p5159_p3  ;;  %p5166_p5 = por %p5165_p12, %p5164_p10 }
 0x109   : > { %p5167_p2 = pnand %p5166_p5, %p5160_p4 }
 0x10b   : > { %5170 = shalt.err (!%p5167_p2)
}
 0x10c   : > { %4713 = dma.hbm_to_vmem [thread:$0]  (!%p6479_p9), %s5691_s21, 512, %s5693_s16, %s452_s24, %s6472_s17, %s6472_s17, %s6471_s0  }
 0x10d   : > { %s6481_s23 = sld [smem:[#allocation32_spill]] }
 0x113   : > { %p6482_p7 = scmp.ne.s32.totalorder %s6481_s23, 0 }
 0x114   : > { %s6483_s1 = sld [smem:[#allocation30_spill]] (!%p6482_p7) }
 0x115   : > { %474 = sbr.rel (%p6482_p7) target bundleno = 8443 (0x20fb), region = 56 }
 0x11a   : > { %p6484_p6 = scmp.eq.s32.totalorder (!%p6482_p7), %s6483_s1, 0 }
 0x11c   : > { %5222 = dma.done.wait (%p6484_p6), [#allocation4], 256   ;;  %p6485_p13 = pmov %p6484_p6 }
 0x11d   : > { %p6486_p8 = pmov %p6484_p6 }
 0x11e   : > { %5224 = vsyncadd (%p6485_p13), [#allocation4], 4294967040 }
 0x11f   : > { %5226 = dma.done.wait (%p6486_p8), [#allocation7], 64   ;;  %p6487_p11 = pmov %p6484_p6 }
 0x120   : > { %s6488_s22 = sld [smem:[#allocation27_spill]]  ;;  %s6489_s28 = sld [smem:[#allocation31_spill]] }
 0x121   : > { %5228 = vsyncadd (%p6487_p11), [#allocation7], 4294967232  ;;  %s484_s26 = sand.u32 1, %s6483_s1  }
 0x122   : > { %s485_s10 = scalar_lea.sflag [#allocation4], %s484_s26 }
 0x126   : > { %s486_s0 = sand.u32 1, %s6488_s22   ;;  %p6490_p9 = scmp.ne.s32.totalorder %s6489_s28, 0 }
 0x127   : > { %s4078_s17 = sshll.u32 %s486_s0, 3 }
 0x128   : > { %s5734_s30 = scalar_lea.vmem [#allocation8], %s4078_s17 }
 0x129   : > { %5230 = dma.done.wait (%p6490_p9), %s485_s10, 128  }
 0x12a   : > { %5232 = vsyncadd (%p6490_p9), %s485_s10, 4294967168  ;;  %p6491_p1 = pmov %p6484_p6 }
 0x12c   : > { %5234 = dma.done.wait (%p6491_p1), [#allocation7], 32   ;;  %p6492_p0 = pmov %p6491_p1 }
 0x12d   : > { %s5744_s21 = sshll.u32 %s486_s0, 4  ;;  %s498_s12 = scalar_lea.sflag [#allocation11], %s484_s26 }
 0x12e   : > { %5236 = vsyncadd (%p6492_p0), [#allocation7], 4294967264  ;;  %s501_s16 = scalar_lea.vmem [#allocation10], %s5744_s21 }
 0x12f   : > { %5238 = dma.done.wait (%p6490_p9), %s498_s12, 512  }
 0x130   : > { %5240 = vsyncadd (%p6490_p9), %s498_s12, 4294966784  ;;  %s510_s24 = scalar_lea.vmem [#allocation12], %s5744_s21  ;;  %s516_s4 = scalar_lea.sflag [#allocation14], %s484_s26 }
 0x131   : > { %s5753_s15 = scalar_lea.vmem [#allocation13], %s5744_s21 }
 0x132   : > { %5242 = dma.done.wait (%p6490_p9), %s516_s4, 512  }
 0x133   : > { %5244 = vsyncadd (%p6490_p9), %s516_s4, 4294966784  ;;  %s4084_s18 = sshll.u32 %s486_s0, 5  ;;  %s528_s9 = scalar_lea.vmem [#allocation15], %s5744_s21 }
 0x134   : > { %s534_s6 = scalar_lea.sflag [#allocation17], %s486_s0  ;;  %s5760_s19 = scalar_lea.vmem [#allocation16], %s4084_s18 }
 0x135   : > { %5246 = dma.done.wait (%p6490_p9), %s534_s6, 512  }
 0x136   : > { %5248 = vsyncadd (%p6490_p9), %s534_s6, 4294966784  ;;  %s6493_s29 = sld [smem:[#allocation28_spill]] }
 0x13c   : > { %p4085_p3 = scmp.ne.s32.totalorder %s6493_s29, 0 }
 0x13d   : > { %v599_v0 = vld [vmem:[#allocation6] sm:$0xf] (!%p4085_p3)  ;;  %vm603_vm0 = vcmask (!%p4085_p3), 1043456   ;;  %vm605_vm1 = vcmask (!%p4085_p3), 261120  }
 0x13e   : > { %598 = sbr.rel (%p4085_p3) target bundleno = 325 (0x145), region = 96  ;;  %v601_v1 = vrot.slane (!%p4085_p3), %v599_v0, 4 }
 0x140   : > { %v604_v2 = vsel (!%p4085_p3), %vm603_vm0, %v599_v0, %v601_v1 }
 0x141   : > { %606 = vst.msk [vmem:[#allocation2] sm:$0xff] (!%p4085_p3), %vm605_vm1, %v604_v2  ;;  %607 = vst.msk [vmem:[#allocation2 + $0x8] sm:$0xff] (!%p4085_p3), %vm605_vm1, %v604_v2 }
 0x142   : > { %608 = vst.msk [vmem:[#allocation2 + $0x10] sm:$0xff] (!%p4085_p3), %vm605_vm1, %v604_v2  ;;  %609 = vst.msk [vmem:[#allocation2 + $0x18] sm:$0xff] (!%p4085_p3), %vm605_vm1, %v604_v2 }
 0x145 PF: > { %vm623_vm2 = vcmask 261120   ;;  %v4167_v9 = vld [vmem:[#allocation3] sm:$0xff]   ;;  %v4174_v14 = vld [vmem:[#allocation3 + $0x8] sm:$0xff]   ;;  %vm5289_vm3 = vmmov 0   ;;  %s5290_s20 = smov 112   ;;  %vm963_vm4 = vcmask 1043456  }
 0x146   : > { %v4168_v12 = vunpack.c.l.bf16 %v4167_v9  ;;  %v4169_v13 = vunpack.c.h.bf16 %v4167_v9  ;;  %v4172_v17 = vunpack.c.l.bf16 %v4174_v14  ;;  %v4173_v18 = vunpack.c.h.bf16 %v4174_v14  ;;  %v4784_v61 = vld [vmem:[%s501_s16] sm:$0xff]   ;;  %v4786_v63 = vld [vmem:[%s501_s16 + $0x8] sm:$0xff]   ;;  %s5291_s27 = smov 96   ;;  %s5292_s14 = smov 80  }
 0x147   : > { %v5819_v62 = vld [vmem:[%s510_s24] sm:$0xff]   ;;  %4293 = vmatprep.subr.bf16.mxu1 %v4784_v61  ;;  %v5827_v0 = vld [vmem:[%s510_s24 + $0x8] sm:$0xff]   ;;  %vm967_vm5 = vcmask 130048   ;;  %vm1014_vm6 = vcmask 60416   ;;  %vm1030_vm7 = vcmask 64512   ;;  %vm3699_vm8 = vcmask 523264  }
 0x148   : > { %v618_v3 = vld [vmem:[#allocation2] sm:$0xff]  ;;  %v619_v5 = vld [vmem:[#allocation2 + $0x8] sm:$0xff]  ;;  %v624_v15 = vsel %vm623_vm2, %v4168_v12, 0.0  ;;  %v627_v16 = vsel %vm623_vm2, %v4169_v13, 0.0  ;;  %v630_v19 = vsel %vm623_vm2, %v4172_v17, 0.0  ;;  %v633_v20 = vsel %vm623_vm2, %v4173_v18, 0.0  ;;  %4309 = vmatprep.subr.bf16.mxu0 %v5819_v62  ;;  %4294 = vmatpush3.bf16.msra.mxu1 %v4784_v61 }
 0x149   : > { %v620_v4 = vld [vmem:[#allocation2 + $0x10] sm:$0xff]  ;;  %v693_v6 = vsel %vm623_vm2, %v618_v3, 0.0  ;;  %v621_v8 = vld [vmem:[#allocation2 + $0x18] sm:$0xff]  ;;  %v696_v10 = vsel %vm623_vm2, %v619_v5, 0.0  ;;  %4310 = vmatpush3.bf16.msra.mxu0 %v5819_v62  ;;  %4295 = vmatprep.subr.bf16.mxu1 %v4786_v63  ;;  %s6494_s23 = sld [smem:[#allocation28_spill]] }
 0x14a   : > { %v699_v7 = vsel %vm623_vm2, %v620_v4, 0.0  ;;  %694 = vadd.xlane.f32.xlu0 %v693_v6  ;;  %v702_v11 = vsel %vm623_vm2, %v621_v8, 0.0  ;;  %4311 = vmatprep.subr.bf16.mxu0 %v5827_v0  ;;  %v677_v6 = vlaneseq }
 0x14b   : > { %700 = vadd.xlane.f32.xlu1 %v699_v7 }
 0x14c   : > { %4296 = vmatpush3.bf16.msra.mxu1 %v4786_v63 }
 0x14d   : > { %4312 = vmatpush3.bf16.msra.mxu0 %v5827_v0  ;;  %4301 = vmatprep.subr.bf16.mxu1 %v5819_v62 }
 0x14e   : > { %697 = vadd.xlane.f32.xlu0 %v696_v10 }
 0x14f   : > { %703 = vadd.xlane.f32.xlu1 %v702_v11  ;;  %p4156_p4 = scmp.ne.s32.totalorder %s6494_s23, 1 }
 0x152   : > { %625 = vadd.xlane.f32.xlu0 %v624_v15 }
 0x153   : > { %628 = vadd.xlane.f32.xlu1 %v627_v16 }
 0x156   : > { %631 = vadd.xlane.f32.xlu0 %v630_v19 }
 0x157   : > { %634 = vadd.xlane.f32.xlu1 %v633_v20 }
 0x1d7   : > { %v695_v21 = vpop.xlane.xlu0 %694 }
 0x1d8   : > { %v701_v22 = vpop.xlane.xlu1 %700  ;;  %v705_v23 = vmul.f32 0.03125, %v695_v21 }
 0x1d9   : > { %v707_v24 = vmul.f32 0.03125, %v701_v22  ;;  %v622_v22 = vld [vmem:[%s5734_s30] sm:$0x3f] }
 0x1da   : > { %v5775_v25 = vsub.f32 %v618_v3, %v705_v23 }
 0x1db   : > { %v5777_v26 = vsub.f32 %v620_v4, %v707_v24  ;;  %v698_v27 = vpop.xlane.xlu0 %697 }
 0x1dc   : > { %v704_v28 = vpop.xlane.xlu1 %703  ;;  %v706_v29 = vmul.f32 0.03125, %v698_v27  ;;  %v713_v31 = vmul.f32 %v5775_v25, %v5775_v25 }
 0x1dd   : > { %v708_v30 = vmul.f32 0.03125, %v704_v28  ;;  %v715_v32 = vmul.f32 %v5777_v26, %v5777_v26 }
 0x1de   : > { %v5783_v33 = vsub.f32 %v619_v5, %v706_v29  ;;  %v717_v35 = vsel %vm623_vm2, %v713_v31, 0.0 }
 0x1df   : > { %v5785_v34 = vsub.f32 %v621_v8, %v708_v30  ;;  %718 = vadd.xlane.f32.xlu0 %v717_v35  ;;  %v626_v36 = vpop.xlane.xlu0 %625  ;;  %v723_v38 = vsel %vm623_vm2, %v715_v32, 0.0 }
 0x1e0   : > { %v629_v37 = vpop.xlane.xlu1 %628  ;;  %v637_v39 = vmul.f32 0.03125, %v626_v36  ;;  %v714_v40 = vmul.f32 %v5783_v33, %v5783_v33 }
 0x1e1   : > { %v638_v41 = vmul.f32 0.03125, %v629_v37  ;;  %v716_v42 = vmul.f32 %v5785_v34, %v5785_v34 }
 0x1e2   : > { %v5793_v43 = vsub.f32 %v4168_v12, %v637_v39  ;;  %v720_v44 = vsel %vm623_vm2, %v714_v40, 0.0 }
 0x1e3   : > { %v5796_v45 = vsub.f32 %v4169_v13, %v638_v41  ;;  %721 = vadd.xlane.f32.xlu1 %v720_v44  ;;  %724 = vadd.xlane.f32.xlu0 %v723_v38  ;;  %v632_v46 = vpop.xlane.xlu0 %631  ;;  %v726_v47 = vsel %vm623_vm2, %v716_v42, 0.0  ;;  %v5832_v13 = vshrl.u32 %v677_v6, 7 }
 0x1e4   : > { %v635_v48 = vpop.xlane.xlu1 %634  ;;  %v639_v49 = vmul.f32 0.03125, %v632_v46  ;;  %v645_v51 = vmul.f32 %v5793_v43, %v5793_v43 }
 0x1e5   : > { %v640_v50 = vmul.f32 0.03125, %v635_v48  ;;  %v646_v52 = vmul.f32 %v5796_v45, %v5796_v45  ;;  %v747_v20 = vsub.s32 2, %v5832_v13  ;;  %v755_v32 = vsub.s32 3, %v5832_v13 }
 0x1e6   : > { %v5803_v53 = vsub.f32 %v4172_v17, %v639_v49  ;;  %v649_v55 = vsel %vm623_vm2, %v645_v51, 0.0  ;;  %v679_v37 = vsub.s32 0, %v5832_v13  ;;  %v687_v48 = vsub.s32 1, %v5832_v13 }
 0x1e7   : > { %v5805_v54 = vsub.f32 %v4173_v18, %v640_v50  ;;  %727 = vadd.xlane.f32.xlu1 %v726_v47  ;;  %650 = vadd.xlane.f32.xlu0 %v649_v55  ;;  %v652_v56 = vsel %vm623_vm2, %v646_v52, 0.0  ;;  %v748_v31 = vrot.slane %v622_v22, %v747_v20  ;;  %v756_v42 = vrot.slane %v622_v22, %v755_v32 }
 0x1e8   : > { %v647_v57 = vmul.f32 %v5803_v53, %v5803_v53  ;;  %v680_v47 = vrot.slane %v622_v22, %v679_v37 }
 0x1e9   : > { %v648_v58 = vmul.f32 %v5805_v54, %v5805_v54 }
 0x1ea   : > { %v655_v59 = vsel %vm623_vm2, %v647_v57, 0.0 }
 0x1eb   : > { %653 = vadd.xlane.f32.xlu1 %v652_v56  ;;  %656 = vadd.xlane.f32.xlu0 %v655_v59  ;;  %v658_v60 = vsel %vm623_vm2, %v648_v58, 0.0  ;;  %v688_v59 = vrot.slane %v622_v22, %v687_v48 }
 0x1ef   : > { %659 = vadd.xlane.f32.xlu1 %v658_v60 }
 0x26c   : > { %v719_v1 = vpop.xlane.xlu0 %718 }
 0x26d   : > { %v729_v2 = vmul.f32 0.03125, %v719_v1 }
 0x26f   : > { %v733_v3 = vadd.f32 1e-05, %v729_v2 }
 0x270   : > { %v722_v4 = vpop.xlane.xlu1 %721  ;;  %v725_v5 = vpop.xlane.xlu0 %724 }
 0x271   : > { %4796 = vrsqrt.f32 %v733_v3  ;;  %v730_v7 = vmul.f32 0.03125, %v722_v4  ;;  %v731_v8 = vmul.f32 0.03125, %v725_v5 }
 0x273   : > { %v734_v9 = vadd.f32 1e-05, %v730_v7  ;;  %v735_v10 = vadd.f32 1e-05, %v731_v8 }
 0x274   : > { %v728_v11 = vpop.xlane.xlu1 %727  ;;  %v651_v12 = vpop.xlane.xlu0 %650 }
 0x275   : > { %4798 = vrsqrt.f32 %v734_v9  ;;  %v732_v14 = vmul.f32 0.03125, %v728_v11  ;;  %v661_v15 = vmul.f32 0.03125, %v651_v12 }
 0x276   : > { %4800 = vrsqrt.f32 %v735_v10 }
 0x277   : > { %v736_v16 = vadd.f32 1e-05, %v732_v14  ;;  %v665_v17 = vadd.f32 1e-05, %v661_v15 }
 0x278   : > { %v654_v18 = vpop.xlane.xlu1 %653  ;;  %v657_v19 = vpop.xlane.xlu0 %656 }
 0x279   : > { %4802 = vrsqrt.f32 %v736_v16  ;;  %v662_v21 = vmul.f32 0.03125, %v654_v18  ;;  %v663_v23 = vmul.f32 0.03125, %v657_v19 }
 0x27a   : > { %4804 = vrsqrt.f32 %v665_v17 }
 0x27b   : > { %v4797_v24 = vpop.eup %4796  ;;  %v666_v27 = vadd.f32 1e-05, %v662_v21  ;;  %v667_v28 = vadd.f32 1e-05, %v663_v23 }
 0x27c   : > { %v660_v29 = vpop.xlane.xlu1 %659  ;;  %v741_v30 = vmul.f32 %v4797_v24, %v5775_v25 }
 0x27d   : > { %4806 = vrsqrt.f32 %v666_v27  ;;  %v664_v35 = vmul.f32 0.03125, %v660_v29 }
 0x27e   : > { %4808 = vrsqrt.f32 %v667_v28  ;;  %v749_v41 = vmul.f32 %v748_v31, %v741_v30 }
 0x27f   : > { %v4799_v36 = vpop.eup %4798  ;;  %v668_v38 = vadd.f32 1e-05, %v664_v35 }
 0x280   : > { %v4801_v39 = vpop.eup %4800  ;;  %v742_v40 = vmul.f32 %v4799_v36, %v5783_v33  ;;  %v757_v51 = vadd.f32 %v756_v42, %v749_v41 }
 0x281   : > { %v743_v44 = vmul.f32 %v4801_v39, %v5777_v26  ;;  %4810 = vrsqrt.f32 %v668_v38 }
 0x282   : > { %v750_v46 = vmul.f32 %v748_v31, %v742_v40 }
 0x283   : > { %v4803_v25 = vpop.eup %4802  ;;  %v751_v55 = vmul.f32 %v748_v31, %v743_v44 }
 0x284   : > { %v4805_v49 = vpop.eup %4804  ;;  %v744_v50 = vmul.f32 %v4803_v25, %v5785_v34  ;;  %v758_v52 = vadd.f32 %v756_v42, %v750_v46 }
 0x285   : > { %v673_v33 = vmul.f32 %v4805_v49, %v5793_v43  ;;  %v759_v34 = vadd.f32 %v756_v42, %v751_v55 }
 0x286   : > { %v773_v56 = vpack.c.bf16 %v758_v52, %v757_v51  ;;  %v752_v57 = vmul.f32 %v748_v31, %v744_v50 }
 0x287   : > { %v4807_v58 = vpop.eup %4806  ;;  %v681_v26 = vmul.f32 %v680_v47, %v673_v33 }
 0x288   : > { %v4809_v60 = vpop.eup %4808  ;;  %v674_v61 = vmul.f32 %v4807_v58, %v5796_v45  ;;  %4297 = vmatprep.mubr.msk.bf16.mxu1 %vm623_vm2, %v773_v56  ;;  %4313 = vmatprep.mubr.msk.bf16.mxu0 %vm623_vm2, %v773_v56  ;;  %v760_v63 = vadd.f32 %v756_v42, %v752_v57 }
 0x289   : > { %v675_v1 = vmul.f32 %v4809_v60, %v5803_v53  ;;  %v689_v4 = vadd.f32 %v688_v59, %v681_v26 }
 0x28a   : > { %v774_v2 = vpack.c.bf16 %v760_v63, %v759_v34  ;;  %v682_v43 = vmul.f32 %v680_v47, %v674_v61 }
 0x28b   : > { %v4811_v3 = vpop.eup %4810  ;;  %v683_v5 = vmul.f32 %v680_v47, %v675_v1 }
 0x28c   : > { %v676_v6 = vmul.f32 %v4811_v3, %v5805_v54  ;;  %4298 = vmatmul.mubr.msk.bf16.vlgmr.msra.gmra.mrb[0].mxu1 %vm623_vm2, %v774_v2  ;;  %4314 = vmatmul.mubr.msk.bf16.vlgmr.msra.gmra.mrb[0].mxu0 %vm623_vm2, %v774_v2  ;;  %v690_v45 = vadd.f32 %v688_v59, %v682_v43  ;;  %v5288_v54 = vmov 0.0  }
 0x28d   : > { %4302 = vmatpush3.bf16.msra.mxu1 %v5819_v62  ;;  %v691_v53 = vadd.f32 %v688_v59, %v683_v5  ;;  %4323 = vmatprep.subr.bf16.mxu0 %v5288_v54 }
 0x28e   : > { %v684_v7 = vmul.f32 %v680_v47, %v676_v6  ;;  %4303 = vmatprep.subr.bf16.mxu1 %v5827_v0  ;;  %v842_v8 = vpack.c.bf16 %v690_v45, %v689_v4  ;;  %4325 = vmatprep.mubr.msk.bf16.mxu0 %vm5289_vm3, %v5288_v54 }
 0x290   : > { %4305 = vmatprep.mubr.msk.bf16.mxu1 %vm623_vm2, %v842_v8  ;;  %v692_v9 = vadd.f32 %v688_v59, %v684_v7 }
 0x291   : > { %4304 = vmatpush3.bf16.msra.mxu1 %v5827_v0 }
 0x292   : > { %v843_v10 = vpack.c.bf16 %v692_v9, %v691_v53  ;;  %4317 = vmatprep.subr.bf16.mxu1 %v5288_v54 }
 0x294   : > { %4306 = vmatmul.mubr.msk.bf16.vlgmr.msra.gmra.mrb[4].mxu1 %vm623_vm2, %v843_v10 }
 0x295   : > { %4319 = vmatprep.mubr.msk.bf16.mxu1 %vm5289_vm3, %v5288_v54 }
 0x35f   : > { %v5866_v62 = vpop.f32.mrb[0].mxu1  ;;  %v4315_v11 = vpop.f32.mrb[0].mxu0 }
 0x360   : > { %v827_v12 = vpop.f32.mrb[1].mxu1  ;;  %v945_v0 = vpop.f32.mrb[1].mxu0  ;;  %v2223_v19 = vrot.slane %v4315_v11, 4 }
 0x361   : > { %v5868_v14 = vpack.c.bf16 %v827_v12, %v827_v12  ;;  %v5870_v15 = vpop.f32.mrb[2].mxu1  ;;  %v4316_v16 = vpop.f32.mrb[2].mxu0  ;;  %v961_v20 = vrot.slane %v945_v0, 4 }
 0x362   : > { %v5872_v17 = vpop.f32.mrb[3].mxu1  ;;  %v948_v18 = vpop.f32.mrb[3].mxu0  ;;  %v2846_v22 = vrot.slane %v4316_v16, 4 }
 0x363   : > { %1079 = vrot.lane.b32.xlu1 %v5868_v14, %s5290_s20  ;;  %v1600_v28 = vrot.slane %v948_v18, 4  ;;  %v1293_v7 = vrot.slane %v5868_v14, 2 }
 0x367   : > { %v4307_v21 = vpop.f32.mrb[4].mxu1 }
 0x368   : > { %v5877_v23 = vsel %vm963_vm4, %v4307_v21, %v2223_v19  ;;  %v2535_v24 = vrot.slane %v4307_v21, 4  ;;  %v896_v27 = vpop.f32.mrb[5].mxu1 }
 0x369   : > { %v964_v29 = vsel %vm963_vm4, %v896_v27, %v961_v20  ;;  %v1289_v30 = vrot.slane %v896_v27, 4  ;;  %v4308_v31 = vpop.f32.mrb[6].mxu1 }
 0x36a   : > { %v5881_v32 = vsel %vm963_vm4, %v2535_v24, %v4315_v11  ;;  %v966_v35 = vpack.c.bf16 %v964_v29, %v964_v29  ;;  %v5884_v36 = vsel %vm963_vm4, %v4308_v31, %v2846_v22  ;;  %v3158_v38 = vrot.slane %v4308_v31, 4  ;;  %v899_v39 = vpop.f32.mrb[7].mxu1  ;;  %v5937_v22 = vld [vmem:[%s5753_s15 + $0x8] sm:$0xff]   ;;  %v5942_v31 = vld [vmem:[%s5753_s15] sm:$0xff]  }
 0x36b   : > { %v1291_v40 = vsel %vm963_vm4, %v1289_v30, %v945_v0  ;;  %v5888_v41 = vsel %vm963_vm4, %v899_v39, %v1600_v28  ;;  %v1912_v44 = vrot.slane %v899_v39, 4 }
 0x36c   : > { %v5891_v42 = vsel %vm963_vm4, %v3158_v38, %v4316_v16  ;;  %1081 = vrot.lane.b32.xlu0 %v966_v35, %s5290_s20  ;;  %v972_v46 = vsel %vm967_vm5, %v966_v35, 0  ;;  %v5914_v45 = vpack.c.bf16 %v1291_v40, %v1291_v40 }
 0x36d   : > { %v5896_v25 = vsel %vm963_vm4, %v1912_v44, %v948_v18  ;;  %4318 = vmatpush3.bf16.xpose.msra.mxu1 %v972_v46 }
 0x36e   : > { %4329 = vmatprep.subr.bf16.mxu1 %v5288_v54  ;;  %v1298_v21 = vsel %vm967_vm5, %v5914_v45, 0 }
 0x374   : > { %4320 = vmatmul.mubr.msk.bf16.vlgmr.msra.gmra.mrb[8].mxu1 %vm967_vm5, %v5868_v14 }
 0x375   : > { %4331 = vmatprep.mubr.msk.bf16.mxu1 %vm5289_vm3, %v5288_v54 }
 0x3d5   : > { %v1080_v50 = vpop.permute.xlu1 %1079 }
 0x3de   : > { %v1082_v47 = vpop.permute.xlu0 %1081 }
 0x3df   : > { %v1087_v49 = vsel %vm967_vm5, %v1082_v47, 0 }
 0x3e0   : > { %4330 = vmatpush3.bf16.xpose.msra.mxu1 %v1087_v49 }
 0x3e1   : > { %4341 = vmatprep.subr.bf16.mxu1 %v5288_v54 }
 0x3e7   : > { %4332 = vmatmul.mubr.msk.bf16.vlgmr.msra.gmra.mrb[12].mxu1 %vm967_vm5, %v1080_v50 }
 0x3e8   : > { %4343 = vmatprep.mubr.msk.bf16.mxu1 %vm5289_vm3, %v5288_v54  ;;  %4342 = vmatpush3.bf16.msra.mxu1 %v5937_v22 }
 0x3e9   : > { %4347 = vmatprep.subr.bf16.mxu1 %v5288_v54 }
 0x447   : > { %v1008_v51 = vpop.f32.mrb[8].mxu1 }
 0x448   : > { %v4321_v52 = vpop.f32.mrb[9].mxu1  ;;  %v1015_v55 = vsel %vm1014_vm6, %v1008_v51, -inf }
 0x449   : > { %1016 = vmax.xlane.f32.xlu1 %v1015_v55  ;;  %v1011_v33 = vpop.f32.mrb[10].mxu1 }
 0x44a   : > { %v4322_v56 = vpop.f32.mrb[11].mxu1 }
 0x4ba   : > { %v1123_v57 = vpop.f32.mrb[12].mxu1 }
 0x4bb   : > { %v4333_v58 = vpop.f32.mrb[13].mxu1  ;;  %v1129_v26 = vsel %vm1014_vm6, %v1123_v57, -inf }
 0x4bc   : > { %1130 = vmax.xlane.f32.xlu0 %v1129_v26  ;;  %v1126_v59 = vpop.f32.mrb[14].mxu1 }
 0x4bd   : > { %v4334_v60 = vpop.f32.mrb[15].mxu1 }
 0x4d6   : > { %v1017_v61 = vpop.xlane.xlu1 %1016 }
 0x4d7   : > { %v1018_v34 = vsub.f32 %v1008_v51, %v1017_v61 }
 0x4d9   : > { %v1019_v63 = vmul.f32 1.442695, %v1018_v34 }
 0x4db   : > { %4812 = vpow2.f32 %v1019_v63 }
 0x4e5   : > { %v4813_v1 = vpop.eup %4812 }
 0x4e6   : > { %v1021_v2 = vsel %vm1014_vm6, %v4813_v1, 0.0 }
 0x4e7   : > { %1022 = vadd.xlane.f32.xlu0 %v1021_v2 }
 0x4fd   : > { %1028 = vrot.lane.b32.xlu0 %v966_v35, %s5291_s27 }
 0x549   : > { %v1131_v43 = vpop.xlane.xlu0 %1130 }
 0x54a   : > { %v1132_v3 = vsub.f32 %v1123_v57, %v1131_v43 }
 0x54c   : > { %v1133_v4 = vmul.f32 1.442695, %v1132_v3 }
 0x54e   : > { %4814 = vpow2.f32 %v1133_v4 }
 0x558   : > { %v4815_v5 = vpop.eup %4814 }
 0x559   : > { %v1135_v6 = vsel %vm1014_vm6, %v4815_v5, 0.0 }
 0x55a   : > { %1136 = vadd.xlane.f32.xlu1 %v1135_v6  ;;  %v5974_v6 = vpack.c.bf16 %v5872_v17, %v5872_v17 }
 0x56b   : > { %1141 = vrot.lane.b32.xlu1 %v966_v35, %s5292_s14 }
 0x56f   : > { %1404 = vrot.lane.b32.xlu1 %v5914_v45, %s5290_s20 }
 0x573   : > { %1402 = vrot.lane.b32.xlu1 %v1293_v7, %s5290_s20 }
 0x574   : > { %v1023_v8 = vpop.xlane.xlu0 %1022 }
 0x575   : > { %4816 = vrcp.f32 %v1023_v8 }
 0x578   : > { %v1029_v53 = vpop.permute.xlu0 %1028 }
 0x579   : > { %v1035_v9 = vsel %vm963_vm4, %v1029_v53, 0 }
 0x57a   : > { %4324 = vmatpush3.bf16.msra.mxu0 %v1035_v9 }
 0x57b   : > { %4335 = vmatprep.subr.bf16.mxu0 %v5288_v54 }
 0x57f   : > { %v4817_v10 = vpop.eup %4816 }
 0x580   : > { %v1025_v11 = vmul.f32 %v4817_v10, %v4813_v1 }
 0x582   : > { %v1026_v12 = vpack.c.bf16 %v1025_v11, %v1025_v11 }
 0x584   : > { %4326 = vmatmul.mubr.msk.bf16.vlgmr.msra.gmra.mrb[4].mxu0 %vm1030_vm7, %v1026_v12 }
 0x585   : > { %4337 = vmatprep.mubr.msk.bf16.mxu0 %vm5289_vm3, %v5288_v54 }
 0x5e7   : > { %v1137_v0 = vpop.xlane.xlu1 %1136 }
 0x5e8   : > { %4818 = vrcp.f32 %v1137_v0 }
 0x5eb   : > { %v1142_v14 = vpop.permute.xlu1 %1141 }
 0x5ec   : > { %v1147_v16 = vsel %vm963_vm4, %v1142_v14, 0 }
 0x5ed   : > { %4336 = vmatpush3.bf16.msra.mxu0 %v1147_v16 }
 0x5ee   : > { %4353 = vmatprep.subr.bf16.mxu0 %v5288_v54 }
 0x5ef   : > { %v1405_v51 = vpop.permute.xlu1 %1404 }
 0x5f0   : > { %v1410_v55 = vsel %vm967_vm5, %v1405_v51, 0 }
 0x5f2   : > { %v4819_v18 = vpop.eup %4818 }
 0x5f3   : > { %v1139_v19 = vmul.f32 %v4819_v18, %v4815_v5  ;;  %v1403_v33 = vpop.permute.xlu1 %1402  ;;  %v5968_v5 = vpack.c.bf16 %v5888_v41, %v5888_v41 }
 0x5f5   : > { %v1140_v20 = vpack.c.bf16 %v1139_v19, %v1139_v19 }
 0x5f7   : > { %4338 = vmatmul.mubr.msk.bf16.vlgmr.msra.gmra.mrb[8].mxu0 %vm1030_vm7, %v1140_v20 }
 0x5f8   : > { %4354 = vmatpush3.bf16.xpose.msra.mxu0 %v1298_v21  ;;  %4355 = vmatprep.mubr.msk.bf16.mxu0 %vm5289_vm3, %v5288_v54 }
 0x5f9   : > { %4359 = vmatprep.subr.bf16.mxu0 %v5288_v54 }
 0x5ff   : > { %4356 = vmatmul.mubr.msk.bf16.vlgmr.msra.gmra.mrb[12].mxu0 %vm967_vm5, %v1293_v7 }
 0x600   : > { %4361 = vmatprep.mubr.msk.bf16.mxu0 %vm5289_vm3, %v5288_v54 }
 0x657   : > { %v1071_v24 = vpop.f32.mrb[4].mxu0 }
 0x658   : > { %v4327_v27 = vpop.f32.mrb[5].mxu0  ;;  %v1077_v52 = vpack.c.bf16 %v1071_v24, %v1071_v24  ;;  %v1609_v24 = vsel %vm967_vm5, %v5968_v5, 0 }
 0x659   : > { %v1074_v28 = vpop.f32.mrb[6].mxu0 }
 0x65a   : > { %v4328_v29 = vpop.f32.mrb[7].mxu0 }
 0x6ca   : > { %v1183_v30 = vpop.f32.mrb[8].mxu0 }
 0x6cb   : > { %v1189_v35 = vpack.c.bf16 %v1183_v30, %v1183_v30  ;;  %v4339_v38 = vpop.f32.mrb[9].mxu0 }
 0x6cc   : > { %v1186_v39 = vpop.f32.mrb[10].mxu0 }
 0x6cd   : > { %v4340_v40 = vpop.f32.mrb[11].mxu0  ;;  %4344 = vmatmul.mubr.msk.bf16.vlgmr.msra.gmra.mrb[16].mxu1 %vm967_vm5, %v1189_v35 }
 0x6ce   : > { %4348 = vmatpush3.bf16.msra.mxu1 %v5942_v31  ;;  %4349 = vmatprep.mubr.msk.bf16.mxu1 %vm5289_vm3, %v5288_v54 }
 0x6cf   : > { %4365 = vmatprep.subr.bf16.mxu1 %v5288_v54 }
 0x6d2   : > { %v1334_v44 = vpop.f32.mrb[12].mxu0 }
 0x6d3   : > { %v4357_v46 = vpop.f32.mrb[13].mxu0  ;;  %v1340_v47 = vsel %vm1014_vm6, %v1334_v44, -inf }
 0x6d4   : > { %1341 = vmax.xlane.f32.xlu0 %v1340_v47  ;;  %v1337_v49 = vpop.f32.mrb[14].mxu0 }
 0x6d5   : > { %v4358_v50 = vpop.f32.mrb[15].mxu0 }
 0x6d9   : > { %4350 = vmatmul.mubr.msk.bf16.vlgmr.msra.gmra.mrb[16].mxu1 %vm967_vm5, %v1077_v52 }
 0x6da   : > { %4366 = vmatpush3.bf16.xpose.msra.mxu1 %v1410_v55  ;;  %4367 = vmatprep.mubr.msk.bf16.mxu1 %vm5289_vm3, %v5288_v54 }
 0x6db   : > { %4377 = vmatprep.subr.bf16.mxu1 %v5288_v54 }
 0x6e1   : > { %4368 = vmatmul.mubr.msk.bf16.vlgmr.msra.gmra.mrb[20].mxu1 %vm967_vm5, %v1403_v33 }
 0x6e2   : > { %4378 = vmatpush3.bf16.msra.mxu1 %v5937_v22  ;;  %4379 = vmatprep.mubr.msk.bf16.mxu1 %vm5289_vm3, %v5288_v54 }
 0x6e3   : > { %4383 = vmatprep.subr.bf16.mxu1 %v5288_v54 }
 0x761   : > { %v1342_v56 = vpop.xlane.xlu0 %1341 }
 0x762   : > { %v1343_v57 = vsub.f32 %v1334_v44, %v1342_v56 }
 0x764   : > { %v1344_v58 = vmul.f32 1.442695, %v1343_v57 }
 0x766   : > { %4820 = vpow2.f32 %v1344_v58 }
 0x770   : > { %v4821_v26 = vpop.eup %4820 }
 0x771   : > { %v1346_v59 = vsel %vm1014_vm6, %v4821_v26, 0.0 }
 0x772   : > { %1347 = vadd.xlane.f32.xlu0 %v1346_v59 }
 0x7ac   : > { %v5961_v60 = vpop.f32.mrb[16].mxu1 }
 0x7ad   : > { %v4351_v61 = vpop.f32.mrb[17].mxu1 }
 0x7ae   : > { %v1285_v34 = vpop.f32.mrb[18].mxu1 }
 0x7af   : > { %v4352_v63 = vpop.f32.mrb[19].mxu1 }
 0x7b4   : > { %v1446_v1 = vpop.f32.mrb[20].mxu1 }
 0x7b5   : > { %v4369_v2 = vpop.f32.mrb[21].mxu1  ;;  %v1452_v43 = vsel %vm1014_vm6, %v1446_v1, -inf }
 0x7b6   : > { %1453 = vmax.xlane.f32.xlu1 %v1452_v43  ;;  %v1449_v3 = vpop.f32.mrb[22].mxu1 }
 0x7b7   : > { %v4370_v4 = vpop.f32.mrb[23].mxu1 }
 0x7c7   : > { %1464 = vrot.lane.b32.xlu1 %v5914_v45, %s5292_s14 }
 0x7cb   : > { %1716 = vrot.lane.b32.xlu1 %v5968_v5, %s5290_s20 }
 0x7cf   : > { %1714 = vrot.lane.b32.xlu1 %v5974_v6, %s5290_s20 }
 0x7ff   : > { %v1348_v41 = vpop.xlane.xlu0 %1347 }
 0x843   : > { %v1454_v7 = vpop.xlane.xlu1 %1453 }
 0x844   : > { %v1455_v8 = vsub.f32 %v1446_v1, %v1454_v7 }
 0x846   : > { %v1456_v53 = vmul.f32 1.442695, %v1455_v8 }
 0x847   : > { %v1465_v16 = vpop.permute.xlu1 %1464 }
 0x848   : > { %4822 = vpow2.f32 %v1456_v53  ;;  %v1470_v19 = vsel %vm963_vm4, %v1465_v16, 0 }
 0x849   : > { %4824 = vrcp.f32 %v1348_v41 }
 0x84b   : > { %v1717_v51 = vpop.permute.xlu1 %1716 }
 0x84c   : > { %v1722_v33 = vsel %vm967_vm5, %v1717_v51, 0 }
 0x84f   : > { %v1715_v56 = vpop.permute.xlu1 %1714 }
 0x852   : > { %v4823_v9 = vpop.eup %4822 }
 0x853   : > { %v1458_v10 = vsel %vm1014_vm6, %v4823_v9, 0.0  ;;  %v4825_v11 = vpop.eup %4824 }
 0x854   : > { %1459 = vadd.xlane.f32.xlu0 %v1458_v10  ;;  %v1350_v17 = vmul.f32 %v4825_v11, %v4821_v26  ;;  %v6024_v10 = vpack.c.bf16 %v5896_v25, %v5896_v25 }
 0x856   : > { %v1351_v18 = vpack.c.bf16 %v1350_v17, %v1350_v17 }
 0x86a   : > { %1353 = vrot.lane.b32.xlu0 %v5914_v45, %s5291_s27 }
 0x8e1   : > { %v1460_v12 = vpop.xlane.xlu0 %1459 }
 0x8e2   : > { %4826 = vrcp.f32 %v1460_v12 }
 0x8e5   : > { %v1354_v0 = vpop.permute.xlu0 %1353 }
 0x8e6   : > { %v1359_v14 = vsel %vm963_vm4, %v1354_v0, 0 }
 0x8e7   : > { %4360 = vmatpush3.bf16.msra.mxu0 %v1359_v14 }
 0x8e8   : > { %4371 = vmatprep.subr.bf16.mxu0 %v5288_v54 }
 0x8ea   : > { %4362 = vmatmul.mubr.msk.bf16.vlgmr.msra.gmra.mrb[16].mxu0 %vm1030_vm7, %v1351_v18 }
 0x8eb   : > { %4372 = vmatpush3.bf16.msra.mxu0 %v1470_v19  ;;  %4373 = vmatprep.mubr.msk.bf16.mxu0 %vm5289_vm3, %v5288_v54 }
 0x8ec   : > { %v4827_v45 = vpop.eup %4826  ;;  %4389 = vmatprep.subr.bf16.mxu0 %v5288_v54 }
 0x8ed   : > { %v1462_v20 = vmul.f32 %v4827_v45, %v4823_v9 }
 0x8ef   : > { %v1463_v21 = vpack.c.bf16 %v1462_v20, %v1462_v20 }
 0x8f2   : > { %4374 = vmatmul.mubr.msk.bf16.vlgmr.msra.gmra.mrb[20].mxu0 %vm1030_vm7, %v1463_v21 }
 0x8f3   : > { %4391 = vmatprep.mubr.msk.bf16.mxu0 %vm5289_vm3, %v5288_v54 }
 0x8f4   : > { %4390 = vmatpush3.bf16.xpose.msra.mxu0 %v1609_v24 }
 0x8f5   : > { %4395 = vmatprep.subr.bf16.mxu0 %v5288_v54 }
 0x8fb   : > { %4392 = vmatmul.mubr.msk.bf16.vlgmr.msra.gmra.mrb[24].mxu0 %vm967_vm5, %v5974_v6 }
 0x8fc   : > { %4397 = vmatprep.mubr.msk.bf16.mxu0 %vm5289_vm3, %v5288_v54 }
 0x9bd   : > { %v1395_v27 = vpop.f32.mrb[16].mxu0 }
 0x9be   : > { %v4363_v28 = vpop.f32.mrb[17].mxu0  ;;  %v1401_v55 = vpack.c.bf16 %v1395_v27, %v1395_v27 }
 0x9bf   : > { %v1398_v29 = vpop.f32.mrb[18].mxu0  ;;  %v1921_v28 = vsel %vm967_vm5, %v6024_v10, 0 }
 0x9c0   : > { %v4364_v30 = vpop.f32.mrb[19].mxu0 }
 0x9c5   : > { %v1506_v35 = vpop.f32.mrb[20].mxu0 }
 0x9c6   : > { %v1512_v38 = vpack.c.bf16 %v1506_v35, %v1506_v35  ;;  %v4375_v39 = vpop.f32.mrb[21].mxu0 }
 0x9c7   : > { %v1509_v40 = vpop.f32.mrb[22].mxu0 }
 0x9c8   : > { %v4376_v44 = vpop.f32.mrb[23].mxu0  ;;  %4380 = vmatmul.mubr.msk.bf16.vlgmr.msra.gmra.mrb[24].mxu1 %vm967_vm5, %v1512_v38 }
 0x9c9   : > { %4384 = vmatpush3.bf16.msra.mxu1 %v5942_v31  ;;  %4385 = vmatprep.mubr.msk.bf16.mxu1 %vm5289_vm3, %v5288_v54 }
 0x9ca   : > { %4401 = vmatprep.subr.bf16.mxu1 %v5288_v54 }
 0x9ce   : > { %v1645_v46 = vpop.f32.mrb[24].mxu0 }
 0x9cf   : > { %v4393_v47 = vpop.f32.mrb[25].mxu0  ;;  %v1651_v49 = vsel %vm1014_vm6, %v1645_v46, -inf }
 0x9d0   : > { %1652 = vmax.xlane.f32.xlu0 %v1651_v49  ;;  %v1648_v50 = vpop.f32.mrb[26].mxu0 }
 0x9d1   : > { %v4394_v52 = vpop.f32.mrb[27].mxu0 }
 0x9d4   : > { %4386 = vmatmul.mubr.msk.bf16.vlgmr.msra.gmra.mrb[24].mxu1 %vm967_vm5, %v1401_v55 }
 0x9d5   : > { %4402 = vmatpush3.bf16.xpose.msra.mxu1 %v1722_v33  ;;  %4403 = vmatprep.mubr.msk.bf16.mxu1 %vm5289_vm3, %v5288_v54 }
 0x9d6   : > { %4413 = vmatprep.subr.bf16.mxu1 %v5288_v54 }
 0x9dc   : > { %4404 = vmatmul.mubr.msk.bf16.vlgmr.msra.gmra.mrb[28].mxu1 %vm967_vm5, %v1715_v56 }
 0x9dd   : > { %4414 = vmatpush3.bf16.msra.mxu1 %v5937_v22  ;;  %4415 = vmatprep.mubr.msk.bf16.mxu1 %vm5289_vm3, %v5288_v54 }
 0x9de   : > { %4419 = vmatprep.subr.bf16.mxu1 %v5288_v54 }
 0xa5d   : > { %v1653_v57 = vpop.xlane.xlu0 %1652 }
 0xa5e   : > { %v1654_v58 = vsub.f32 %v1645_v46, %v1653_v57 }
 0xa60   : > { %v1655_v26 = vmul.f32 1.442695, %v1654_v58 }
 0xa62   : > { %4828 = vpow2.f32 %v1655_v26 }
 0xa6c   : > { %v4829_v59 = vpop.eup %4828 }
 0xa6d   : > { %v1657_v61 = vsel %vm1014_vm6, %v4829_v59, 0.0 }
 0xa6e   : > { %1658 = vadd.xlane.f32.xlu0 %v1657_v61 }
 0xaa7   : > { %v1593_v34 = vpop.f32.mrb[24].mxu1 }
 0xaa8   : > { %v3469_v63 = vrot.slane %v1593_v34, 4  ;;  %v4387_v1 = vpop.f32.mrb[25].mxu1 }
 0xaa9   : > { %v1596_v2 = vpop.f32.mrb[26].mxu1 }
 0xaaa   : > { %v6017_v43 = vsel %vm963_vm4, %v5961_v60, %v3469_v63  ;;  %v4388_v3 = vpop.f32.mrb[27].mxu1  ;;  %v1916_v60 = vrot.slane %v5974_v6, 2 }
 0xaaf   : > { %v1758_v4 = vpop.f32.mrb[28].mxu1 }
 0xab0   : > { %v4405_v7 = vpop.f32.mrb[29].mxu1  ;;  %v1764_v8 = vsel %vm1014_vm6, %v1758_v4, -inf }
 0xab1   : > { %1765 = vmax.xlane.f32.xlu1 %v1764_v8  ;;  %v1761_v53 = vpop.f32.mrb[30].mxu1 }
 0xab2   : > { %v4406_v9 = vpop.f32.mrb[31].mxu1 }
 0xac2   : > { %1776 = vrot.lane.b32.xlu1 %v5968_v5, %s5292_s14 }
 0xac6   : > { %2027 = vrot.lane.b32.xlu1 %v6024_v10, %s5290_s20 }
 0xaca   : > { %2025 = vrot.lane.b32.xlu1 %v1916_v60, %s5290_s20 }
 0xafb   : > { %v1659_v25 = vpop.xlane.xlu0 %1658 }
 0xb3e   : > { %v1766_v41 = vpop.xlane.xlu1 %1765 }
 0xb3f   : > { %v1767_v11 = vsub.f32 %v1758_v4, %v1766_v41  ;;  %v6073_v41 = vpack.c.bf16 %v5877_v23, %v5877_v23 }
 0xb41   : > { %v1768_v12 = vmul.f32 1.442695, %v1767_v11  ;;  %v6079_v11 = vpack.c.bf16 %v5866_v62, %v5866_v62 }
 0xb42   : > { %v1777_v45 = vpop.permute.xlu1 %1776 }
 0xb43   : > { %4830 = vpow2.f32 %v1768_v12  ;;  %v1782_v21 = vsel %vm963_vm4, %v1777_v45, 0 }
 0xb44   : > { %4832 = vrcp.f32 %v1659_v25 }
 0xb46   : > { %v2028_v55 = vpop.permute.xlu1 %2027 }
 0xb47   : > { %v2033_v57 = vsel %vm967_vm5, %v2028_v55, 0 }
 0xb4a   : > { %v2026_v58 = vpop.permute.xlu1 %2025 }
 0xb4d   : > { %v4831_v17 = vpop.eup %4830 }
 0xb4e   : > { %v1770_v0 = vsel %vm1014_vm6, %v4831_v17, 0.0  ;;  %v4833_v14 = vpop.eup %4832 }
 0xb4f   : > { %1771 = vadd.xlane.f32.xlu0 %v1770_v0  ;;  %v1661_v18 = vmul.f32 %v4833_v14, %v4829_v59 }
 0xb51   : > { %v1662_v20 = vpack.c.bf16 %v1661_v18, %v1661_v18 }
 0xb65   : > { %1664 = vrot.lane.b32.xlu0 %v5968_v5, %s5291_s27 }
 0xbdc   : > { %v1772_v16 = vpop.xlane.xlu0 %1771 }
 0xbdd   : > { %4834 = vrcp.f32 %v1772_v16 }
 0xbe0   : > { %v1665_v6 = vpop.permute.xlu0 %1664 }
 0xbe1   : > { %v1670_v19 = vsel %vm963_vm4, %v1665_v6, 0 }
 0xbe2   : > { %4396 = vmatpush3.bf16.msra.mxu0 %v1670_v19 }
 0xbe3   : > { %4407 = vmatprep.subr.bf16.mxu0 %v5288_v54 }
 0xbe5   : > { %4398 = vmatmul.mubr.msk.bf16.vlgmr.msra.gmra.mrb[28].mxu0 %vm1030_vm7, %v1662_v20 }
 0xbe6   : > { %4408 = vmatpush3.bf16.msra.mxu0 %v1782_v21  ;;  %4409 = vmatprep.mubr.msk.bf16.mxu0 %vm5289_vm3, %v5288_v54 }
 0xbe7   : > { %v4835_v5 = vpop.eup %4834  ;;  %4425 = vmatprep.subr.bf16.mxu0 %v5288_v54 }
 0xbe8   : > { %v1774_v24 = vmul.f32 %v4835_v5, %v4831_v17 }
 0xbea   : > { %v1775_v27 = vpack.c.bf16 %v1774_v24, %v1774_v24 }
 0xbed   : > { %4410 = vmatmul.mubr.msk.bf16.vlgmr.msra.gmra.mrb[32].mxu0 %vm1030_vm7, %v1775_v27  ;;  %v2232_v27 = vsel %vm967_vm5, %v6073_v41, 0 }
 0xbee   : > { %4427 = vmatprep.mubr.msk.bf16.mxu0 %vm5289_vm3, %v5288_v54 }
 0xbef   : > { %4426 = vmatpush3.bf16.xpose.msra.mxu0 %v1921_v28 }
 0xbf0   : > { %4431 = vmatprep.subr.bf16.mxu0 %v5288_v54 }
 0xbf6   : > { %4428 = vmatmul.mubr.msk.bf16.vlgmr.msra.gmra.mrb[36].mxu0 %vm967_vm5, %v1916_v60 }
 0xbf7   : > { %4433 = vmatprep.mubr.msk.bf16.mxu0 %vm5289_vm3, %v5288_v54 }
 0xcb8   : > { %v1706_v29 = vpop.f32.mrb[28].mxu0 }
 0xcb9   : > { %v4399_v30 = vpop.f32.mrb[29].mxu0  ;;  %v1712_v56 = vpack.c.bf16 %v1706_v29, %v1706_v29 }
 0xcba   : > { %v1709_v35 = vpop.f32.mrb[30].mxu0 }
 0xcbb   : > { %v4400_v38 = vpop.f32.mrb[31].mxu0 }
 0xcc0   : > { %v1818_v39 = vpop.f32.mrb[32].mxu0 }
 0xcc1   : > { %v1824_v40 = vpack.c.bf16 %v1818_v39, %v1818_v39  ;;  %v4411_v44 = vpop.f32.mrb[33].mxu0 }
 0xcc2   : > { %v1821_v46 = vpop.f32.mrb[34].mxu0 }
 0xcc3   : > { %v4412_v47 = vpop.f32.mrb[35].mxu0  ;;  %4416 = vmatmul.mubr.msk.bf16.vlgmr.msra.gmra.mrb[32].mxu1 %vm967_vm5, %v1824_v40 }
 0xcc4   : > { %4420 = vmatpush3.bf16.msra.mxu1 %v5942_v31  ;;  %4421 = vmatprep.mubr.msk.bf16.mxu1 %vm5289_vm3, %v5288_v54 }
 0xcc5   : > { %4437 = vmatprep.subr.bf16.mxu1 %v5288_v54 }
 0xcc9   : > { %v1957_v49 = vpop.f32.mrb[36].mxu0 }
 0xcca   : > { %v4429_v50 = vpop.f32.mrb[37].mxu0  ;;  %v1963_v51 = vsel %vm1014_vm6, %v1957_v49, -inf }
 0xccb   : > { %1964 = vmax.xlane.f32.xlu0 %v1963_v51  ;;  %v1960_v52 = vpop.f32.mrb[38].mxu0 }
 0xccc   : > { %v4430_v33 = vpop.f32.mrb[39].mxu0 }
 0xccf   : > { %4422 = vmatmul.mubr.msk.bf16.vlgmr.msra.gmra.mrb[32].mxu1 %vm967_vm5, %v1712_v56 }
 0xcd0   : > { %4438 = vmatpush3.bf16.xpose.msra.mxu1 %v2033_v57  ;;  %4439 = vmatprep.mubr.msk.bf16.mxu1 %vm5289_vm3, %v5288_v54 }
 0xcd1   : > { %4449 = vmatprep.subr.bf16.mxu1 %v5288_v54 }
 0xcd7   : > { %4440 = vmatmul.mubr.msk.bf16.vlgmr.msra.gmra.mrb[36].mxu1 %vm967_vm5, %v2026_v58 }
 0xcd8   : > { %4450 = vmatpush3.bf16.msra.mxu1 %v5937_v22  ;;  %4451 = vmatprep.mubr.msk.bf16.mxu1 %vm5289_vm3, %v5288_v54 }
 0xcd9   : > { %4455 = vmatprep.subr.bf16.mxu1 %v5288_v54 }
 0xd58   : > { %v1965_v26 = vpop.xlane.xlu0 %1964 }
 0xd59   : > { %v1966_v59 = vsub.f32 %v1957_v49, %v1965_v26 }
 0xd5b   : > { %v1967_v61 = vmul.f32 1.442695, %v1966_v59 }
 0xd5d   : > { %4836 = vpow2.f32 %v1967_v61 }
 0xd67   : > { %v4837_v34 = vpop.eup %4836 }
 0xd68   : > { %v1969_v63 = vsel %vm1014_vm6, %v4837_v34, 0.0 }
 0xd69   : > { %1970 = vadd.xlane.f32.xlu0 %v1969_v63 }
 0xda2   : > { %v6066_v1 = vpop.f32.mrb[32].mxu1 }
 0xda3   : > { %v4423_v2 = vpop.f32.mrb[33].mxu1 }
 0xda4   : > { %v1908_v3 = vpop.f32.mrb[34].mxu1 }
 0xda5   : > { %v4424_v4 = vpop.f32.mrb[35].mxu1 }
 0xdaa   : > { %v2069_v7 = vpop.f32.mrb[36].mxu1 }
 0xdab   : > { %v4441_v8 = vpop.f32.mrb[37].mxu1  ;;  %v2075_v53 = vsel %vm1014_vm6, %v2069_v7, -inf }
 0xdac   : > { %2076 = vmax.xlane.f32.xlu1 %v2075_v53  ;;  %v2072_v9 = vpop.f32.mrb[38].mxu1 }
 0xdad   : > { %v4442_v60 = vpop.f32.mrb[39].mxu1 }
 0xdbd   : > { %2087 = vrot.lane.b32.xlu1 %v6024_v10, %s5292_s14 }
 0xdc1   : > { %2339 = vrot.lane.b32.xlu1 %v6073_v41, %s5290_s20 }
 0xdc5   : > { %2337 = vrot.lane.b32.xlu1 %v6079_v11, %s5290_s20 }
 0xdf6   : > { %v1971_v23 = vpop.xlane.xlu0 %1970 }
 0xe39   : > { %v2077_v12 = vpop.xlane.xlu1 %2076 }
 0xe3a   : > { %v2078_v17 = vsub.f32 %v2069_v7, %v2077_v12 }
 0xe3c   : > { %v2079_v0 = vmul.f32 1.442695, %v2078_v17 }
 0xe3d   : > { %v2088_v45 = vpop.permute.xlu1 %2087 }
 0xe3e   : > { %4838 = vpow2.f32 %v2079_v0  ;;  %v2093_v21 = vsel %vm963_vm4, %v2088_v45, 0  ;;  %v6129_v0 = vpack.c.bf16 %v5881_v32, %v5881_v32 }
 0xe3f   : > { %4840 = vrcp.f32 %v1971_v23 }
 0xe41   : > { %v2340_v52 = vpop.permute.xlu1 %2339 }
 0xe42   : > { %v2345_v56 = vsel %vm967_vm5, %v2340_v52, 0 }
 0xe45   : > { %v2338_v57 = vpop.permute.xlu1 %2337 }
 0xe48   : > { %v4839_v25 = vpop.eup %4838 }
 0xe49   : > { %v2081_v14 = vsel %vm1014_vm6, %v4839_v25, 0.0  ;;  %v4841_v16 = vpop.eup %4840 }
 0xe4a   : > { %2082 = vadd.xlane.f32.xlu0 %v2081_v14  ;;  %v1973_v62 = vmul.f32 %v4841_v16, %v4837_v34 }
 0xe4c   : > { %v1974_v20 = vpack.c.bf16 %v1973_v62, %v1973_v62 }
 0xe60   : > { %1976 = vrot.lane.b32.xlu0 %v6024_v10, %s5291_s27 }
 0xed7   : > { %v2083_v18 = vpop.xlane.xlu0 %2082 }
 0xed8   : > { %4842 = vrcp.f32 %v2083_v18 }
 0xedb   : > { %v1977_v6 = vpop.permute.xlu0 %1976 }
 0xedc   : > { %v1982_v19 = vsel %vm963_vm4, %v1977_v6, 0 }
 0xedd   : > { %4432 = vmatpush3.bf16.msra.mxu0 %v1982_v19 }
 0xede   : > { %4443 = vmatprep.subr.bf16.mxu0 %v5288_v54 }
 0xee0   : > { %4434 = vmatmul.mubr.msk.bf16.vlgmr.msra.gmra.mrb[40].mxu0 %vm1030_vm7, %v1974_v20 }
 0xee1   : > { %4444 = vmatpush3.bf16.msra.mxu0 %v2093_v21  ;;  %4445 = vmatprep.mubr.msk.bf16.mxu0 %vm5289_vm3, %v5288_v54 }
 0xee2   : > { %v4843_v10 = vpop.eup %4842  ;;  %4461 = vmatprep.subr.bf16.mxu0 %v5288_v54 }
 0xee3   : > { %v2085_v5 = vmul.f32 %v4843_v10, %v4839_v25 }
 0xee5   : > { %v2086_v24 = vpack.c.bf16 %v2085_v5, %v2085_v5 }
 0xee8   : > { %4446 = vmatmul.mubr.msk.bf16.vlgmr.msra.gmra.mrb[44].mxu0 %vm1030_vm7, %v2086_v24 }
 0xee9   : > { %4463 = vmatprep.mubr.msk.bf16.mxu0 %vm5289_vm3, %v5288_v54 }
 0xeea   : > { %4462 = vmatpush3.bf16.xpose.msra.mxu0 %v2232_v27  ;;  %v2544_v27 = vsel %vm967_vm5, %v6129_v0, 0 }
 0xeeb   : > { %4467 = vmatprep.subr.bf16.mxu0 %v5288_v54 }
 0xef1   : > { %4464 = vmatmul.mubr.msk.bf16.vlgmr.msra.gmra.mrb[48].mxu0 %vm967_vm5, %v6079_v11 }
 0xef2   : > { %4469 = vmatprep.mubr.msk.bf16.mxu0 %vm5289_vm3, %v5288_v54 }
 0xfb3   : > { %v2018_v28 = vpop.f32.mrb[40].mxu0 }
 0xfb4   : > { %v4435_v29 = vpop.f32.mrb[41].mxu0  ;;  %v2024_v33 = vpack.c.bf16 %v2018_v28, %v2018_v28 }
 0xfb5   : > { %v2021_v30 = vpop.f32.mrb[42].mxu0 }
 0xfb6   : > { %v4436_v35 = vpop.f32.mrb[43].mxu0 }
 0xfbb   : > { %v2129_v38 = vpop.f32.mrb[44].mxu0 }
 0xfbc   : > { %v2135_v39 = vpack.c.bf16 %v2129_v38, %v2129_v38  ;;  %v4447_v40 = vpop.f32.mrb[45].mxu0 }
 0xfbd   : > { %v2132_v44 = vpop.f32.mrb[46].mxu0 }
 0xfbe   : > { %v4448_v46 = vpop.f32.mrb[47].mxu0  ;;  %4452 = vmatmul.mubr.msk.bf16.vlgmr.msra.gmra.mrb[40].mxu1 %vm967_vm5, %v2135_v39 }
 0xfbf   : > { %4456 = vmatpush3.bf16.msra.mxu1 %v5942_v31  ;;  %4457 = vmatprep.mubr.msk.bf16.mxu1 %vm5289_vm3, %v5288_v54 }
 0xfc0   : > { %4473 = vmatprep.subr.bf16.mxu1 %v5288_v54 }
 0xfc4   : > { %v2268_v47 = vpop.f32.mrb[48].mxu0 }
 0xfc5   : > { %v4465_v49 = vpop.f32.mrb[49].mxu0  ;;  %v2274_v50 = vsel %vm1014_vm6, %v2268_v47, -inf }
 0xfc6   : > { %2275 = vmax.xlane.f32.xlu0 %v2274_v50  ;;  %v2271_v51 = vpop.f32.mrb[50].mxu0 }
 0xfc7   : > { %v4466_v55 = vpop.f32.mrb[51].mxu0 }
 0xfca   : > { %4458 = vmatmul.mubr.msk.bf16.vlgmr.msra.gmra.mrb[40].mxu1 %vm967_vm5, %v2024_v33 }
 0xfcb   : > { %4474 = vmatpush3.bf16.xpose.msra.mxu1 %v2345_v56  ;;  %4475 = vmatprep.mubr.msk.bf16.mxu1 %vm5289_vm3, %v5288_v54 }
 0xfcc   : > { %4485 = vmatprep.subr.bf16.mxu1 %v5288_v54 }
 0xfd2   : > { %4476 = vmatmul.mubr.msk.bf16.vlgmr.msra.gmra.mrb[44].mxu1 %vm967_vm5, %v2338_v57 }
 0xfd3   : > { %4486 = vmatpush3.bf16.msra.mxu1 %v5937_v22  ;;  %4487 = vmatprep.mubr.msk.bf16.mxu1 %vm5289_vm3, %v5288_v54 }
 0xfd4   : > { %4491 = vmatprep.subr.bf16.mxu1 %v5288_v54 }
0x1053   : > { %v2276_v58 = vpop.xlane.xlu0 %2275 }
0x1054   : > { %v2277_v26 = vsub.f32 %v2268_v47, %v2276_v58 }
0x1056   : > { %v2278_v59 = vmul.f32 1.442695, %v2277_v26 }
0x1058   : > { %4844 = vpow2.f32 %v2278_v59 }
0x1062   : > { %v4845_v61 = vpop.eup %4844 }
0x1063   : > { %v2280_v34 = vsel %vm1014_vm6, %v4845_v61, 0.0 }
0x1064   : > { %2281 = vadd.xlane.f32.xlu0 %v2280_v34 }
0x109d   : > { %v2216_v63 = vpop.f32.mrb[40].mxu1 }
0x109e   : > { %v3472_v2 = vrot.slane %v2216_v63, 4  ;;  %v4459_v3 = vpop.f32.mrb[41].mxu1 }
0x109f   : > { %v2219_v4 = vpop.f32.mrb[42].mxu1 }
0x10a0   : > { %v6122_v7 = vsel %vm963_vm4, %v6066_v1, %v3472_v2  ;;  %v4460_v8 = vpop.f32.mrb[43].mxu1  ;;  %v2539_v1 = vrot.slane %v6079_v11, 2 }
0x10a5   : > { %v2381_v53 = vpop.f32.mrb[44].mxu1 }
0x10a6   : > { %v4477_v9 = vpop.f32.mrb[45].mxu1  ;;  %v2387_v60 = vsel %vm1014_vm6, %v2381_v53, -inf }
0x10a7   : > { %2388 = vmax.xlane.f32.xlu1 %v2387_v60  ;;  %v2384_v12 = vpop.f32.mrb[46].mxu1 }
0x10a8   : > { %v4478_v17 = vpop.f32.mrb[47].mxu1 }
0x10a9   : > { %v6178_v17 = vpack.c.bf16 %v5884_v36, %v5884_v36 }
0x10b8   : > { %2399 = vrot.lane.b32.xlu1 %v6073_v41, %s5292_s14 }
0x10bc   : > { %2650 = vrot.lane.b32.xlu1 %v6129_v0, %s5290_s20 }
0x10c0   : > { %2648 = vrot.lane.b32.xlu1 %v2539_v1, %s5290_s20 }
0x10f1   : > { %v2282_v32 = vpop.xlane.xlu0 %2281 }
0x1134   : > { %v2389_v25 = vpop.xlane.xlu1 %2388 }
0x1135   : > { %v2390_v14 = vsub.f32 %v2381_v53, %v2389_v25 }
0x1137   : > { %v2391_v23 = vmul.f32 1.442695, %v2390_v14 }
0x1138   : > { %v2400_v20 = vpop.permute.xlu1 %2399 }
0x1139   : > { %4846 = vpow2.f32 %v2391_v23  ;;  %v2405_v10 = vsel %vm963_vm4, %v2400_v20, 0 }
0x113a   : > { %4848 = vrcp.f32 %v2282_v32 }
0x113c   : > { %v2651_v52 = vpop.permute.xlu1 %2650 }
0x113d   : > { %v2656_v56 = vsel %vm967_vm5, %v2651_v52, 0 }
0x1140   : > { %v2649_v57 = vpop.permute.xlu1 %2648 }
0x1143   : > { %v4847_v16 = vpop.eup %4846 }
0x1144   : > { %v2393_v18 = vsel %vm1014_vm6, %v4847_v16, 0.0  ;;  %v4849_v62 = vpop.eup %4848 }
0x1145   : > { %2394 = vadd.xlane.f32.xlu0 %v2393_v18  ;;  %v2284_v19 = vmul.f32 %v4849_v62, %v4845_v61 }
0x1147   : > { %v2285_v21 = vpack.c.bf16 %v2284_v19, %v2284_v19 }
0x115b   : > { %2287 = vrot.lane.b32.xlu0 %v6073_v41, %s5291_s27 }
0x11d2   : > { %v2395_v6 = vpop.xlane.xlu0 %2394 }
0x11d3   : > { %4850 = vrcp.f32 %v2395_v6 }
0x11d6   : > { %v2288_v11 = vpop.permute.xlu0 %2287 }
0x11d7   : > { %v2293_v45 = vsel %vm963_vm4, %v2288_v11, 0 }
0x11d8   : > { %4468 = vmatpush3.bf16.msra.mxu0 %v2293_v45 }
0x11d9   : > { %4479 = vmatprep.subr.bf16.mxu0 %v5288_v54 }
0x11db   : > { %4470 = vmatmul.mubr.msk.bf16.vlgmr.msra.gmra.mrb[52].mxu0 %vm1030_vm7, %v2285_v21 }
0x11dc   : > { %4480 = vmatpush3.bf16.msra.mxu0 %v2405_v10  ;;  %4481 = vmatprep.mubr.msk.bf16.mxu0 %vm5289_vm3, %v5288_v54 }
0x11dd   : > { %v4851_v41 = vpop.eup %4850  ;;  %4497 = vmatprep.subr.bf16.mxu0 %v5288_v54 }
0x11de   : > { %v2397_v5 = vmul.f32 %v4851_v41, %v4847_v16  ;;  %v2855_v41 = vsel %vm967_vm5, %v6178_v17, 0 }
0x11e0   : > { %v2398_v24 = vpack.c.bf16 %v2397_v5, %v2397_v5 }
0x11e3   : > { %4482 = vmatmul.mubr.msk.bf16.vlgmr.msra.gmra.mrb[56].mxu0 %vm1030_vm7, %v2398_v24 }
0x11e4   : > { %4499 = vmatprep.mubr.msk.bf16.mxu0 %vm5289_vm3, %v5288_v54 }
0x11e5   : > { %4498 = vmatpush3.bf16.xpose.msra.mxu0 %v2544_v27 }
0x11e6   : > { %4503 = vmatprep.subr.bf16.mxu0 %v5288_v54 }
0x11ec   : > { %4500 = vmatmul.mubr.msk.bf16.vlgmr.msra.gmra.mrb[60].mxu0 %vm967_vm5, %v2539_v1  ;;  %v6184_v1 = vpack.c.bf16 %v5870_v15, %v5870_v15 }
0x11ed   : > { %4505 = vmatprep.mubr.msk.bf16.mxu0 %vm5289_vm3, %v5288_v54 }
0x12ae   : > { %v2329_v28 = vpop.f32.mrb[52].mxu0 }
0x12af   : > { %v4471_v29 = vpop.f32.mrb[53].mxu0  ;;  %v2335_v33 = vpack.c.bf16 %v2329_v28, %v2329_v28 }
0x12b0   : > { %v2332_v30 = vpop.f32.mrb[54].mxu0 }
0x12b1   : > { %v4472_v35 = vpop.f32.mrb[55].mxu0 }
0x12b6   : > { %v2441_v38 = vpop.f32.mrb[56].mxu0 }
0x12b7   : > { %v2447_v39 = vpack.c.bf16 %v2441_v38, %v2441_v38  ;;  %v4483_v40 = vpop.f32.mrb[57].mxu0 }
0x12b8   : > { %v2444_v44 = vpop.f32.mrb[58].mxu0 }
0x12b9   : > { %v4484_v46 = vpop.f32.mrb[59].mxu0  ;;  %4488 = vmatmul.mubr.msk.bf16.vlgmr.msra.gmra.mrb[48].mxu1 %vm967_vm5, %v2447_v39 }
0x12ba   : > { %4492 = vmatpush3.bf16.msra.mxu1 %v5942_v31  ;;  %4493 = vmatprep.mubr.msk.bf16.mxu1 %vm5289_vm3, %v5288_v54 }
0x12bb   : > { %4509 = vmatprep.subr.bf16.mxu1 %v5288_v54 }
0x12bf   : > { %v2580_v47 = vpop.f32.mrb[60].mxu0 }
0x12c0   : > { %v4501_v49 = vpop.f32.mrb[61].mxu0  ;;  %v2586_v50 = vsel %vm1014_vm6, %v2580_v47, -inf }
0x12c1   : > { %2587 = vmax.xlane.f32.xlu0 %v2586_v50  ;;  %v2583_v51 = vpop.f32.mrb[62].mxu0 }
0x12c2   : > { %v4502_v55 = vpop.f32.mrb[63].mxu0 }
0x12c5   : > { %4494 = vmatmul.mubr.msk.bf16.vlgmr.msra.gmra.mrb[48].mxu1 %vm967_vm5, %v2335_v33 }
0x12c6   : > { %4510 = vmatpush3.bf16.xpose.msra.mxu1 %v2656_v56  ;;  %4511 = vmatprep.mubr.msk.bf16.mxu1 %vm5289_vm3, %v5288_v54 }
0x12c7   : > { %4521 = vmatprep.subr.bf16.mxu1 %v5288_v54 }
0x12cd   : > { %4512 = vmatmul.mubr.msk.bf16.vlgmr.msra.gmra.mrb[52].mxu1 %vm967_vm5, %v2649_v57 }
0x12ce   : > { %4522 = vmatpush3.bf16.msra.mxu1 %v5937_v22  ;;  %4523 = vmatprep.mubr.msk.bf16.mxu1 %vm5289_vm3, %v5288_v54 }
0x12cf   : > { %4527 = vmatprep.subr.bf16.mxu1 %v5288_v54 }
0x134e   : > { %v2588_v58 = vpop.xlane.xlu0 %2587 }
0x134f   : > { %v2589_v26 = vsub.f32 %v2580_v47, %v2588_v58 }
0x1351   : > { %v2590_v59 = vmul.f32 1.442695, %v2589_v26 }
0x1353   : > { %4852 = vpow2.f32 %v2590_v59 }
0x135d   : > { %v4853_v61 = vpop.eup %4852 }
0x135e   : > { %v2592_v34 = vsel %vm1014_vm6, %v4853_v61, 0.0 }
0x135f   : > { %2593 = vadd.xlane.f32.xlu0 %v2592_v34 }
0x1398   : > { %v6171_v63 = vpop.f32.mrb[48].mxu1 }
0x1399   : > { %v4495_v2 = vpop.f32.mrb[49].mxu1 }
0x139a   : > { %v2531_v3 = vpop.f32.mrb[50].mxu1 }
0x139b   : > { %v4496_v4 = vpop.f32.mrb[51].mxu1 }
0x13a0   : > { %v2692_v8 = vpop.f32.mrb[52].mxu1 }
0x13a1   : > { %v4513_v53 = vpop.f32.mrb[53].mxu1  ;;  %v2698_v9 = vsel %vm1014_vm6, %v2692_v8, -inf }
0x13a2   : > { %2699 = vmax.xlane.f32.xlu1 %v2698_v9  ;;  %v2695_v60 = vpop.f32.mrb[54].mxu1 }
0x13a3   : > { %v4514_v12 = vpop.f32.mrb[55].mxu1  ;;  %v6234_v60 = vpack.c.bf16 %v5891_v42, %v5891_v42 }
0x13b3   : > { %2710 = vrot.lane.b32.xlu1 %v6129_v0, %s5292_s14 }
0x13b7   : > { %2962 = vrot.lane.b32.xlu1 %v6178_v17, %s5290_s20 }
0x13bb   : > { %2960 = vrot.lane.b32.xlu1 %v6184_v1, %s5290_s20 }
0x13ec   : > { %v2594_v36 = vpop.xlane.xlu0 %2593 }
0x142f   : > { %v2700_v25 = vpop.xlane.xlu1 %2699 }
0x1430   : > { %v2701_v14 = vsub.f32 %v2692_v8, %v2700_v25 }
0x1432   : > { %v2702_v23 = vmul.f32 1.442695, %v2701_v14 }
0x1433   : > { %v2711_v11 = vpop.permute.xlu1 %2710 }
0x1434   : > { %4854 = vpow2.f32 %v2702_v23  ;;  %v2716_v20 = vsel %vm963_vm4, %v2711_v11, 0 }
0x1435   : > { %4856 = vrcp.f32 %v2594_v36 }
0x1437   : > { %v2963_v49 = vpop.permute.xlu1 %2962 }
0x1438   : > { %v2968_v52 = vsel %vm967_vm5, %v2963_v49, 0 }
0x143e   : > { %v4855_v16 = vpop.eup %4854 }
0x143f   : > { %v2704_v18 = vsel %vm1014_vm6, %v4855_v16, 0.0  ;;  %v4857_v32 = vpop.eup %4856 }
0x1440   : > { %2705 = vadd.xlane.f32.xlu0 %v2704_v18  ;;  %v2596_v15 = vmul.f32 %v4857_v32, %v4853_v61 }
0x1442   : > { %v2597_v45 = vpack.c.bf16 %v2596_v15, %v2596_v15 }
0x1456   : > { %2599 = vrot.lane.b32.xlu0 %v6129_v0, %s5291_s27 }
0x14cd   : > { %v2706_v62 = vpop.xlane.xlu0 %2705 }
0x14ce   : > { %4858 = vrcp.f32 %v2706_v62 }
0x14d1   : > { %v2600_v6 = vpop.permute.xlu0 %2599 }
0x14d2   : > { %v2605_v19 = vsel %vm963_vm4, %v2600_v6, 0 }
0x14d3   : > { %4504 = vmatpush3.bf16.msra.mxu0 %v2605_v19 }
0x14d4   : > { %4515 = vmatprep.subr.bf16.mxu0 %v5288_v54 }
0x14d6   : > { %4506 = vmatmul.mubr.msk.bf16.vlgmr.msra.gmra.mrb[64].mxu0 %vm1030_vm7, %v2597_v45 }
0x14d7   : > { %4516 = vmatpush3.bf16.msra.mxu0 %v2716_v20  ;;  %4517 = vmatprep.mubr.msk.bf16.mxu0 %vm5289_vm3, %v5288_v54  ;;  %v3167_v20 = vsel %vm967_vm5, %v6234_v60, 0 }
0x14d8   : > { %v4859_v0 = vpop.eup %4858  ;;  %4533 = vmatprep.subr.bf16.mxu0 %v5288_v54 }
0x14d9   : > { %v2708_v21 = vmul.f32 %v4859_v0, %v4855_v16 }
0x14db   : > { %v2709_v10 = vpack.c.bf16 %v2708_v21, %v2708_v21 }
0x14de   : > { %4518 = vmatmul.mubr.msk.bf16.vlgmr.msra.gmra.mrb[68].mxu0 %vm1030_vm7, %v2709_v10 }
0x14df   : > { %4535 = vmatprep.mubr.msk.bf16.mxu0 %vm5289_vm3, %v5288_v54 }
0x14e0   : > { %4534 = vmatpush3.bf16.xpose.msra.mxu0 %v2855_v41 }
0x14e1   : > { %4539 = vmatprep.subr.bf16.mxu0 %v5288_v54 }
0x14e7   : > { %4536 = vmatmul.mubr.msk.bf16.vlgmr.msra.gmra.mrb[72].mxu0 %vm967_vm5, %v6184_v1 }
0x14e8   : > { %4541 = vmatprep.mubr.msk.bf16.mxu0 %vm5289_vm3, %v5288_v54 }
0x15a9   : > { %v2641_v5 = vpop.f32.mrb[64].mxu0 }
0x15aa   : > { %v4507_v24 = vpop.f32.mrb[65].mxu0  ;;  %v2647_v51 = vpack.c.bf16 %v2641_v5, %v2641_v5 }
0x15ab   : > { %v2644_v27 = vpop.f32.mrb[66].mxu0 }
0x15ac   : > { %v4508_v28 = vpop.f32.mrb[67].mxu0 }
0x15b1   : > { %v2752_v29 = vpop.f32.mrb[68].mxu0 }
0x15b2   : > { %v2758_v30 = vpack.c.bf16 %v2752_v29, %v2752_v29  ;;  %v4519_v35 = vpop.f32.mrb[69].mxu0 }
0x15b3   : > { %v2755_v38 = vpop.f32.mrb[70].mxu0 }
0x15b4   : > { %v4520_v39 = vpop.f32.mrb[71].mxu0  ;;  %4524 = vmatmul.mubr.msk.bf16.vlgmr.msra.gmra.mrb[56].mxu1 %vm967_vm5, %v2758_v30  ;;  %v6261_v30 = vld [vmem:[%s5753_s15] sm:$0xff]  }
0x15b5   : > { %4528 = vmatpush3.bf16.msra.mxu1 %v5942_v31  ;;  %4529 = vmatprep.mubr.msk.bf16.mxu1 %vm5289_vm3, %v5288_v54  ;;  %v2961_v31 = vpop.permute.xlu1 %2960 }
0x15b6   : > { %4545 = vmatprep.subr.bf16.mxu1 %v5288_v54 }
0x15ba   : > { %v2891_v40 = vpop.f32.mrb[72].mxu0 }
0x15bb   : > { %v4537_v44 = vpop.f32.mrb[73].mxu0  ;;  %v2897_v46 = vsel %vm1014_vm6, %v2891_v40, -inf }
0x15bc   : > { %2898 = vmax.xlane.f32.xlu0 %v2897_v46  ;;  %v2894_v47 = vpop.f32.mrb[74].mxu0 }
0x15bd   : > { %v4538_v50 = vpop.f32.mrb[75].mxu0 }
0x15c0   : > { %4530 = vmatmul.mubr.msk.bf16.vlgmr.msra.gmra.mrb[56].mxu1 %vm967_vm5, %v2647_v51  ;;  %v4893_v51 = vld [vmem:[%s5753_s15 + $0x8] sm:$0xff]  }
0x15c1   : > { %4546 = vmatpush3.bf16.xpose.msra.mxu1 %v2968_v52  ;;  %4547 = vmatprep.mubr.msk.bf16.mxu1 %vm5289_vm3, %v5288_v54 }
0x15c2   : > { %4557 = vmatprep.subr.bf16.mxu1 %v5288_v54 }
0x15c8   : > { %4548 = vmatmul.mubr.msk.bf16.vlgmr.msra.gmra.mrb[60].mxu1 %vm967_vm5, %v2961_v31 }
0x15c9   : > { %4558 = vmatpush3.bf16.msra.mxu1 %v5937_v22  ;;  %4559 = vmatprep.mubr.msk.bf16.mxu1 %vm5289_vm3, %v5288_v54 }
0x15ca   : > { %4563 = vmatprep.subr.bf16.mxu1 %v5288_v54 }
0x1649   : > { %v2899_v55 = vpop.xlane.xlu0 %2898 }
0x164a   : > { %v2900_v33 = vsub.f32 %v2891_v40, %v2899_v55 }
0x164c   : > { %v2901_v56 = vmul.f32 1.442695, %v2900_v33 }
0x164e   : > { %4860 = vpow2.f32 %v2901_v56 }
0x1658   : > { %v4861_v57 = vpop.eup %4860 }
0x1659   : > { %v2903_v58 = vsel %vm1014_vm6, %v4861_v57, 0.0 }
0x165a   : > { %2904 = vadd.xlane.f32.xlu0 %v2903_v58 }
0x1693   : > { %v2839_v26 = vpop.f32.mrb[56].mxu1 }
0x1694   : > { %v3475_v59 = vrot.slane %v2839_v26, 4  ;;  %v4531_v61 = vpop.f32.mrb[57].mxu1 }
0x1695   : > { %v2842_v34 = vpop.f32.mrb[58].mxu1 }
0x1696   : > { %v6227_v22 = vsel %vm963_vm4, %v6171_v63, %v3475_v59  ;;  %v4532_v2 = vpop.f32.mrb[59].mxu1  ;;  %v3162_v63 = vrot.slane %v6184_v1, 2 }
0x169b   : > { %v3004_v3 = vpop.f32.mrb[60].mxu1 }
0x169c   : > { %v4549_v4 = vpop.f32.mrb[61].mxu1  ;;  %v3010_v8 = vsel %vm1014_vm6, %v3004_v3, -inf }
0x169d   : > { %3011 = vmax.xlane.f32.xlu1 %v3010_v8  ;;  %v3007_v53 = vpop.f32.mrb[62].mxu1  ;;  %v4894_v8 = vld [vmem:[#allocation2] sm:$0xff] }
0x169e   : > { %v4550_v9 = vpop.f32.mrb[63].mxu1  ;;  %v6285_v53 = vadd.f32 %v4894_v8, %v6017_v43  ;;  %v4895_v43 = vld [vmem:[#allocation2 + $0x8] sm:$0xff] }
0x16a0   : > { %v3488_v9 = vsel %vm623_vm2, %v6285_v53, 0.0 }
0x16ae   : > { %3022 = vrot.lane.b32.xlu1 %v6178_v17, %s5292_s14 }
0x16b2   : > { %3273 = vrot.lane.b32.xlu1 %v6234_v60, %s5290_s20 }
0x16b6   : > { %3271 = vrot.lane.b32.xlu1 %v3162_v63, %s5290_s20 }
0x16e7   : > { %v2905_v42 = vpop.xlane.xlu0 %2904 }
0x172a   : > { %v3012_v12 = vpop.xlane.xlu1 %3011 }
0x172b   : > { %v3013_v25 = vsub.f32 %v3004_v3, %v3012_v12 }
0x172d   : > { %v3014_v14 = vmul.f32 1.442695, %v3013_v25 }
0x172e   : > { %v3023_v15 = vpop.permute.xlu1 %3022 }
0x172f   : > { %4862 = vpow2.f32 %v3014_v14  ;;  %v3028_v19 = vsel %vm963_vm4, %v3023_v15, 0 }
0x1730   : > { %4864 = vrcp.f32 %v2905_v42 }
0x1732   : > { %v3274_v44 = vpop.permute.xlu1 %3273 }
0x1733   : > { %v3279_v49 = vsel %vm967_vm5, %v3274_v44, 0 }
0x1736   : > { %v3272_v50 = vpop.permute.xlu1 %3271 }
0x1739   : > { %v4863_v23 = vpop.eup %4862 }
0x173a   : > { %v3016_v16 = vsel %vm1014_vm6, %v4863_v23, 0.0  ;;  %v4865_v18 = vpop.eup %4864 }
0x173b   : > { %3017 = vadd.xlane.f32.xlu0 %v3016_v16  ;;  %v2907_v32 = vmul.f32 %v4865_v18, %v4861_v57 }
0x173d   : > { %v2908_v6 = vpack.c.bf16 %v2907_v32, %v2907_v32 }
0x1751   : > { %2910 = vrot.lane.b32.xlu0 %v6178_v17, %s5291_s27 }
0x17c8   : > { %v3018_v36 = vpop.xlane.xlu0 %3017 }
0x17c9   : > { %4866 = vrcp.f32 %v3018_v36  ;;  %v6293_v36 = vadd.f32 %v4895_v43, %v6122_v7  ;;  %v3542_v43 = vsub.s32 4, %v5832_v13 }
0x17cc   : > { %v2911_v1 = vpop.permute.xlu0 %2910 }
0x17cd   : > { %v2916_v62 = vsel %vm963_vm4, %v2911_v1, 0  ;;  %v3491_v1 = vsel %vm623_vm2, %v6293_v36, 0.0 }
0x17ce   : > { %4540 = vmatpush3.bf16.msra.mxu0 %v2916_v62  ;;  %v4896_v62 = vld [vmem:[#allocation2 + $0x10] sm:$0xff] }
0x17cf   : > { %4551 = vmatprep.subr.bf16.mxu0 %v5288_v54  ;;  %v6301_v15 = vadd.f32 %v4896_v62, %v6227_v22 }
0x17d1   : > { %4542 = vmatmul.mubr.msk.bf16.vlgmr.msra.gmra.mrb[76].mxu0 %vm1030_vm7, %v2908_v6 }
0x17d2   : > { %4552 = vmatpush3.bf16.msra.mxu0 %v3028_v19  ;;  %4553 = vmatprep.mubr.msk.bf16.mxu0 %vm5289_vm3, %v5288_v54 }
0x17d3   : > { %v4867_v17 = vpop.eup %4866  ;;  %4569 = vmatprep.subr.bf16.mxu0 %v5288_v54 }
0x17d4   : > { %v3020_v11 = vmul.f32 %v4867_v17, %v4863_v23 }
0x17d6   : > { %v3021_v45 = vpack.c.bf16 %v3020_v11, %v3020_v11 }
0x17d9   : > { %4554 = vmatmul.mubr.msk.bf16.vlgmr.msra.gmra.mrb[80].mxu0 %vm1030_vm7, %v3021_v45 }
0x17da   : > { %4571 = vmatprep.mubr.msk.bf16.mxu0 %vm5289_vm3, %v5288_v54 }
0x17db   : > { %4570 = vmatpush3.bf16.xpose.msra.mxu0 %v3167_v20 }
0x17dc   : > { %4575 = vmatprep.subr.bf16.mxu0 %v5288_v54 }
0x17e2   : > { %4572 = vmatmul.mubr.msk.bf16.vlgmr.msra.gmra.mrb[84].mxu0 %vm967_vm5, %v3162_v63 }
0x17e3   : > { %4577 = vmatprep.mubr.msk.bf16.mxu0 %vm5289_vm3, %v5288_v54 }
0x18a4   : > { %v2952_v0 = vpop.f32.mrb[76].mxu0 }
0x18a5   : > { %v4543_v21 = vpop.f32.mrb[77].mxu0  ;;  %v2958_v47 = vpack.c.bf16 %v2952_v0, %v2952_v0 }
0x18a6   : > { %v2955_v10 = vpop.f32.mrb[78].mxu0 }
0x18a7   : > { %v4544_v41 = vpop.f32.mrb[79].mxu0 }
0x18ac   : > { %v3064_v5 = vpop.f32.mrb[80].mxu0 }
0x18ad   : > { %v3070_v24 = vpack.c.bf16 %v3064_v5, %v3064_v5  ;;  %v4555_v27 = vpop.f32.mrb[81].mxu0 }
0x18ae   : > { %v3067_v28 = vpop.f32.mrb[82].mxu0 }
0x18af   : > { %v4556_v29 = vpop.f32.mrb[83].mxu0  ;;  %4560 = vmatmul.mubr.msk.bf16.vlgmr.msra.gmra.mrb[64].mxu1 %vm967_vm5, %v3070_v24 }
0x18b0   : > { %4564 = vmatpush3.bf16.msra.mxu1 %v6261_v30  ;;  %4565 = vmatprep.mubr.msk.bf16.mxu1 %vm5289_vm3, %v5288_v54 }
0x18b1   : > { %4581 = vmatprep.subr.bf16.mxu1 %v5288_v54 }
0x18b5   : > { %v3203_v35 = vpop.f32.mrb[84].mxu0 }
0x18b6   : > { %v4573_v38 = vpop.f32.mrb[85].mxu0  ;;  %v3209_v39 = vsel %vm1014_vm6, %v3203_v35, -inf }
0x18b7   : > { %3210 = vmax.xlane.f32.xlu0 %v3209_v39  ;;  %v3206_v40 = vpop.f32.mrb[86].mxu0 }
0x18b8   : > { %v4574_v46 = vpop.f32.mrb[87].mxu0 }
0x18bb   : > { %4566 = vmatmul.mubr.msk.bf16.vlgmr.msra.gmra.mrb[64].mxu1 %vm967_vm5, %v2958_v47 }
0x18bc   : > { %4582 = vmatpush3.bf16.xpose.msra.mxu1 %v3279_v49  ;;  %4583 = vmatprep.mubr.msk.bf16.mxu1 %vm5289_vm3, %v5288_v54 }
0x18bd   : > { %4593 = vmatprep.subr.bf16.mxu1 %v5288_v54 }
0x18c3   : > { %4584 = vmatmul.mubr.msk.bf16.vlgmr.msra.gmra.mrb[68].mxu1 %vm967_vm5, %v3272_v50 }
0x18c4   : > { %4594 = vmatpush3.bf16.msra.mxu1 %v4893_v51  ;;  %4595 = vmatprep.mubr.msk.bf16.mxu1 %vm5289_vm3, %v5288_v54 }
0x18c5   : > { %4599 = vmatprep.subr.bf16.mxu1 %v5288_v54 }
0x1944   : > { %v3211_v52 = vpop.xlane.xlu0 %3210 }
0x1945   : > { %v3212_v31 = vsub.f32 %v3203_v35, %v3211_v52 }
0x1947   : > { %v3213_v55 = vmul.f32 1.442695, %v3212_v31 }
0x1949   : > { %4868 = vpow2.f32 %v3213_v55 }
0x1953   : > { %v4869_v33 = vpop.eup %4868 }
0x1954   : > { %v3215_v56 = vsel %vm1014_vm6, %v4869_v33, 0.0 }
0x1955   : > { %3216 = vadd.xlane.f32.xlu0 %v3215_v56 }
0x198e   : > { %v6279_v57 = vpop.f32.mrb[64].mxu1 }
0x198f   : > { %v4567_v58 = vpop.f32.mrb[65].mxu1 }
0x1990   : > { %v3154_v26 = vpop.f32.mrb[66].mxu1 }
0x1991   : > { %v4568_v59 = vpop.f32.mrb[67].mxu1 }
0x1996   : > { %v3315_v61 = vpop.f32.mrb[68].mxu1 }
0x1997   : > { %v4585_v34 = vpop.f32.mrb[69].mxu1  ;;  %v3321_v2 = vsel %vm1014_vm6, %v3315_v61, -inf }
0x1998   : > { %3322 = vmax.xlane.f32.xlu1 %v3321_v2  ;;  %v3318_v3 = vpop.f32.mrb[70].mxu1  ;;  %v4897_v2 = vld [vmem:[#allocation2 + $0x18] sm:$0xff] }
0x1999   : > { %v4586_v4 = vpop.f32.mrb[71].mxu1 }
0x19a9   : > { %3333 = vrot.lane.b32.xlu1 %v6234_v60, %s5292_s14 }
0x19cd   : > { %3489 = vadd.xlane.f32.xlu1 %v3488_v9 }
0x19e2   : > { %v3217_v19 = vpop.xlane.xlu0 %3216 }
0x1a25   : > { %v3323_v63 = vpop.xlane.xlu1 %3322 }
0x1a26   : > { %v3324_v12 = vsub.f32 %v3315_v61, %v3323_v63 }
0x1a28   : > { %v3325_v25 = vmul.f32 1.442695, %v3324_v12 }
0x1a29   : > { %v3334_v16 = vpop.permute.xlu1 %3333 }
0x1a2a   : > { %4870 = vpow2.f32 %v3325_v25  ;;  %v3339_v21 = vsel %vm963_vm4, %v3334_v16, 0 }
0x1a2b   : > { %4872 = vrcp.f32 %v3217_v19 }
0x1a34   : > { %v4871_v14 = vpop.eup %4870 }
0x1a35   : > { %v3327_v23 = vsel %vm1014_vm6, %v4871_v14, 0.0  ;;  %v4873_v17 = vpop.eup %4872 }
0x1a36   : > { %3328 = vadd.xlane.f32.xlu0 %v3327_v23  ;;  %v3219_v45 = vmul.f32 %v4873_v17, %v4869_v33 }
0x1a38   : > { %v3220_v0 = vpack.c.bf16 %v3219_v45, %v3219_v45 }
0x1a4c   : > { %3222 = vrot.lane.b32.xlu0 %v6234_v60, %s5291_s27  ;;  %v3494_v60 = vsel %vm623_vm2, %v6301_v15, 0.0 }
0x1a5a   : > { %v3490_v42 = vpop.xlane.xlu1 %3489 }
0x1a5b   : > { %v3500_v18 = vmul.f32 0.03125, %v3490_v42 }
0x1a5d   : > { %v6296_v32 = vsub.f32 %v6285_v53, %v3500_v18 }
0x1a5f   : > { %v3508_v6 = vmul.f32 %v6296_v32, %v6296_v32 }
0x1a61   : > { %v3512_v7 = vsel %vm623_vm2, %v3508_v6, 0.0 }
0x1a6b   : > { %3492 = vadd.xlane.f32.xlu0 %v3491_v1 }
0x1a6f   : > { %3495 = vadd.xlane.f32.xlu0 %v3494_v60  ;;  %v4898_v60 = vld [vmem:[%s5734_s30] sm:$0x3f] }
0x1a70   : > { %v3543_v6 = vrot.slane %v4898_v60, %v3542_v43 }
0x1a73   : > { %3513 = vadd.xlane.f32.xlu0 %v3512_v7  ;;  %v3550_v7 = vsub.s32 5, %v5832_v13 }
0x1a75   : > { %v3551_v45 = vrot.slane %v4898_v60, %v3550_v7 }
0x1ac3   : > { %v3329_v11 = vpop.xlane.xlu0 %3328 }
0x1ac4   : > { %4874 = vrcp.f32 %v3329_v11 }
0x1ac7   : > { %v3223_v20 = vpop.permute.xlu0 %3222 }
0x1ac8   : > { %v3228_v22 = vsel %vm963_vm4, %v3223_v20, 0 }
0x1ac9   : > { %4576 = vmatpush3.bf16.msra.mxu0 %v3228_v22 }
0x1aca   : > { %4587 = vmatprep.subr.bf16.mxu0 %v5288_v54 }
0x1acc   : > { %4578 = vmatmul.mubr.msk.bf16.vlgmr.msra.gmra.mrb[88].mxu0 %vm1030_vm7, %v3220_v0 }
0x1acd   : > { %4588 = vmatpush3.bf16.msra.mxu0 %v3339_v21  ;;  %4589 = vmatprep.mubr.msk.bf16.mxu0 %vm5289_vm3, %v5288_v54 }
0x1ace   : > { %v4875_v10 = vpop.eup %4874 }
0x1acf   : > { %v3331_v41 = vmul.f32 %v4875_v10, %v4871_v14  ;;  %v4790_v10 = vld [vmem:[%s528_s9] sm:$0xff]  }
0x1ad0   : > { %4605 = vmatprep.subr.bf16.mxu0 %v4790_v10 }
0x1ad1   : > { %v3332_v5 = vpack.c.bf16 %v3331_v41, %v3331_v41  ;;  %v4791_v41 = vld [vmem:[%s528_s9 + $0x8] sm:$0xff]  }
0x1ad4   : > { %4590 = vmatmul.mubr.msk.bf16.vlgmr.msra.gmra.mrb[92].mxu0 %vm1030_vm7, %v3332_v5 }
0x1ad5   : > { %4606 = vmatpush3.bf16.msra.mxu0 %v4790_v10 }
0x1ad6   : > { %4607 = vmatprep.subr.bf16.mxu0 %v4791_v41 }
0x1ad9   : > { %4608 = vmatpush3.bf16.msra.mxu0 %v4791_v41 }
0x1af8   : > { %v3493_v24 = vpop.xlane.xlu0 %3492 }
0x1af9   : > { %v3501_v55 = vmul.f32 0.03125, %v3493_v24 }
0x1afb   : > { %v3505_v26 = vsub.f32 %v6293_v36, %v3501_v55  ;;  %v4794_v55 = vld [vmem:[%s5760_s19 + $0x10] sm:$0xff]  }
0x1afc   : > { %v3496_v27 = vpop.xlane.xlu0 %3495 }
0x1afd   : > { %v3502_v28 = vmul.f32 0.03125, %v3496_v27 }
0x1aff   : > { %v6316_v29 = vsub.f32 %v6301_v15, %v3502_v28 }
0x1b00   : > { %v3514_v8 = vpop.xlane.xlu0 %3513 }
0x1b01   : > { %v3510_v35 = vmul.f32 %v6316_v29, %v6316_v29  ;;  %v3524_v9 = vmul.f32 0.03125, %v3514_v8 }
0x1b03   : > { %v3518_v38 = vsel %vm623_vm2, %v3510_v35, 0.0  ;;  %v3528_v63 = vadd.f32 1e-05, %v3524_v9 }
0x1b04   : > { %3519 = vadd.xlane.f32.xlu0 %v3518_v38 }
0x1b05   : > { %4876 = vrsqrt.f32 %v3528_v63 }
0x1b0f   : > { %v4877_v1 = vpop.eup %4876 }
0x1b10   : > { %v3536_v62 = vmul.f32 %v4877_v1, %v6296_v32 }
0x1b12   : > { %v3544_v11 = vmul.f32 %v3543_v6, %v3536_v62 }
0x1b14   : > { %v3552_v22 = vadd.f32 %v3551_v45, %v3544_v11 }
0x1b91   : > { %v3520_v32 = vpop.xlane.xlu0 %3519 }
0x1b92   : > { %v3526_v5 = vmul.f32 0.03125, %v3520_v32 }
0x1b94   : > { %v3530_v24 = vadd.f32 1e-05, %v3526_v5 }
0x1b9f   : > { %v3264_v39 = vpop.f32.mrb[88].mxu0 }
0x1ba0   : > { %v4579_v40 = vpop.f32.mrb[89].mxu0  ;;  %v3270_v31 = vpack.c.bf16 %v3264_v39, %v3264_v39 }
0x1ba1   : > { %v3267_v44 = vpop.f32.mrb[90].mxu0 }
0x1ba2   : > { %v4580_v46 = vpop.f32.mrb[91].mxu0 }
0x1ba7   : > { %v3375_v47 = vpop.f32.mrb[92].mxu0 }
0x1ba8   : > { %v3381_v49 = vpack.c.bf16 %v3375_v47, %v3375_v47  ;;  %v4591_v50 = vpop.f32.mrb[93].mxu0 }
0x1ba9   : > { %v3378_v51 = vpop.f32.mrb[94].mxu0 }
0x1baa   : > { %v4592_v52 = vpop.f32.mrb[95].mxu0  ;;  %4596 = vmatmul.mubr.msk.bf16.vlgmr.msra.gmra.mrb[72].mxu1 %vm967_vm5, %v3381_v49 }
0x1bab   : > { %4600 = vmatpush3.bf16.msra.mxu1 %v6261_v30  ;;  %4601 = vmatprep.mubr.msk.bf16.mxu1 %vm5289_vm3, %v5288_v54  ;;  %v3509_v30 = vmul.f32 %v3505_v26, %v3505_v26  ;;  %v4792_v52 = vld [vmem:[%s5760_s19] sm:$0xff]  }
0x1bac   : > { %4613 = vmatprep.subr.bf16.mxu0 %v4792_v52 }
0x1bad   : > { %v3515_v4 = vsel %vm623_vm2, %v3509_v30, 0.0 }
0x1bb6   : > { %4602 = vmatmul.mubr.msk.bf16.vlgmr.msra.gmra.mrb[72].mxu1 %vm967_vm5, %v3270_v31  ;;  %v4793_v31 = vld [vmem:[%s5760_s19 + $0x8] sm:$0xff]  }
0x1c89   : > { %v3462_v33 = vpop.f32.mrb[72].mxu1 }
0x1c8a   : > { %v3478_v56 = vrot.slane %v3462_v33, 4  ;;  %v4603_v58 = vpop.f32.mrb[73].mxu1 }
0x1c8b   : > { %v3465_v59 = vpop.f32.mrb[74].mxu1 }
0x1c8c   : > { %v3483_v61 = vsel %vm963_vm4, %v6279_v57, %v3478_v56  ;;  %v4604_v34 = vpop.f32.mrb[75].mxu1 }
0x1c8d   : > { %v6329_v3 = vadd.f32 %v4897_v2, %v3483_v61 }
0x1c8f   : > { %v3497_v54 = vsel %vm623_vm2, %v6329_v3, 0.0 }
0x1c90   : > { %3498 = vadd.xlane.f32.xlu1 %v3497_v54 }
0x1c94   : > { %3516 = vadd.xlane.f32.xlu1 %v3515_v4 }
0x1d1d   : > { %v3499_v12 = vpop.xlane.xlu1 %3498 }
0x1d1e   : > { %v3503_v25 = vmul.f32 0.03125, %v3499_v12 }
0x1d20   : > { %v3507_v57 = vsub.f32 %v6329_v3, %v3503_v25 }
0x1d21   : > { %v3517_v14 = vpop.xlane.xlu1 %3516 }
0x1d22   : > { %v3525_v23 = vmul.f32 0.03125, %v3517_v14  ;;  %v3511_v16 = vmul.f32 %v3507_v57, %v3507_v57 }
0x1d24   : > { %v3529_v42 = vadd.f32 1e-05, %v3525_v23  ;;  %v3521_v18 = vsel %vm623_vm2, %v3511_v16, 0.0 }
0x1d25   : > { %3522 = vadd.xlane.f32.xlu1 %v3521_v18 }
0x1d26   : > { %4878 = vrsqrt.f32 %v3529_v42 }
0x1d27   : > { %4880 = vrsqrt.f32 %v3530_v24 }
0x1d30   : > { %v4879_v19 = vpop.eup %4878 }
0x1d31   : > { %v3537_v17 = vmul.f32 %v4879_v19, %v3505_v26  ;;  %v4881_v38 = vpop.eup %4880 }
0x1d32   : > { %v3538_v39 = vmul.f32 %v4881_v38, %v6316_v29  ;;  %v4795_v29 = vld [vmem:[%s5760_s19 + $0x18] sm:$0xff]  }
0x1d33   : > { %v3545_v20 = vmul.f32 %v3543_v6, %v3537_v17 }
0x1d34   : > { %v3546_v44 = vmul.f32 %v3543_v6, %v3538_v39 }
0x1d35   : > { %v3553_v0 = vadd.f32 %v3551_v45, %v3545_v20 }
0x1d36   : > { %v3554_v49 = vadd.f32 %v3551_v45, %v3546_v44 }
0x1d37   : > { %v3556_v21 = vpack.c.bf16 %v3553_v0, %v3552_v22 }
0x1d39   : > { %4609 = vmatprep.mubr.msk.bf16.mxu0 %vm623_vm2, %v3556_v21 }
0x1db2   : > { %v3523_v27 = vpop.xlane.xlu1 %3522 }
0x1db3   : > { %v3527_v28 = vmul.f32 0.03125, %v3523_v27 }
0x1db5   : > { %v3531_v35 = vadd.f32 1e-05, %v3527_v28 }
0x1db7   : > { %4882 = vrsqrt.f32 %v3531_v35 }
0x1dc1   : > { %v4883_v40 = vpop.eup %4882 }
0x1dc2   : > { %v3539_v46 = vmul.f32 %v4883_v40, %v3507_v57 }
0x1dc4   : > { %v3547_v47 = vmul.f32 %v3543_v6, %v3539_v46 }
0x1dc6   : > { %v3555_v50 = vadd.f32 %v3551_v45, %v3547_v47 }
0x1dc8   : > { %v3557_v51 = vpack.c.bf16 %v3555_v50, %v3554_v49 }
0x1dca   : > { %4610 = vmatmul.mubr.msk.bf16.vlgmr.msra.gmra.mrb[96].mxu0 %vm623_vm2, %v3557_v51 }
0x1dcb   : > { %4614 = vmatpush3.bf16.msra.mxu0 %v4792_v52 }
0x1dcc   : > { %4615 = vmatprep.subr.bf16.mxu0 %v4793_v31 }
0x1dcf   : > { %4616 = vmatpush3.bf16.msra.mxu0 %v4793_v31 }
0x1dd0   : > { %4617 = vmatprep.subr.bf16.mxu0 %v4794_v55 }
0x1dd3   : > { %4618 = vmatpush3.bf16.msra.mxu0 %v4794_v55 }
0x1dd4   : > { %4619 = vmatprep.subr.bf16.mxu0 %v4795_v29 }
0x1dd7   : > { %4620 = vmatpush3.bf16.msra.mxu0 %v4795_v29 }
0x1e9d   : > { %v4611_v33 = vpop.f32.mrb[96].mxu0 }
0x1e9e   : > { %v3631_v56 = vmul.f32 %v4611_v33, %v4611_v33  ;;  %v3614_v58 = vpop.f32.mrb[97].mxu0 }
0x1e9f   : > { %v3629_v26 = vmul.f32 %v3614_v58, %v3614_v58  ;;  %v4612_v59 = vpop.f32.mrb[98].mxu0 }
0x1ea0   : > { %v3635_v61 = vmul.f32 %v4611_v33, %v3631_v56  ;;  %v3632_v34 = vmul.f32 %v4612_v59, %v4612_v59  ;;  %v3617_v2 = vpop.f32.mrb[99].mxu0 }
0x1ea1   : > { %v3633_v54 = vmul.f32 %v3629_v26, %v3614_v58  ;;  %v3630_v30 = vmul.f32 %v3617_v2, %v3617_v2 }
0x1ea2   : > { %v3639_v4 = vmul.f32 0.044715, %v3635_v61  ;;  %v3636_v8 = vmul.f32 %v4612_v59, %v3632_v34 }
0x1ea3   : > { %v3637_v9 = vmul.f32 0.044715, %v3633_v54  ;;  %v3634_v63 = vmul.f32 %v3630_v30, %v3617_v2 }
0x1ea4   : > { %v3643_v12 = vadd.f32 %v4611_v33, %v3639_v4  ;;  %v3640_v25 = vmul.f32 0.044715, %v3636_v8 }
0x1ea5   : > { %v3641_v57 = vadd.f32 %v3637_v9, %v3614_v58  ;;  %v3638_v14 = vmul.f32 0.044715, %v3634_v63 }
0x1ea6   : > { %v3647_v23 = vmul.f32 0.7978846, %v3643_v12  ;;  %v3644_v16 = vadd.f32 %v4612_v59, %v3640_v25 }
0x1ea7   : > { %v3645_v42 = vmul.f32 0.7978846, %v3641_v57  ;;  %v3642_v18 = vadd.f32 %v3638_v14, %v3617_v2 }
0x1ea8   : > { %4884 = vtanh.f32 %v3647_v23  ;;  %v3648_v43 = vmul.f32 0.7978846, %v3644_v16 }
0x1ea9   : > { %4886 = vtanh.f32 %v3645_v42  ;;  %v3646_v1 = vmul.f32 0.7978846, %v3642_v18 }
0x1eaa   : > { %4888 = vtanh.f32 %v3648_v43 }
0x1eab   : > { %4890 = vtanh.f32 %v3646_v1 }
0x1eb2   : > { %v4885_v62 = vpop.eup %4884 }
0x1eb3   : > { %v4887_v60 = vpop.eup %4886  ;;  %v3655_v6 = vadd.f32 1.0, %v4885_v62  ;;  %v3767_v62 = vld [vmem:[#allocation9] sm:$0x3] (!%p4156_p4) }
0x1eb4   : > { %v4889_v7 = vpop.eup %4888  ;;  %v3653_v19 = vadd.f32 1.0, %v4887_v60 }
0x1eb5   : > { %v4891_v17 = vpop.eup %4890  ;;  %v3659_v11 = vmul.f32 0.5, %v3655_v6  ;;  %v3656_v45 = vadd.f32 1.0, %v4889_v7  ;;  %v3823_v6 = vrot.slane (!%p4156_p4), %v3767_v62, %v679_v37 }
0x1eb6   : > { %v3657_v20 = vmul.f32 0.5, %v3653_v19  ;;  %v3654_v22 = vadd.f32 1.0, %v4891_v17  ;;  %v3831_v17 = vrot.slane (!%p4156_p4), %v3767_v62, %v687_v48 }
0x1eb7   : > { %v3660_v0 = vmul.f32 0.5, %v3656_v45  ;;  %v3663_v10 = vmul.f32 %v4611_v33, %v3659_v11 }
0x1eb8   : > { %v3658_v21 = vmul.f32 0.5, %v3654_v22  ;;  %v3661_v32 = vmul.f32 %v3657_v20, %v3614_v58 }
0x1eb9   : > { %v3664_v41 = vmul.f32 %v4612_v59, %v3660_v0 }
0x1eba   : > { %v3662_v5 = vmul.f32 %v3658_v21, %v3617_v2 }
0x1ebb   : > { %v3666_v24 = vpack.c.bf16 %v3664_v41, %v3663_v10 }
0x1ebc   : > { %v3665_v27 = vpack.c.bf16 %v3662_v5, %v3661_v32 }
0x1ebe   : > { %4621 = vmatprep.mubr.msk.bf16.mxu0 %vm3699_vm8, %v3665_v27 }
0x1ebf   : > { %4622 = vmatmul.mubr.msk.bf16.vlgmr.msra.gmra.mrb[100].mxu0 %vm3699_vm8, %v3666_v24 }
0x1f92   : > { %v4623_v28 = vpop.f32.mrb[100].mxu0  ;;  %3766 = sbr.rel (%p4156_p4) target bundleno = 8408 (0x20d8), region = 100 }
0x1f93   : > { %v3757_v35 = vadd.f32 %v4623_v28, %v6301_v15  ;;  %v3740_v38 = vpop.f32.mrb[101].mxu0 }
0x1f94   : > { %v3755_v39 = vadd.f32 %v3740_v38, %v6285_v53  ;;  %v4624_v40 = vpop.f32.mrb[102].mxu0 }
0x1f95   : > { %3761 = vst.msk [vmem:[#allocation2 + $0x10] sm:$0xff] %vm623_vm2, %v3757_v35  ;;  %v3758_v44 = vadd.f32 %v4624_v40, %v6329_v3  ;;  %v3743_v46 = vpop.f32.mrb[103].mxu0  ;;  %v3774_v53 = vsel (!%p4156_p4), %vm623_vm2, %v3757_v35, 0.0 }
0x1f96   : > { %3759 = vst.msk [vmem:[#allocation2] sm:$0xff] %vm623_vm2, %v3755_v39  ;;  %v3756_v47 = vadd.f32 %v3743_v46, %v6293_v36  ;;  %v3768_v15 = vsel (!%p4156_p4), %vm623_vm2, %v3755_v39, 0.0  ;;  %3775 = vadd.xlane.f32.xlu1 (!%p4156_p4), %v3774_v53 }
0x1f97   : > { %3762 = vst.msk [vmem:[#allocation2 + $0x18] sm:$0xff] %vm623_vm2, %v3758_v44  ;;  %3769 = vadd.xlane.f32.xlu0 (!%p4156_p4), %v3768_v15  ;;  %v3777_v49 = vsel (!%p4156_p4), %vm623_vm2, %v3758_v44, 0.0 }
0x1f98   : > { %3760 = vst.msk [vmem:[#allocation2 + $0x8] sm:$0xff] %vm623_vm2, %v3756_v47  ;;  %v3771_v3 = vsel (!%p4156_p4), %vm623_vm2, %v3756_v47, 0.0 }
0x1f9a   : > { %3778 = vadd.xlane.f32.xlu1 %v3777_v49 }
0x1f9b   : > { %3772 = vadd.xlane.f32.xlu0 %v3771_v3 }
0x2023   : > { %v3776_v50 = vpop.xlane.xlu1 %3775 }
0x2024   : > { %v3770_v36 = vpop.xlane.xlu0 %3769  ;;  %v3782_v52 = vmul.f32 0.03125, %v3776_v50 }
0x2025   : > { %v3780_v51 = vmul.f32 0.03125, %v3770_v36 }
0x2026   : > { %v3786_v55 = vsub.f32 %v3757_v35, %v3782_v52 }
0x2027   : > { %v3784_v31 = vsub.f32 %v3755_v39, %v3780_v51  ;;  %v3779_v33 = vpop.xlane.xlu1 %3778 }
0x2028   : > { %v3773_v29 = vpop.xlane.xlu0 %3772  ;;  %v3783_v58 = vmul.f32 0.03125, %v3779_v33  ;;  %v3790_v59 = vmul.f32 %v3786_v55, %v3786_v55 }
0x2029   : > { %v3781_v56 = vmul.f32 0.03125, %v3773_v29  ;;  %v3788_v26 = vmul.f32 %v3784_v31, %v3784_v31 }
0x202a   : > { %v3787_v34 = vsub.f32 %v3758_v44, %v3783_v58  ;;  %v3798_v54 = vsel %vm623_vm2, %v3790_v59, 0.0 }
0x202b   : > { %v3785_v61 = vsub.f32 %v3756_v47, %v3781_v56  ;;  %v3792_v2 = vsel %vm623_vm2, %v3788_v26, 0.0 }
0x202c   : > { %3793 = vadd.xlane.f32.xlu0 %v3792_v2  ;;  %v3791_v4 = vmul.f32 %v3787_v34, %v3787_v34 }
0x202d   : > { %v3789_v30 = vmul.f32 %v3785_v61, %v3785_v61 }
0x202e   : > { %v3801_v9 = vsel %vm623_vm2, %v3791_v4, 0.0 }
0x202f   : > { %v3795_v8 = vsel %vm623_vm2, %v3789_v30, 0.0 }
0x2030   : > { %3799 = vadd.xlane.f32.xlu0 %v3798_v54  ;;  %3796 = vadd.xlane.f32.xlu1 %v3795_v8 }
0x2034   : > { %3802 = vadd.xlane.f32.xlu1 %v3801_v9 }
0x20b9   : > { %v3794_v63 = vpop.xlane.xlu0 %3793 }
0x20ba   : > { %v3804_v12 = vmul.f32 0.03125, %v3794_v63 }
0x20bc   : > { %v3808_v25 = vadd.f32 1e-05, %v3804_v12 }
0x20bd   : > { %v3797_v57 = vpop.xlane.xlu1 %3796  ;;  %v3800_v14 = vpop.xlane.xlu0 %3799 }
0x20be   : > { %4899 = vrsqrt.f32 %v3808_v25  ;;  %v3805_v23 = vmul.f32 0.03125, %v3797_v57  ;;  %v3806_v16 = vmul.f32 0.03125, %v3800_v14 }
0x20c0   : > { %v3809_v42 = vadd.f32 1e-05, %v3805_v23  ;;  %v3810_v18 = vadd.f32 1e-05, %v3806_v16 }
0x20c1   : > { %v3803_v43 = vpop.xlane.xlu1 %3802 }
0x20c2   : > { %4901 = vrsqrt.f32 %v3809_v42  ;;  %v3807_v1 = vmul.f32 0.03125, %v3803_v43 }
0x20c3   : > { %4903 = vrsqrt.f32 %v3810_v18 }
0x20c4   : > { %v3811_v60 = vadd.f32 1e-05, %v3807_v1 }
0x20c6   : > { %4905 = vrsqrt.f32 %v3811_v60 }
0x20c8   : > { %v4900_v7 = vpop.eup %4899 }
0x20c9   : > { %v3816_v19 = vmul.f32 %v4900_v7, %v3784_v31 }
0x20cb   : > { %v3824_v11 = vmul.f32 %v3823_v6, %v3816_v19 }
0x20cc   : > { %v4902_v45 = vpop.eup %4901 }
0x20cd   : > { %v4904_v20 = vpop.eup %4903  ;;  %v3832_v22 = vadd.f32 %v3831_v17, %v3824_v11  ;;  %v3817_v0 = vmul.f32 %v4902_v45, %v3785_v61 }
0x20ce   : > { %v3818_v21 = vmul.f32 %v4904_v20, %v3786_v55 }
0x20cf   : > { %3836 = vst.msk [vmem:[#allocation18] sm:$0xff] %vm623_vm2, %v3832_v22  ;;  %v3825_v10 = vmul.f32 %v3823_v6, %v3817_v0 }
0x20d0   : > { %v4906_v41 = vpop.eup %4905  ;;  %v3826_v32 = vmul.f32 %v3823_v6, %v3818_v21 }
0x20d1   : > { %v3833_v5 = vadd.f32 %v3831_v17, %v3825_v10  ;;  %v3819_v24 = vmul.f32 %v4906_v41, %v3787_v34 }
0x20d2   : > { %v3834_v27 = vadd.f32 %v3831_v17, %v3826_v32 }
0x20d3   : > { %3837 = vst.msk [vmem:[#allocation18 + $0x8] sm:$0xff] %vm623_vm2, %v3833_v5  ;;  %v3827_v37 = vmul.f32 %v3823_v6, %v3819_v24 }
0x20d4   : > { %3838 = vst.msk [vmem:[#allocation18 + $0x10] sm:$0xff] %vm623_vm2, %v3834_v27 }
0x20d5   : > { %v3835_v13 = vadd.f32 %v3831_v17, %v3827_v37 }
0x20d7   : > { %3839 = vst.msk [vmem:[#allocation18 + $0x18] sm:$0xff] %vm623_vm2, %v3835_v13 }
0x20d8 PF: > { %s6495_s1 = sld [smem:[#allocation30_spill]]  ;;  %s5293_s22 = smov [#allocation18]  }
0x20d9   : > { %s3849_s28 = sshll.u32 %s5293_s22, 4  ;;  %s3850_s28 = int_to_ptr.vmem [resolvable:$true] %s3849_s28 }
0x20da   : > { %s5171_s26 = scalar_lea.vmem %s3850_s28, 512  ;;  %p5178_p7 = scmp.lt.s32.totalorder %s3850_s28, %s3850_s28 }
0x20db   : > { %p5172_p12 = scmp.ne.s32.totalorder %s3850_s28, %s5171_s26  ;;  %p5179_p6 = scmp.lt.s32.totalorder %s5171_s26, %s5171_s26 }
0x20dd   : > { %p5180_p13 = por %p5179_p6, %p5178_p7 }
0x20de   : > { %p4721_p10 = scmp.eq.s32.totalorder %s6495_s1, 1 }
0x20e0   : > { %p5173_p5 = pnand %p5172_p12, %p4721_p10 }
0x20e2   : > { %p5174_p2 = pneg %p5173_p5 }
0x20e4   : > { %p5181_p8 = pnand %p5180_p13, %p5174_p2 }
0x20e6   : > { %5184 = shalt.err (!%p5181_p8)
}
0x20e7   : > { %s6496_s10 = sld [smem:[#allocation38_spill]] }
0x20ed   : > { %s6497_s21 = smov %s6496_s10  ;;  %s5185_s30 = scalar_lea.hbm %s6496_s10, 512 }
0x20ee   : > { %p5186_p11 = scmp.ne.s32.totalorder %s6497_s21, %s5185_s30  ;;  %p5191_p0 = scmp.lt.u32.totalorder %s5185_s30, %s6497_s21 }
0x20f0   : > { %p5187_p9 = pnand %p5186_p11, %p4721_p10 }
0x20f2   : > { %p5188_p1 = pneg %p5187_p9 }
0x20f4   : > { %p5193_p3 = pnand %p5191_p0, %p5188_p1 }
0x20f6   : > { %5196 = shalt.err (!%p5193_p3)
}
0x20f7   : > { %s5294_s15 = smov 128   ;;  %s5295_s18 = smov 8  }
0x20f8   : > { %4682 = dma.vmem_to_hbm [thread:$0]  (%p4721_p10), %s3850_s28, 512, %s6497_s21, [#allocation5], %s5294_s15, %s5294_s15, %s5295_s18  }
0x20f9   : > { %5250 = dma.done.wait (%p4721_p10), [#allocation5], 512  }
0x20fa   : > { %5252 = vsyncadd (%p4721_p10), [#allocation5], 4294966784 }
0x20fb PF: > { %s6498_s19 = sld [smem:[#allocation29_spill]]  ;;  %s6499_s30 = sld [smem:[#allocation27_spill]] }
0x20fc   : > { %s6500_s29 = sld [smem:[#allocation33_spill]]  ;;  %s6501_s10 = smov %s5263_s11 }
0x20fd   : > { %s6502_s11 = smov %s5535_s25  ;;  %s6503_s12 = smov %s5271_s13 }
0x2101   : > { %s31_s14 = sadd.s32 1, %s6498_s19  }
0x2102   : > { %p28_p4 = scmp.ge.s32.totalorder %s31_s14, 4   ;;  %s6504_s13 = smov %s6500_s29 }
0x2104   :  { %30 = sbr.rel (!%p28_p4) target bundleno = 17 (0x11), region = 175 }
0x210b   :  { %3865 = vsyncpa [#allocation4], 1 }
0x210c   :  { %3867 = vsyncpa [#allocation4 + $0x1], 1 }
0x210d   :  { %3868 = vsyncpa [#allocation7], 1 }
0x210e   :  { %3869 = vsyncpa [#allocation11], 1 }
0x210f   :  { %3871 = vsyncpa [#allocation11 + $0x1], 1 }
0x2110   :  { %3872 = vsyncpa [#allocation14], 1 }
0x2111   :  { %3874 = vsyncpa [#allocation14 + $0x1], 1 }
0x2112   :  { %3875 = vsyncpa [#allocation17], 1 }
0x2113   :  { %3877 = vsyncpa [#allocation17 + $0x1], 1 }
0x2114   :  { %3878 = vsyncpa [#allocation5], 1 }
0x2115   :  { %3880 = vsyncpa [#allocation5 + $0x1], 1 }

</bundles_post_ra>
